<compile_context>
chip_gen: v7x
topology: tpu7x:2x2x1
jax: 0.10.0
libtpu: 0.0.40
codegen_flags: <defaults>
</compile_context>

<pallas_src>
import functools

import numpy as np
import jax
import jax.numpy as jnp
from jax import lax
from jax.experimental import pallas as pl
from jax.experimental.pallas import tpu as pltpu

# ----------------------------------------------------------------------------
# db4 wavelet filters (pywt convention), used by pytorch_wavelets DWT/IDWT.
# ----------------------------------------------------------------------------
_REC_LO = np.array(
    [0.23037781330885523, 0.7148465705525415, 0.6308807679295904,
     -0.02798376941698385, -0.18703481171888114, 0.030841381835986965,
     0.032883011666982945, -0.010597401784997278], dtype=np.float64)
_L = _REC_LO.size
_DEC_LO = _REC_LO[::-1].copy()
_REC_HI = np.array([(-1.0) ** k * _REC_LO[_L - 1 - k] for k in range(_L)],
                   dtype=np.float64)
_DEC_HI = _REC_HI[::-1].copy()

# correlation filters for the analysis step (conv with reversed dec filter)
_F_DEC_LO = _DEC_LO[::-1].copy()
_F_DEC_HI = _DEC_HI[::-1].copy()


def _coeff_len(n):
    # pywt.dwt_coeff_len for non-periodization modes.
    return (n + _L - 1) // 2


def _reflect_idx(t, n):
    # half-sample "symmetric" extension index map (matches numpy / pywt 'symmetric').
    u = np.mod(t, 2 * n)
    return np.where(u < n, u, 2 * n - 1 - u)


# ----------------------------------------------------------------------------
# Pallas kernels: channel-mixing linears
# ----------------------------------------------------------------------------
_TM = 2048   # logical-row budget per grid step (memory-bound layers; fits VMEM on v7x)


def _row_tile(nrows, cap, granule=16):
    """Row-block size: <= cap, multiple of `granule` (safe for bf16 sublane packing),
    and chosen so the parallel grid axis has >= 2 steps whenever possible (v7x)."""
    if nrows <= granule:
        return nrows
    t = (((nrows + 1) // 2) + granule - 1) // granule * granule   # ~half, rounded up
    return max(granule, min(cap, t))


def _erf_poly(x):
    # Abramowitz & Stegun 7.1.26 polynomial erf (|err| < 1.5e-7).
    a1, a2, a3, a4, a5 = 0.254829592, -0.284496736, 1.421413741, -1.453152027, 1.061405429
    pc = 0.3275911
    ax = jnp.abs(x)
    d = 1.0 + pc * ax
    # EUP approx reciprocal + one Newton step (keeps the 1.5e-7 erf bound, frees VALU).
    t = pl.reciprocal(d, approx=True)
    t = t * (2.0 - d * t)
    poly = ((((a5 * t + a4) * t + a3) * t + a2) * t + a1) * t
    y = 1.0 - poly * jnp.exp(-ax * ax)
    return jnp.where(x >= 0, y, -y)


def _gelu_exact(x):
    return 0.5 * x * (1.0 + _erf_poly(x * 0.7071067811865476))


def _linear_kernel(x_ref, w_ref, b_ref, o_ref, *, use_gelu):
    x = x_ref[...].astype(jnp.float32)
    acc = jnp.dot(x, w_ref[...], preferred_element_type=jnp.float32) + b_ref[...]
    if use_gelu:
        acc = _gelu_exact(acc)
    o_ref[...] = acc.astype(o_ref.dtype)


def _linear_res_kernel(x_ref, w_ref, b_ref, r_ref, o_ref, *, use_gelu):
    x = x_ref[...].astype(jnp.float32)
    acc = jnp.dot(x, w_ref[...], preferred_element_type=jnp.float32)
    acc = acc + b_ref[...] + r_ref[...].astype(jnp.float32)
    if use_gelu:
        acc = _gelu_exact(acc)
    o_ref[...] = acc.astype(o_ref.dtype)


def pointwise_linear(x2d, w, b, residual=None, use_gelu=False, out_dtype=jnp.float32):
    """out = [gelu]( x2d @ w + b [+ residual] ), tiled over rows on the MXU.

    x2d / residual may be bf16 (HBM storage dtype); compute is f32 in-kernel.
    Narrow outputs (n < 128, n | 128) are packed g rows per vreg via a block-diagonal
    kron(I_g, W) weight so the stores are lane-dense and the MXU columns are filled.
    Ragged last row-blocks compute on undefined VMEM but their writes are masked
    (rows are independent — keep it that way: no cross-row reductions in these kernels).
    """
    m, k = x2d.shape
    n = w.shape[1]

    g = 1
    if n < 128 and (128 % n == 0):
        g = 128 // n
        while g > 1 and (m % g) != 0:
            g //= 2
    if g > 1:
        x2d = x2d.reshape(m // g, g * k)                    # free row-major reshape
        w = jnp.kron(jnp.eye(g, dtype=w.dtype), w)          # block-diagonal weight
        b = jnp.tile(b, g)
        if residual is not None:
            residual = residual.reshape(m // g, g * n)

    mg, kg = x2d.shape
    ng = w.shape[1]
    b2 = b.reshape(1, ng)
    tm = _row_tile(mg, cap=max(16, _TM // g))

    in_specs = [
        pl.BlockSpec((tm, kg), lambda i: (i, 0)),
        pl.BlockSpec((kg, ng), lambda i: (0, 0)),
        pl.BlockSpec((1, ng), lambda i: (0, 0)),
    ]
    args = [x2d, w, b2]
    if residual is None:
        kernel = functools.partial(_linear_kernel, use_gelu=use_gelu)
    else:
        in_specs.append(pl.BlockSpec((tm, ng), lambda i: (i, 0)))
        args.append(residual)
        kernel = functools.partial(_linear_res_kernel, use_gelu=use_gelu)

    out = pl.pallas_call(
        kernel,
        out_shape=jax.ShapeDtypeStruct((mg, ng), out_dtype),
        grid=(pl.cdiv(mg, tm),),
        in_specs=in_specs,
        out_specs=pl.BlockSpec((tm, ng), lambda i: (i, 0)),
        compiler_params=pltpu.CompilerParams(dimension_semantics=("parallel",)),
    )(*args)

    if g > 1:
        out = out.reshape(m, n)
    return out


def _proj_kernel(x_ref, w1_ref, b1_ref, w2_ref, b2_ref, o_ref):
    x = x_ref[...].astype(jnp.float32)
    h = jnp.dot(x, w1_ref[...], preferred_element_type=jnp.float32) + b1_ref[...]
    h = _gelu_exact(h)
    y = jnp.dot(h, w2_ref[...], preferred_element_type=jnp.float32) + b2_ref[...]
    o_ref[...] = y.astype(o_ref.dtype)


def fused_projection(x2d, w1, b1, w2, b2, out_dtype=jnp.float32):
    """fc2( gelu( fc1(x) ) ) fused in one kernel; the hidden tensor stays in VMEM.

    The input is g-row-packed via kron(I_g, W1) so the x block is a dense (tm, g*k)
    lane tile; the output carries g logical rows per vreg row (g x fewer masked stores
    than the naive (tm, 1) layout)."""
    m, k = x2d.shape
    hdim = w1.shape[1]
    nout = w2.shape[1]

    g = 1
    if k < 128 and (128 % k == 0):
        g = 128 // k
        while g > 1 and (m % g) != 0:
            g //= 2

    xg = x2d.reshape(m // g, g * k) if g > 1 else x2d
    w1g = jnp.kron(jnp.eye(g, dtype=w1.dtype), w1) if g > 1 else w1
    b1g = jnp.tile(b1, g) if g > 1 else b1
    w2g = jnp.kron(jnp.eye(g, dtype=w2.dtype), w2) if g > 1 else w2
    b2g = jnp.tile(b2, g) if g > 1 else b2

    mp = m // g
    kg = g * k
    hg = g * hdim
    og = g * nout
    tm = _row_tile(mp, cap=max(16, _TM // g))

    out = pl.pallas_call(
        _proj_kernel,
        out_shape=jax.ShapeDtypeStruct((mp, og), out_dtype),
        grid=(pl.cdiv(mp, tm),),
        in_specs=[
            pl.BlockSpec((tm, kg), lambda i: (i, 0)),
            pl.BlockSpec((kg, hg), lambda i: (0, 0)),
            pl.BlockSpec((1, hg), lambda i: (0, 0)),
            pl.BlockSpec((hg, og), lambda i: (0, 0)),
            pl.BlockSpec((1, og), lambda i: (0, 0)),
        ],
        out_specs=pl.BlockSpec((tm, og), lambda i: (i, 0)),
        compiler_params=pltpu.CompilerParams(dimension_semantics=("parallel",)),
    )(xg, w1g, b1g.reshape(1, hg), w2g, b2g.reshape(1, og))

    return out.reshape(m, nout)


# ----------------------------------------------------------------------------
# Pallas kernel: WaveConv2d per-pixel channel mixing
# ----------------------------------------------------------------------------
_TP = 128   # lane tile for pixel_mix (dense vregs; >=2 grid steps via the batch axis)


def _pixelmix_kernel(x_ref, w_ref, o_ref):
    # x: (1, Ci, TP) bf16, w: (Ci, Co, TP) bf16 -> out[0, o, t] = sum_i x[0,i,t]*w[i,o,t]
    x = x_ref[...].astype(jnp.float32)
    w = w_ref[...].astype(jnp.float32)
    ci = x.shape[1]
    acc = x[:, 0:1, :] * w[0:1, :, :]
    for i in range(1, ci):                      # Ci VPU FMAs over (1, Co, TP), f32
        acc = acc + x[:, i:i + 1, :] * w[i:i + 1, :, :]
    o_ref[...] = acc.astype(o_ref.dtype)


def pixel_mix(x_bcp, w_icp, out_dtype=jnp.float32):
    """Per-pixel channel mixing: (B,Ci,P) x (Ci,Co,P) -> (B,Co,P)
    (== torch einsum 'bixy,ioxy->boxy' with xy flattened into P).
    Pixel axis is padded to a multiple of 128 so every load/FMA/store is lane-dense."""
    b, ci, p = x_bcp.shape
    co = w_icp.shape[1]
    p_pad = ((p + _TP - 1) // _TP) * _TP
    if p_pad != p:
        x_bcp = jnp.pad(x_bcp, ((0, 0), (0, 0), (0, p_pad - p)))
        w_icp = jnp.pad(w_icp, ((0, 0), (0, 0), (0, p_pad - p)))
    out = pl.pallas_call(
        _pixelmix_kernel,
        out_shape=jax.ShapeDtypeStruct((b, co, p_pad), out_dtype),
        grid=(b, p_pad // _TP),
        in_specs=[
            pl.BlockSpec((1, ci, _TP), lambda bi, pi: (bi, 0, pi)),
            pl.BlockSpec((ci, co, _TP), lambda bi, pi: (0, 0, pi)),
        ],
        out_specs=pl.BlockSpec((1, co, _TP), lambda bi, pi: (bi, 0, pi)),
        compiler_params=pltpu.CompilerParams(
            dimension_semantics=("parallel", "parallel")),
    )(x_bcp, w_icp)
    return out[:, :, :p]


# ----------------------------------------------------------------------------
# DWT / IDWT (db4, mode='symmetric', J=5) — pytorch_wavelets conventions, NHWC.
# Plain-JAX glue: reversed-slice symmetric extension (no gather) + 8-tap strided-slice
# FMAs (O(n*L) per axis); computed in f32 regardless of the bf16 activation storage.
# ----------------------------------------------------------------------------
def _sym_ext(x, axis, p_left, p_right):
    """Half-sample symmetric extension via reversed slices + concat (no jnp.take)."""
    n = x.shape[axis]
    if p_left <= n and p_right <= n:
        parts = []
        if p_left > 0:
            parts.append(lax.rev(lax.slice_in_dim(x, 0, p_left, axis=axis), (axis,)))
        parts.append(x)
        if p_right > 0:
            parts.append(lax.rev(lax.slice_in_dim(x, n - p_right, n, axis=axis), (axis,)))
        return jnp.concatenate(parts, axis=axis)
    # fallback (multi-reflection) — not hit for db4 with n >= 7
    t = np.arange(-p_left, n + p_right)
    idx = jnp.asarray(_reflect_idx(t, n), dtype=jnp.int32)
    return jnp.take(x, idx, axis=axis)


def _dwt1d(x, axis):
    """Single-level db4 symmetric-mode analysis along `axis` -> (lo, hi)."""
    n = x.shape[axis]
    out = _coeff_len(n)
    p = 2 * (out - 1) - n + _L                  # pytorch_wavelets afb1d pad amount
    p_left, p_right = p // 2, (p + 1) // 2
    xe = _sym_ext(x, axis, p_left, p_right)     # symmetric extension, length n + p
    lo = None
    hi = None
    for j in range(_L):
        win = lax.slice_in_dim(xe, j, j + 2 * out - 1, stride=2, axis=axis)
        flo = float(_F_DEC_LO[j])
        fhi = float(_F_DEC_HI[j])
        lo = flo * win if lo is None else lo + flo * win
        hi = fhi * win if hi is None else hi + fhi * win
    return lo, hi


def _idwt1d(lo, hi, axis):
    """Single-level db4 synthesis along `axis` (conv_transpose, crop L-2 each side)."""
    n = lo.shape[axis]
    lrec = 2 * n - (_L - 2)                     # 2n - 6
    z = jnp.zeros_like(lo)
    new_shape = list(lo.shape)
    new_shape[axis] = 2 * n
    u_lo = jnp.stack([lo, z], axis=axis + 1).reshape(new_shape)   # upsample by 2
    u_hi = jnp.stack([hi, z], axis=axis + 1).reshape(new_shape)
    pad_cfg = [(0, 0)] * lo.ndim
    pad_cfg[axis] = (1, 0)
    u_lo = jnp.pad(u_lo, pad_cfg)               # length 2n + 1
    u_hi = jnp.pad(u_hi, pad_cfg)
    rec = None
    for k in range(_L):
        s = (_L - 1) - k
        term = (float(_REC_LO[k]) * lax.slice_in_dim(u_lo, s, s + lrec, axis=axis)
                + float(_REC_HI[k]) * lax.slice_in_dim(u_hi, s, s + lrec, axis=axis))
        rec = term if rec is None else rec + term
    return rec


def _dwt2(x, j_levels):
    # x: (B, H, W, C).  Filter along W (axis 2) first, then H (axis 1),
    # matching pytorch_wavelets afb2d (dim=3 then dim=2 on NCHW).
    yh = []
    ll = x
    for _ in range(j_levels):
        lo_w, hi_w = _dwt1d(ll, axis=2)
        ll_new, lh = _dwt1d(lo_w, axis=1)       # lh = (w-lo, h-hi): subband index 0
        hl, hh = _dwt1d(hi_w, axis=1)           # hl = (w-hi, h-lo), hh = (w-hi, h-hi)
        yh.append((lh, hl, hh))
        ll = ll_new
    return ll, yh


def _idwt2(ll, yh):
    for (lh, hl, hh) in yh[::-1]:
        if ll.shape[1] > lh.shape[1]:
            ll = ll[:, :-1]
        if ll.shape[2] > lh.shape[2]:
            ll = ll[:, :, :-1]
        lo = _idwt1d(ll, lh, axis=1)
        hi = _idwt1d(hl, hh, axis=1)
        ll = _idwt1d(lo, hi, axis=2)
    return ll


def wave_conv2d(x, w1, w2, j_levels=5):
    """WaveConv2d.forward: DWT -> per-pixel channel mix (Pallas, ll & lh fused) -> IDWT.

    x may be bf16; the wavelet filtering runs in f32.  w1/w2 are stored bf16 in HBM
    (dominant byte stream of pixel_mix) and upconverted in-kernel."""
    b = x.shape[0]
    c = x.shape[3]
    ll, yh = _dwt2(x.astype(jnp.float32), j_levels)
    m1, m2 = ll.shape[1], ll.shape[2]
    p = m1 * m2
    lh, hl, hh = yh[-1]

    def to_cp(a):                                            # (B,m1,m2,C) -> (B,C,P) bf16
        return jnp.transpose(a.reshape(b, p, c), (0, 2, 1)).astype(jnp.bfloat16)

    # fuse the ll (weights1) and lh (weights2) mixes into one kernel along the pixel axis
    xs = jnp.concatenate([to_cp(ll), to_cp(lh)], axis=2)                    # (B, C, 2P)
    ws = jnp.concatenate([w1.reshape(c, c, p), w2.reshape(c, c, p)], axis=2)  # (C, C, 2P)
    mixed = pixel_mix(xs, ws, out_dtype=jnp.float32)                        # (B, C, 2P)

    def from_cp(a_cp):                                       # (B,C,P) -> (B,m1,m2,C)
        return jnp.transpose(a_cp, (0, 2, 1)).reshape(b, m1, m2, c)

    out_ll = from_cp(mixed[:, :, :p])
    new_lh = from_cp(mixed[:, :, p:])
    yh = yh[:-1] + [(new_lh, hl, hh)]
    return _idwt2(out_ll, yh)


# ----------------------------------------------------------------------------
# WNO2d forward
# ----------------------------------------------------------------------------
def wno2d_forward(params, x):
    # x: (B, sx, sy, 1) float32
    b, sx, sy, _ = x.shape
    width = params['fc0_w'].shape[1]

    gridx = jnp.broadcast_to(
        jnp.linspace(0.0, 360.0, sx, dtype=jnp.float32).reshape(1, sx, 1, 1),
        (b, sx, sy, 1))
    gridy = jnp.broadcast_to(
        jnp.linspace(90.0, -90.0, sy, dtype=jnp.float32).reshape(1, 1, sy, 1),
        (b, sx, sy, 1))
    h = jnp.concatenate([x, gridx, gridy], axis=-1)             # (B, sx, sy, 3)

    # fc0 lift; activations stored bf16 in HBM from here on (compute stays f32 in-kernel)
    h = pointwise_linear(h.reshape(b * sx * sy, 3), params['fc0_w'], params['fc0_b'],
                         out_dtype=jnp.bfloat16)
    h = h.reshape(b, sx, sy, width)
    # torch: F.pad(x, [0, 1, 0, 1]) in NCHW == right-pad X and Y by 1 in NHWC.
    h = jnp.pad(h, ((0, 0), (0, 1), (0, 1), (0, 0)))
    hp, wp = sx + 1, sy + 1

    for k in range(4):
        x1 = wave_conv2d(h, params[f'conv{k}_w1'], params[f'conv{k}_w2'], j_levels=5)
        assert x1.shape == h.shape
        x1 = x1.astype(jnp.bfloat16)                # fused into the IDWT's last pass
        h2d = h.reshape(b * hp * wp, width)
        x1_2d = x1.reshape(b * hp * wp, width)
        # fused:  gelu( x @ W_k + b_k + waveconv(x) )   (no gelu on the last block)
        h = pointwise_linear(h2d, params[f'w{k}_w'], params[f'w{k}_b'],
                             residual=x1_2d, use_gelu=(k < 3),
                             out_dtype=jnp.bfloat16).reshape(b, hp, wp, width)

    # fc1 -> GELU -> fc2 is pointwise per pixel, so run it on the padded grid (row count
    # divisible by the packing) and crop afterwards — identical to torch's crop-then-fc.
    m = b * hp * wp
    out = fused_projection(h.reshape(m, width), params['fc1_w'], params['fc1_b'],
                           params['fc2_w'], params['fc2_b'], out_dtype=jnp.float32)
    out = out.reshape(b, hp, wp, 1)[:, :sx, :sy, :]             # drop the padding
    return out


# ----------------------------------------------------------------------------
# Deterministic parameter init (shapes mirror WNO2d.__init__; random, not a checkpoint)
# ----------------------------------------------------------------------------
def init_params(key, width, modes1, modes2, hidden=128):
    keys = iter(jax.random.split(key, 32))

    def lin(in_f, out_f):
        bound = 1.0 / np.sqrt(in_f)
        w = jax.random.uniform(next(keys), (in_f, out_f), jnp.float32, -bound, bound)
        bb = jax.random.uniform(next(keys), (out_f,), jnp.float32, -bound, bound)
        return w, bb

    params = {}
    params['fc0_w'], params['fc0_b'] = lin(3, width)
    scale = 1.0 / (width * width)
    for k in range(4):
        # WaveConv2d weights stored bf16 (halves pixel_mix's dominant HBM stream)
        params[f'conv{k}_w1'] = (scale * jax.random.uniform(
            next(keys), (width, width, modes1, modes2), jnp.float32)).astype(jnp.bfloat16)
        params[f'conv{k}_w2'] = (scale * jax.random.uniform(
            next(keys), (width, width, modes1, modes2), jnp.float32)).astype(jnp.bfloat16)
        params[f'w{k}_w'], params[f'w{k}_b'] = lin(width, width)
    params['fc1_w'], params['fc1_b'] = lin(width, hidden)
    params['fc2_w'], params['fc2_b'] = lin(hidden, 1)
    return params


if __name__ == "__main__":
    key = jax.random.PRNGKey(0)
    k_x, k_p = jax.random.split(key)

    B, S = 2, 15      # odd spatial size so the padded size (S+1)=16 is even and the
    WIDTH = 32        # multi-level symmetric db4 DWT/IDWT reconstructs shape-exactly.
    J = 5
    n = S + 1
    for _ in range(J):
        n = _coeff_len(n)
    MODES1 = MODES2 = n   # level-J approximation size (== 7 for S=15), as the module requires

    x = jax.random.normal(k_x, (B, S, S, 1), dtype=jnp.float32)
    params = init_params(k_p, WIDTH, MODES1, MODES2)

    fwd = jax.jit(wno2d_forward)
    out = jax.block_until_ready(fwd(params, x))
    assert out.shape == (B, S, S, 1)
    assert bool(jnp.all(jnp.isfinite(out)))
    print("KERNEL_OK")
</pallas_src>

<mosaic_0001>
module attributes {stable_mosaic.version = 11 : i64} {
  func.func @_linear_kernel(%arg0: i32, %arg1: memref<128x6xf32, #tpu.memory_space<vmem>>, %arg2: memref<6x64xf32, #tpu.memory_space<vmem>>, %arg3: memref<1x64xf32, #tpu.memory_space<vmem>>, %arg4: memref<128x64xbf16, #tpu.memory_space<vmem>>) attributes {dimension_semantics = [#tpu.dimension_semantics<parallel>], iteration_bounds = array<i64: 2>, scalar_prefetch = 0 : i64, scratch_operands = 0 : i64, tpu.core_type = #tpu.core_type<tc>, window_params = [{transform_indices = @transform_0, window_bounds = array<i64: 128, 6>}, {pipeline_mode = #tpu.pipeline_mode<synchronous>, transform_indices = @transform_1, window_bounds = array<i64: 6, 64>}, {pipeline_mode = #tpu.pipeline_mode<synchronous>, transform_indices = @transform_2, window_bounds = array<i64: 1, 64>}, {transform_indices = @transform_3, window_bounds = array<i64: 128, 64>}]} {
    %c0 = arith.constant 0 : index
    %c0_0 = arith.constant 0 : index
    %0 = vector.load %arg1[%c0, %c0_0] : memref<128x6xf32, #tpu.memory_space<vmem>>, vector<128x6xf32>
    %c0_1 = arith.constant 0 : index
    %c0_2 = arith.constant 0 : index
    %1 = vector.load %arg2[%c0_1, %c0_2] : memref<6x64xf32, #tpu.memory_space<vmem>>, vector<6x64xf32>
    %cst = arith.constant dense<0.000000e+00> : vector<128x64xf32>
    %2 = tpu.matmul %0, %1, %cst {dimension_numbers = #tpu.dot_dimension_numbers<[1], [0], [0], [1], [0, 0, 1, 1], [], []>} : vector<128x6xf32>, vector<6x64xf32>, vector<128x64xf32> -> vector<128x64xf32>
    %c0_3 = arith.constant 0 : index
    %c0_4 = arith.constant 0 : index
    %3 = vector.load %arg3[%c0_3, %c0_4] : memref<1x64xf32, #tpu.memory_space<vmem>>, vector<1x64xf32>
    %4 = vector.broadcast %3 : vector<1x64xf32> to vector<128x64xf32>
    %5 = arith.addf %2, %4 : vector<128x64xf32>
    %6 = arith.truncf %5 : vector<128x64xf32> to vector<128x64xbf16>
    %c0_5 = arith.constant 0 : index
    %c0_6 = arith.constant 0 : index
    %7 = vector.load %arg4[%c0_5, %c0_6] : memref<128x64xbf16, #tpu.memory_space<vmem>>, vector<128x64xbf16>
    tpu.vector_store %arg4[%c0_5, %c0_6], %6 {strides = array<i32>} : memref<128x64xbf16, #tpu.memory_space<vmem>>, vector<128x64xbf16>,
    return
  }
  func.func @transform_0(%arg0: i32) -> (i32, i32) {
    %c0_i32 = arith.constant 0 : i32
    %c0_i32_0 = arith.constant 0 : i32
    return %arg0, %c0_i32 : i32, i32
  }
  func.func @transform_1(%arg0: i32) -> (i32, i32) {
    %c0_i32 = arith.constant 0 : i32
    %c0_i32_0 = arith.constant 0 : i32
    %c0_i32_1 = arith.constant 0 : i32
    return %c0_i32, %c0_i32_0 : i32, i32
  }
  func.func @transform_2(%arg0: i32) -> (i32, i32) {
    %c0_i32 = arith.constant 0 : i32
    %c0_i32_0 = arith.constant 0 : i32
    %c0_i32_1 = arith.constant 0 : i32
    return %c0_i32, %c0_i32_0 : i32, i32
  }
  func.func @transform_3(%arg0: i32) -> (i32, i32) {
    %c0_i32 = arith.constant 0 : i32
    %c0_i32_0 = arith.constant 0 : i32
    return %arg0, %c0_i32 : i32, i32
  }
}

module attributes {stable_mosaic.version = 11 : i64} {
  func.func @_pixelmix_kernel(%arg0: i32, %arg1: i32, %arg2: memref<1x32x128xbf16, #tpu.memory_space<vmem>>, %arg3: memref<32x32x128xbf16, #tpu.memory_space<vmem>>, %arg4: memref<1x32x128xf32, #tpu.memory_space<vmem>>) attributes {dimension_semantics = [#tpu.dimension_semantics<parallel>, #tpu.dimension_semantics<parallel>], iteration_bounds = array<i64: 2, 1>, scalar_prefetch = 0 : i64, scratch_operands = 0 : i64, tpu.core_type = #tpu.core_type<tc>, window_params = [{transform_indices = @transform_0, window_bounds = array<i64: 1, 32, 128>}, {transform_indices = @transform_1, window_bounds = array<i64: 32, 32, 128>}, {transform_indices = @transform_2, window_bounds = array<i64: 1, 32, 128>}]} {
    %c0 = arith.constant 0 : index
    %c0_0 = arith.constant 0 : index
    %c0_1 = arith.constant 0 : index
    %0 = vector.load %arg2[%c0, %c0_0, %c0_1] : memref<1x32x128xbf16, #tpu.memory_space<vmem>>, vector<1x32x128xbf16>
    %1 = arith.extf %0 : vector<1x32x128xbf16> to vector<1x32x128xf32>
    %c0_2 = arith.constant 0 : index
    %c0_3 = arith.constant 0 : index
    %c0_4 = arith.constant 0 : index
    %2 = vector.load %arg3[%c0_2, %c0_3, %c0_4] : memref<32x32x128xbf16, #tpu.memory_space<vmem>>, vector<32x32x128xbf16>
    %3 = arith.extf %2 : vector<32x32x128xbf16> to vector<32x32x128xf32>
    %4 = vector.extract_strided_slice %1 {offsets = [0, 0, 0], sizes = [1, 1, 128], strides = [1, 1, 1]} : vector<1x32x128xf32> to vector<1x1x128xf32>
    %5 = vector.extract_strided_slice %3 {offsets = [0, 0, 0], sizes = [1, 32, 128], strides = [1, 1, 1]} : vector<32x32x128xf32> to vector<1x32x128xf32>
    %6 = vector.broadcast %4 : vector<1x1x128xf32> to vector<1x32x128xf32>
    %7 = arith.mulf %6, %5 : vector<1x32x128xf32>
    %8 = vector.extract_strided_slice %1 {offsets = [0, 1, 0], sizes = [1, 1, 128], strides = [1, 1, 1]} : vector<1x32x128xf32> to vector<1x1x128xf32>
    %9 = vector.extract_strided_slice %3 {offsets = [1, 0, 0], sizes = [1, 32, 128], strides = [1, 1, 1]} : vector<32x32x128xf32> to vector<1x32x128xf32>
    %10 = vector.broadcast %8 : vector<1x1x128xf32> to vector<1x32x128xf32>
    %11 = arith.mulf %10, %9 : vector<1x32x128xf32>
    %12 = arith.addf %7, %11 : vector<1x32x128xf32>
    %13 = vector.extract_strided_slice %1 {offsets = [0, 2, 0], sizes = [1, 1, 128], strides = [1, 1, 1]} : vector<1x32x128xf32> to vector<1x1x128xf32>
    %14 = vector.extract_strided_slice %3 {offsets = [2, 0, 0], sizes = [1, 32, 128], strides = [1, 1, 1]} : vector<32x32x128xf32> to vector<1x32x128xf32>
    %15 = vector.broadcast %13 : vector<1x1x128xf32> to vector<1x32x128xf32>
    %16 = arith.mulf %15, %14 : vector<1x32x128xf32>
    %17 = arith.addf %12, %16 : vector<1x32x128xf32>
    %18 = vector.extract_strided_slice %1 {offsets = [0, 3, 0], sizes = [1, 1, 128], strides = [1, 1, 1]} : vector<1x32x128xf32> to vector<1x1x128xf32>
    %19 = vector.extract_strided_slice %3 {offsets = [3, 0, 0], sizes = [1, 32, 128], strides = [1, 1, 1]} : vector<32x32x128xf32> to vector<1x32x128xf32>
    %20 = vector.broadcast %18 : vector<1x1x128xf32> to vector<1x32x128xf32>
    %21 = arith.mulf %20, %19 : vector<1x32x128xf32>
    %22 = arith.addf %17, %21 : vector<1x32x128xf32>
    %23 = vector.extract_strided_slice %1 {offsets = [0, 4, 0], sizes = [1, 1, 128], strides = [1, 1, 1]} : vector<1x32x128xf32> to vector<1x1x128xf32>
    %24 = vector.extract_strided_slice %3 {offsets = [4, 0, 0], sizes = [1, 32, 128], strides = [1, 1, 1]} : vector<32x32x128xf32> to vector<1x32x128xf32>
    %25 = vector.broadcast %23 : vector<1x1x128xf32> to vector<1x32x128xf32>
    %26 = arith.mulf %25, %24 : vector<1x32x128xf32>
    %27 = arith.addf %22, %26 : vector<1x32x128xf32>
    %28 = vector.extract_strided_slice %1 {offsets = [0, 5, 0], sizes = [1, 1, 128], strides = [1, 1, 1]} : vector<1x32x128xf32> to vector<1x1x128xf32>
    %29 = vector.extract_strided_slice %3 {offsets = [5, 0, 0], sizes = [1, 32, 128], strides = [1, 1, 1]} : vector<32x32x128xf32> to vector<1x32x128xf32>
    %30 = vector.broadcast %28 : vector<1x1x128xf32> to vector<1x32x128xf32>
    %31 = arith.mulf %30, %29 : vector<1x32x128xf32>
    %32 = arith.addf %27, %31 : vector<1x32x128xf32>
    %33 = vector.extract_strided_slice %1 {offsets = [0, 6, 0], sizes = [1, 1, 128], strides = [1, 1, 1]} : vector<1x32x128xf32> to vector<1x1x128xf32>
    %34 = vector.extract_strided_slice %3 {offsets = [6, 0, 0], sizes = [1, 32, 128], strides = [1, 1, 1]} : vector<32x32x128xf32> to vector<1x32x128xf32>
    %35 = vector.broadcast %33 : vector<1x1x128xf32> to vector<1x32x128xf32>
    %36 = arith.mulf %35, %34 : vector<1x32x128xf32>
    %37 = arith.addf %32, %36 : vector<1x32x128xf32>
    %38 = vector.extract_strided_slice %1 {offsets = [0, 7, 0], sizes = [1, 1, 128], strides = [1, 1, 1]} : vector<1x32x128xf32> to vector<1x1x128xf32>
    %39 = vector.extract_strided_slice %3 {offsets = [7, 0, 0], sizes = [1, 32, 128], strides = [1, 1, 1]} : vector<32x32x128xf32> to vector<1x32x128xf32>
    %40 = vector.broadcast %38 : vector<1x1x128xf32> to vector<1x32x128xf32>
    %41 = arith.mulf %40, %39 : vector<1x32x128xf32>
    %42 = arith.addf %37, %41 : vector<1x32x128xf32>
    %43 = vector.extract_strided_slice %1 {offsets = [0, 8, 0], sizes = [1, 1, 128], strides = [1, 1, 1]} : vector<1x32x128xf32> to vector<1x1x128xf32>
    %44 = vector.extract_strided_slice %3 {offsets = [8, 0, 0], sizes = [1, 32, 128], strides = [1, 1, 1]} : vector<32x32x128xf32> to vector<1x32x128xf32>
    %45 = vector.broadcast %43 : vector<1x1x128xf32> to vector<1x32x128xf32>
    %46 = arith.mulf %45, %44 : vector<1x32x128xf32>
    %47 = arith.addf %42, %46 : vector<1x32x128xf32>
    %48 = vector.extract_strided_slice %1 {offsets = [0, 9, 0], sizes = [1, 1, 128], strides = [1, 1, 1]} : vector<1x32x128xf32> to vector<1x1x128xf32>
    %49 = vector.extract_strided_slice %3 {offsets = [9, 0, 0], sizes = [1, 32, 128], strides = [1, 1, 1]} : vector<32x32x128xf32> to vector<1x32x128xf32>
    %50 = vector.broadcast %48 : vector<1x1x128xf32> to vector<1x32x128xf32>
    %51 = arith.mulf %50, %49 : vector<1x32x128xf32>
    %52 = arith.addf %47, %51 : vector<1x32x128xf32>
    %53 = vector.extract_strided_slice %1 {offsets = [0, 10, 0], sizes = [1, 1, 128], strides = [1, 1, 1]} : vector<1x32x128xf32> to vector<1x1x128xf32>
    %54 = vector.extract_strided_slice %3 {offsets = [10, 0, 0], sizes = [1, 32, 128], strides = [1, 1, 1]} : vector<32x32x128xf32> to vector<1x32x128xf32>
    %55 = vector.broadcast %53 : vector<1x1x128xf32> to vector<1x32x128xf32>
    %56 = arith.mulf %55, %54 : vector<1x32x128xf32>
    %57 = arith.addf %52, %56 : vector<1x32x128xf32>
    %58 = vector.extract_strided_slice %1 {offsets = [0, 11, 0], sizes = [1, 1, 128], strides = [1, 1, 1]} : vector<1x32x128xf32> to vector<1x1x128xf32>
    %59 = vector.extract_strided_slice %3 {offsets = [11, 0, 0], sizes = [1, 32, 128], strides = [1, 1, 1]} : vector<32x32x128xf32> to vector<1x32x128xf32>
    %60 = vector.broadcast %58 : vector<1x1x128xf32> to vector<1x32x128xf32>
    %61 = arith.mulf %60, %59 : vector<1x32x128xf32>
    %62 = arith.addf %57, %61 : vector<1x32x128xf32>
    %63 = vector.extract_strided_slice %1 {offsets = [0, 12, 0], sizes = [1, 1, 128], strides = [1, 1, 1]} : vector<1x32x128xf32> to vector<1x1x128xf32>
    %64 = vector.extract_strided_slice %3 {offsets = [12, 0, 0], sizes = [1, 32, 128], strides = [1, 1, 1]} : vector<32x32x128xf32> to vector<1x32x128xf32>
    %65 = vector.broadcast %63 : vector<1x1x128xf32> to vector<1x32x128xf32>
    %66 = arith.mulf %65, %64 : vector<1x32x128xf32>
    %67 = arith.addf %62, %66 : vector<1x32x128xf32>
    %68 = vector.extract_strided_slice %1 {offsets = [0, 13, 0], sizes = [1, 1, 128], strides = [1, 1, 1]} : vector<1x32x128xf32> to vector<1x1x128xf32>
    %69 = vector.extract_strided_slice %3 {offsets = [13, 0, 0], sizes = [1, 32, 128], strides = [1, 1, 1]} : vector<32x32x128xf32> to vector<1x32x128xf32>
    %70 = vector.broadcast %68 : vector<1x1x128xf32> to vector<1x32x128xf32>
    %71 = arith.mulf %70, %69 : vector<1x32x128xf32>
    %72 = arith.addf %67, %71 : vector<1x32x128xf32>
    %73 = vector.extract_strided_slice %1 {offsets = [0, 14, 0], sizes = [1, 1, 128], strides = [1, 1, 1]} : vector<1x32x128xf32> to vector<1x1x128xf32>
    %74 = vector.extract_strided_slice %3 {offsets = [14, 0, 0], sizes = [1, 32, 128], strides = [1, 1, 1]} : vector<32x32x128xf32> to vector<1x32x128xf32>
    %75 = vector.broadcast %73 : vector<1x1x128xf32> to vector<1x32x128xf32>
    %76 = arith.mulf %75, %74 : vector<1x32x128xf32>
    %77 = arith.addf %72, %76 : vector<1x32x128xf32>
    %78 = vector.extract_strided_slice %1 {offsets = [0, 15, 0], sizes = [1, 1, 128], strides = [1, 1, 1]} : vector<1x32x128xf32> to vector<1x1x128xf32>
    %79 = vector.extract_strided_slice %3 {offsets = [15, 0, 0], sizes = [1, 32, 128], strides = [1, 1, 1]} : vector<32x32x128xf32> to vector<1x32x128xf32>
    %80 = vector.broadcast %78 : vector<1x1x128xf32> to vector<1x32x128xf32>
    %81 = arith.mulf %80, %79 : vector<1x32x128xf32>
    %82 = arith.addf %77, %81 : vector<1x32x128xf32>
    %83 = vector.extract_strided_slice %1 {offsets = [0, 16, 0], sizes = [1, 1, 128], strides = [1, 1, 1]} : vector<1x32x128xf32> to vector<1x1x128xf32>
    %84 = vector.extract_strided_slice %3 {offsets = [16, 0, 0], sizes = [1, 32, 128], strides = [1, 1, 1]} : vector<32x32x128xf32> to vector<1x32x128xf32>
    %85 = vector.broadcast %83 : vector<1x1x128xf32> to vector<1x32x128xf32>
    %86 = arith.mulf %85, %84 : vector<1x32x128xf32>
    %87 = arith.addf %82, %86 : vector<1x32x128xf32>
    %88 = vector.extract_strided_slice %1 {offsets = [0, 17, 0], sizes = [1, 1, 128], strides = [1, 1, 1]} : vector<1x32x128xf32> to vector<1x1x128xf32>
    %89 = vector.extract_strided_slice %3 {offsets = [17, 0, 0], sizes = [1, 32, 128], strides = [1, 1, 1]} : vector<32x32x128xf32> to vector<1x32x128xf32>
    %90 = vector.broadcast %88 : vector<1x1x128xf32> to vector<1x32x128xf32>
    %91 = arith.mulf %90, %89 : vector<1x32x128xf32>
    %92 = arith.addf %87, %91 : vector<1x32x128xf32>
    %93 = vector.extract_strided_slice %1 {offsets = [0, 18, 0], sizes = [1, 1, 128], strides = [1, 1, 1]} : vector<1x32x128xf32> to vector<1x1x128xf32>
    %94 = vector.extract_strided_slice %3 {offsets = [18, 0, 0], sizes = [1, 32, 128], strides = [1, 1, 1]} : vector<32x32x128xf32> to vector<1x32x128xf32>
    %95 = vector.broadcast %93 : vector<1x1x128xf32> to vector<1x32x128xf32>
    %96 = arith.mulf %95, %94 : vector<1x32x128xf32>
    %97 = arith.addf %92, %96 : vector<1x32x128xf32>
    %98 = vector.extract_strided_slice %1 {offsets = [0, 19, 0], sizes = [1, 1, 128], strides = [1, 1, 1]} : vector<1x32x128xf32> to vector<1x1x128xf32>
    %99 = vector.extract_strided_slice %3 {offsets = [19, 0, 0], sizes = [1, 32, 128], strides = [1, 1, 1]} : vector<32x32x128xf32> to vector<1x32x128xf32>
    %100 = vector.broadcast %98 : vector<1x1x128xf32> to vector<1x32x128xf32>
    %101 = arith.mulf %100, %99 : vector<1x32x128xf32>
    %102 = arith.addf %97, %101 : vector<1x32x128xf32>
    %103 = vector.extract_strided_slice %1 {offsets = [0, 20, 0], sizes = [1, 1, 128], strides = [1, 1, 1]} : vector<1x32x128xf32> to vector<1x1x128xf32>
    %104 = vector.extract_strided_slice %3 {offsets = [20, 0, 0], sizes = [1, 32, 128], strides = [1, 1, 1]} : vector<32x32x128xf32> to vector<1x32x128xf32>
    %105 = vector.broadcast %103 : vector<1x1x128xf32> to vector<1x32x128xf32>
    %106 = arith.mulf %105, %104 : vector<1x32x128xf32>
    %107 = arith.addf %102, %106 : vector<1x32x128xf32>
    %108 = vector.extract_strided_slice %1 {offsets = [0, 21, 0], sizes = [1, 1, 128], strides = [1, 1, 1]} : vector<1x32x128xf32> to vector<1x1x128xf32>
    %109 = vector.extract_strided_slice %3 {offsets = [21, 0, 0], sizes = [1, 32, 128], strides = [1, 1, 1]} : vector<32x32x128xf32> to vector<1x32x128xf32>
    %110 = vector.broadcast %108 : vector<1x1x128xf32> to vector<1x32x128xf32>
    %111 = arith.mulf %110, %109 : vector<1x32x128xf32>
    %112 = arith.addf %107, %111 : vector<1x32x128xf32>
    %113 = vector.extract_strided_slice %1 {offsets = [0, 22, 0], sizes = [1, 1, 128], strides = [1, 1, 1]} : vector<1x32x128xf32> to vector<1x1x128xf32>
    %114 = vector.extract_strided_slice %3 {offsets = [22, 0, 0], sizes = [1, 32, 128], strides = [1, 1, 1]} : vector<32x32x128xf32> to vector<1x32x128xf32>
    %115 = vector.broadcast %113 : vector<1x1x128xf32> to vector<1x32x128xf32>
    %116 = arith.mulf %115, %114 : vector<1x32x128xf32>
    %117 = arith.addf %112, %116 : vector<1x32x128xf32>
    %118 = vector.extract_strided_slice %1 {offsets = [0, 23, 0], sizes = [1, 1, 128], strides = [1, 1, 1]} : vector<1x32x128xf32> to vector<1x1x128xf32>
    %119 = vector.extract_strided_slice %3 {offsets = [23, 0, 0], sizes = [1, 32, 128], strides = [1, 1, 1]} : vector<32x32x128xf32> to vector<1x32x128xf32>
    %120 = vector.broadcast %118 : vector<1x1x128xf32> to vector<1x32x128xf32>
    %121 = arith.mulf %120, %119 : vector<1x32x128xf32>
    %122 = arith.addf %117, %121 : vector<1x32x128xf32>
    %123 = vector.extract_strided_slice %1 {offsets = [0, 24, 0], sizes = [1, 1, 128], strides = [1, 1, 1]} : vector<1x32x128xf32> to vector<1x1x128xf32>
    %124 = vector.extract_strided_slice %3 {offsets = [24, 0, 0], sizes = [1, 32, 128], strides = [1, 1, 1]} : vector<32x32x128xf32> to vector<1x32x128xf32>
    %125 = vector.broadcast %123 : vector<1x1x128xf32> to vector<1x32x128xf32>
    %126 = arith.mulf %125, %124 : vector<1x32x128xf32>
    %127 = arith.addf %122, %126 : vector<1x32x128xf32>
    %128 = vector.extract_strided_slice %1 {offsets = [0, 25, 0], sizes = [1, 1, 128], strides = [1, 1, 1]} : vector<1x32x128xf32> to vector<1x1x128xf32>
    %129 = vector.extract_strided_slice %3 {offsets = [25, 0, 0], sizes = [1, 32, 128], strides = [1, 1, 1]} : vector<32x32x128xf32> to vector<1x32x128xf32>
    %130 = vector.broadcast %128 : vector<1x1x128xf32> to vector<1x32x128xf32>
    %131 = arith.mulf %130, %129 : vector<1x32x128xf32>
    %132 = arith.addf %127, %131 : vector<1x32x128xf32>
    %133 = vector.extract_strided_slice %1 {offsets = [0, 26, 0], sizes = [1, 1, 128], strides = [1, 1, 1]} : vector<1x32x128xf32> to vector<1x1x128xf32>
    %134 = vector.extract_strided_slice %3 {offsets = [26, 0, 0], sizes = [1, 32, 128], strides = [1, 1, 1]} : vector<32x32x128xf32> to vector<1x32x128xf32>
    %135 = vector.broadcast %133 : vector<1x1x128xf32> to vector<1x32x128xf32>
    %136 = arith.mulf %135, %134 : vector<1x32x128xf32>
    %137 = arith.addf %132, %136 : vector<1x32x128xf32>
    %138 = vector.extract_strided_slice %1 {offsets = [0, 27, 0], sizes = [1, 1, 128], strides = [1, 1, 1]} : vector<1x32x128xf32> to vector<1x1x128xf32>
    %139 = vector.extract_strided_slice %3 {offsets = [27, 0, 0], sizes = [1, 32, 128], strides = [1, 1, 1]} : vector<32x32x128xf32> to vector<1x32x128xf32>
    %140 = vector.broadcast %138 : vector<1x1x128xf32> to vector<1x32x128xf32>
    %141 = arith.mulf %140, %139 : vector<1x32x128xf32>
    %142 = arith.addf %137, %141 : vector<1x32x128xf32>
    %143 = vector.extract_strided_slice %1 {offsets = [0, 28, 0], sizes = [1, 1, 128], strides = [1, 1, 1]} : vector<1x32x128xf32> to vector<1x1x128xf32>
    %144 = vector.extract_strided_slice %3 {offsets = [28, 0, 0], sizes = [1, 32, 128], strides = [1, 1, 1]} : vector<32x32x128xf32> to vector<1x32x128xf32>
    %145 = vector.broadcast %143 : vector<1x1x128xf32> to vector<1x32x128xf32>
    %146 = arith.mulf %145, %144 : vector<1x32x128xf32>
    %147 = arith.addf %142, %146 : vector<1x32x128xf32>
    %148 = vector.extract_strided_slice %1 {offsets = [0, 29, 0], sizes = [1, 1, 128], strides = [1, 1, 1]} : vector<1x32x128xf32> to vector<1x1x128xf32>
    %149 = vector.extract_strided_slice %3 {offsets = [29, 0, 0], sizes = [1, 32, 128], strides = [1, 1, 1]} : vector<32x32x128xf32> to vector<1x32x128xf32>
    %150 = vector.broadcast %148 : vector<1x1x128xf32> to vector<1x32x128xf32>
    %151 = arith.mulf %150, %149 : vector<1x32x128xf32>
    %152 = arith.addf %147, %151 : vector<1x32x128xf32>
    %153 = vector.extract_strided_slice %1 {offsets = [0, 30, 0], sizes = [1, 1, 128], strides = [1, 1, 1]} : vector<1x32x128xf32> to vector<1x1x128xf32>
    %154 = vector.extract_strided_slice %3 {offsets = [30, 0, 0], sizes = [1, 32, 128], strides = [1, 1, 1]} : vector<32x32x128xf32> to vector<1x32x128xf32>
    %155 = vector.broadcast %153 : vector<1x1x128xf32> to vector<1x32x128xf32>
    %156 = arith.mulf %155, %154 : vector<1x32x128xf32>
    %157 = arith.addf %152, %156 : vector<1x32x128xf32>
    %158 = vector.extract_strided_slice %1 {offsets = [0, 31, 0], sizes = [1, 1, 128], strides = [1, 1, 1]} : vector<1x32x128xf32> to vector<1x1x128xf32>
    %159 = vector.extract_strided_slice %3 {offsets = [31, 0, 0], sizes = [1, 32, 128], strides = [1, 1, 1]} : vector<32x32x128xf32> to vector<1x32x128xf32>
    %160 = vector.broadcast %158 : vector<1x1x128xf32> to vector<1x32x128xf32>
    %161 = arith.mulf %160, %159 : vector<1x32x128xf32>
    %162 = arith.addf %157, %161 : vector<1x32x128xf32>
    %c0_5 = arith.constant 0 : index
    %c0_6 = arith.constant 0 : index
    %c0_7 = arith.constant 0 : index
    %163 = vector.load %arg4[%c0_5, %c0_6, %c0_7] : memref<1x32x128xf32, #tpu.memory_space<vmem>>, vector<1x32x128xf32>
    tpu.vector_store %arg4[%c0_5, %c0_6, %c0_7], %162 {strides = array<i32>} : memref<1x32x128xf32, #tpu.memory_space<vmem>>, vector<1x32x128xf32>,
    return
  }
  func.func @transform_0(%arg0: i32, %arg1: i32) -> (i32, i32, i32) {
    %c0_i32 = arith.constant 0 : i32
    %c0_i32_0 = arith.constant 0 : i32
    return %arg0, %c0_i32, %arg1 : i32, i32, i32
  }
  func.func @transform_1(%arg0: i32, %arg1: i32) -> (i32, i32, i32) {
    %c0_i32 = arith.constant 0 : i32
    %c0_i32_0 = arith.constant 0 : i32
    %c0_i32_1 = arith.constant 0 : i32
    return %c0_i32, %c0_i32_0, %arg1 : i32, i32, i32
  }
  func.func @transform_2(%arg0: i32, %arg1: i32) -> (i32, i32, i32) {
    %c0_i32 = arith.constant 0 : i32
    %c0_i32_0 = arith.constant 0 : i32
    return %arg0, %c0_i32, %arg1 : i32, i32, i32
  }
}

module attributes {stable_mosaic.version = 11 : i64} {
  func.func @_linear_res_kernel(%arg0: i32, %arg1: memref<64x128xbf16, #tpu.memory_space<vmem>>, %arg2: memref<128x128xf32, #tpu.memory_space<vmem>>, %arg3: memref<1x128xf32, #tpu.memory_space<vmem>>, %arg4: memref<64x128xbf16, #tpu.memory_space<vmem>>, %arg5: memref<64x128xbf16, #tpu.memory_space<vmem>>) attributes {dimension_semantics = [#tpu.dimension_semantics<parallel>], iteration_bounds = array<i64: 2>, scalar_prefetch = 0 : i64, scratch_operands = 0 : i64, tpu.core_type = #tpu.core_type<tc>, window_params = [{transform_indices = @transform_0, window_bounds = array<i64: 64, 128>}, {pipeline_mode = #tpu.pipeline_mode<synchronous>, transform_indices = @transform_1, window_bounds = array<i64: 128, 128>}, {pipeline_mode = #tpu.pipeline_mode<synchronous>, transform_indices = @transform_2, window_bounds = array<i64: 1, 128>}, {transform_indices = @transform_3, window_bounds = array<i64: 64, 128>}, {transform_indices = @transform_4, window_bounds = array<i64: 64, 128>}]} {
    %c0 = arith.constant 0 : index
    %c0_0 = arith.constant 0 : index
    %0 = vector.load %arg1[%c0, %c0_0] : memref<64x128xbf16, #tpu.memory_space<vmem>>, vector<64x128xbf16>
    %1 = arith.extf %0 : vector<64x128xbf16> to vector<64x128xf32>
    %c0_1 = arith.constant 0 : index
    %c0_2 = arith.constant 0 : index
    %2 = vector.load %arg2[%c0_1, %c0_2] : memref<128x128xf32, #tpu.memory_space<vmem>>, vector<128x128xf32>
    %cst = arith.constant dense<0.000000e+00> : vector<64x128xf32>
    %3 = tpu.matmul %1, %2, %cst {dimension_numbers = #tpu.dot_dimension_numbers<[1], [0], [0], [1], [0, 0, 1, 1], [], []>} : vector<64x128xf32>, vector<128x128xf32>, vector<64x128xf32> -> vector<64x128xf32>
    %c0_3 = arith.constant 0 : index
    %c0_4 = arith.constant 0 : index
    %4 = vector.load %arg3[%c0_3, %c0_4] : memref<1x128xf32, #tpu.memory_space<vmem>>, vector<1x128xf32>
    %5 = vector.broadcast %4 : vector<1x128xf32> to vector<64x128xf32>
    %6 = arith.addf %3, %5 : vector<64x128xf32>
    %c0_5 = arith.constant 0 : index
    %c0_6 = arith.constant 0 : index
    %7 = vector.load %arg4[%c0_5, %c0_6] : memref<64x128xbf16, #tpu.memory_space<vmem>>, vector<64x128xbf16>
    %8 = arith.extf %7 : vector<64x128xbf16> to vector<64x128xf32>
    %9 = arith.addf %6, %8 : vector<64x128xf32>
    %cst_7 = arith.constant 5.000000e-01 : f32
    %10 = vector.broadcast %cst_7 : f32 to vector<64x128xf32>
    %11 = arith.mulf %10, %9 : vector<64x128xf32>
    %cst_8 = arith.constant 0.707106769 : f32
    %12 = vector.broadcast %cst_8 : f32 to vector<64x128xf32>
    %13 = arith.mulf %9, %12 : vector<64x128xf32>
    %14 = math.absf %13 : vector<64x128xf32>
    %cst_9 = arith.constant 0.327591091 : f32
    %15 = vector.broadcast %cst_9 : f32 to vector<64x128xf32>
    %16 = arith.mulf %15, %14 : vector<64x128xf32>
    %cst_10 = arith.constant 1.000000e+00 : f32
    %17 = vector.broadcast %cst_10 : f32 to vector<64x128xf32>
    %18 = arith.addf %17, %16 : vector<64x128xf32>
    %19 = tpu.reciprocal %18 {approx = true} : vector<64x128xf32> -> vector<64x128xf32>
    %20 = arith.mulf %18, %19 : vector<64x128xf32>
    %cst_11 = arith.constant 2.000000e+00 : f32
    %21 = vector.broadcast %cst_11 : f32 to vector<64x128xf32>
    %22 = arith.subf %21, %20 : vector<64x128xf32>
    %23 = arith.mulf %19, %22 : vector<64x128xf32>
    %cst_12 = arith.constant 1.06140542 : f32
    %24 = vector.broadcast %cst_12 : f32 to vector<64x128xf32>
    %25 = arith.mulf %24, %23 : vector<64x128xf32>
    %cst_13 = arith.constant -1.45315206 : f32
    %26 = vector.broadcast %cst_13 : f32 to vector<64x128xf32>
    %27 = arith.addf %25, %26 : vector<64x128xf32>
    %28 = arith.mulf %27, %23 : vector<64x128xf32>
    %cst_14 = arith.constant 1.42141378 : f32
    %29 = vector.broadcast %cst_14 : f32 to vector<64x128xf32>
    %30 = arith.addf %28, %29 : vector<64x128xf32>
    %31 = arith.mulf %30, %23 : vector<64x128xf32>
    %cst_15 = arith.constant -0.284496725 : f32
    %32 = vector.broadcast %cst_15 : f32 to vector<64x128xf32>
    %33 = arith.addf %31, %32 : vector<64x128xf32>
    %34 = arith.mulf %33, %23 : vector<64x128xf32>
    %cst_16 = arith.constant 0.254829586 : f32
    %35 = vector.broadcast %cst_16 : f32 to vector<64x128xf32>
    %36 = arith.addf %34, %35 : vector<64x128xf32>
    %37 = arith.mulf %36, %23 : vector<64x128xf32>
    %cst_17 = arith.constant 0.000000e+00 : f32
    %38 = vector.broadcast %cst_17 : f32 to vector<64x128xf32>
    %39 = arith.subf %38, %14 : vector<64x128xf32>
    %40 = arith.mulf %39, %14 : vector<64x128xf32>
    %41 = math.exp %40 : vector<64x128xf32>
    %42 = arith.mulf %37, %41 : vector<64x128xf32>
    %cst_18 = arith.constant 1.000000e+00 : f32
    %43 = vector.broadcast %cst_18 : f32 to vector<64x128xf32>
    %44 = arith.subf %43, %42 : vector<64x128xf32>
    %cst_19 = arith.constant 0.000000e+00 : f32
    %45 = vector.broadcast %cst_19 : f32 to vector<64x128xf32>
    %46 = arith.cmpf oge, %13, %45 : vector<64x128xf32>
    %cst_20 = arith.constant 0.000000e+00 : f32
    %47 = vector.broadcast %cst_20 : f32 to vector<64x128xf32>
    %48 = arith.subf %47, %44 : vector<64x128xf32>
    %49 = arith.select %46, %44, %48 : vector<64x128xi1>, vector<64x128xf32>
    %cst_21 = arith.constant 1.000000e+00 : f32
    %50 = vector.broadcast %cst_21 : f32 to vector<64x128xf32>
    %51 = arith.addf %50, %49 : vector<64x128xf32>
    %52 = arith.mulf %11, %51 : vector<64x128xf32>
    %53 = arith.truncf %52 : vector<64x128xf32> to vector<64x128xbf16>
    %c0_22 = arith.constant 0 : index
    %c0_23 = arith.constant 0 : index
    %54 = vector.load %arg5[%c0_22, %c0_23] : memref<64x128xbf16, #tpu.memory_space<vmem>>, vector<64x128xbf16>
    tpu.vector_store %arg5[%c0_22, %c0_23], %53 {strides = array<i32>} : memref<64x128xbf16, #tpu.memory_space<vmem>>, vector<64x128xbf16>,
    return
  }
  func.func @transform_0(%arg0: i32) -> (i32, i32) {
    %c0_i32 = arith.constant 0 : i32
    %c0_i32_0 = arith.constant 0 : i32
    return %arg0, %c0_i32 : i32, i32
  }
  func.func @transform_1(%arg0: i32) -> (i32, i32) {
    %c0_i32 = arith.constant 0 : i32
    %c0_i32_0 = arith.constant 0 : i32
    %c0_i32_1 = arith.constant 0 : i32
    return %c0_i32, %c0_i32_0 : i32, i32
  }
  func.func @transform_2(%arg0: i32) -> (i32, i32) {
    %c0_i32 = arith.constant 0 : i32
    %c0_i32_0 = arith.constant 0 : i32
    %c0_i32_1 = arith.constant 0 : i32
    return %c0_i32, %c0_i32_0 : i32, i32
  }
  func.func @transform_3(%arg0: i32) -> (i32, i32) {
    %c0_i32 = arith.constant 0 : i32
    %c0_i32_0 = arith.constant 0 : i32
    return %arg0, %c0_i32 : i32, i32
  }
  func.func @transform_4(%arg0: i32) -> (i32, i32) {
    %c0_i32 = arith.constant 0 : i32
    %c0_i32_0 = arith.constant 0 : i32
    return %arg0, %c0_i32 : i32, i32
  }
}

module attributes {stable_mosaic.version = 11 : i64} {
  func.func @_linear_res_kernel(%arg0: i32, %arg1: memref<64x128xbf16, #tpu.memory_space<vmem>>, %arg2: memref<128x128xf32, #tpu.memory_space<vmem>>, %arg3: memref<1x128xf32, #tpu.memory_space<vmem>>, %arg4: memref<64x128xbf16, #tpu.memory_space<vmem>>, %arg5: memref<64x128xbf16, #tpu.memory_space<vmem>>) attributes {dimension_semantics = [#tpu.dimension_semantics<parallel>], iteration_bounds = array<i64: 2>, scalar_prefetch = 0 : i64, scratch_operands = 0 : i64, tpu.core_type = #tpu.core_type<tc>, window_params = [{transform_indices = @transform_0, window_bounds = array<i64: 64, 128>}, {pipeline_mode = #tpu.pipeline_mode<synchronous>, transform_indices = @transform_1, window_bounds = array<i64: 128, 128>}, {pipeline_mode = #tpu.pipeline_mode<synchronous>, transform_indices = @transform_2, window_bounds = array<i64: 1, 128>}, {transform_indices = @transform_3, window_bounds = array<i64: 64, 128>}, {transform_indices = @transform_4, window_bounds = array<i64: 64, 128>}]} {
    %c0 = arith.constant 0 : index
    %c0_0 = arith.constant 0 : index
    %0 = vector.load %arg1[%c0, %c0_0] : memref<64x128xbf16, #tpu.memory_space<vmem>>, vector<64x128xbf16>
    %1 = arith.extf %0 : vector<64x128xbf16> to vector<64x128xf32>
    %c0_1 = arith.constant 0 : index
    %c0_2 = arith.constant 0 : index
    %2 = vector.load %arg2[%c0_1, %c0_2] : memref<128x128xf32, #tpu.memory_space<vmem>>, vector<128x128xf32>
    %cst = arith.constant dense<0.000000e+00> : vector<64x128xf32>
    %3 = tpu.matmul %1, %2, %cst {dimension_numbers = #tpu.dot_dimension_numbers<[1], [0], [0], [1], [0, 0, 1, 1], [], []>} : vector<64x128xf32>, vector<128x128xf32>, vector<64x128xf32> -> vector<64x128xf32>
    %c0_3 = arith.constant 0 : index
    %c0_4 = arith.constant 0 : index
    %4 = vector.load %arg3[%c0_3, %c0_4] : memref<1x128xf32, #tpu.memory_space<vmem>>, vector<1x128xf32>
    %5 = vector.broadcast %4 : vector<1x128xf32> to vector<64x128xf32>
    %6 = arith.addf %3, %5 : vector<64x128xf32>
    %c0_5 = arith.constant 0 : index
    %c0_6 = arith.constant 0 : index
    %7 = vector.load %arg4[%c0_5, %c0_6] : memref<64x128xbf16, #tpu.memory_space<vmem>>, vector<64x128xbf16>
    %8 = arith.extf %7 : vector<64x128xbf16> to vector<64x128xf32>
    %9 = arith.addf %6, %8 : vector<64x128xf32>
    %10 = arith.truncf %9 : vector<64x128xf32> to vector<64x128xbf16>
    %c0_7 = arith.constant 0 : index
    %c0_8 = arith.constant 0 : index
    %11 = vector.load %arg5[%c0_7, %c0_8] : memref<64x128xbf16, #tpu.memory_space<vmem>>, vector<64x128xbf16>
    tpu.vector_store %arg5[%c0_7, %c0_8], %10 {strides = array<i32>} : memref<64x128xbf16, #tpu.memory_space<vmem>>, vector<64x128xbf16>,
    return
  }
  func.func @transform_0(%arg0: i32) -> (i32, i32) {
    %c0_i32 = arith.constant 0 : i32
    %c0_i32_0 = arith.constant 0 : i32
    return %arg0, %c0_i32 : i32, i32
  }
  func.func @transform_1(%arg0: i32) -> (i32, i32) {
    %c0_i32 = arith.constant 0 : i32
    %c0_i32_0 = arith.constant 0 : i32
    %c0_i32_1 = arith.constant 0 : i32
    return %c0_i32, %c0_i32_0 : i32, i32
  }
  func.func @transform_2(%arg0: i32) -> (i32, i32) {
    %c0_i32 = arith.constant 0 : i32
    %c0_i32_0 = arith.constant 0 : i32
    %c0_i32_1 = arith.constant 0 : i32
    return %c0_i32, %c0_i32_0 : i32, i32
  }
  func.func @transform_3(%arg0: i32) -> (i32, i32) {
    %c0_i32 = arith.constant 0 : i32
    %c0_i32_0 = arith.constant 0 : i32
    return %arg0, %c0_i32 : i32, i32
  }
  func.func @transform_4(%arg0: i32) -> (i32, i32) {
    %c0_i32 = arith.constant 0 : i32
    %c0_i32_0 = arith.constant 0 : i32
    return %arg0, %c0_i32 : i32, i32
  }
}

module attributes {stable_mosaic.version = 11 : i64} {
  func.func @_proj_kernel(%arg0: i32, %arg1: memref<64x128xbf16, #tpu.memory_space<vmem>>, %arg2: memref<128x512xf32, #tpu.memory_space<vmem>>, %arg3: memref<1x512xf32, #tpu.memory_space<vmem>>, %arg4: memref<512x4xf32, #tpu.memory_space<vmem>>, %arg5: memref<1x4xf32, #tpu.memory_space<vmem>>, %arg6: memref<64x4xf32, #tpu.memory_space<vmem>>) attributes {dimension_semantics = [#tpu.dimension_semantics<parallel>], iteration_bounds = array<i64: 2>, scalar_prefetch = 0 : i64, scratch_operands = 0 : i64, tpu.core_type = #tpu.core_type<tc>, window_params = [{transform_indices = @transform_0, window_bounds = array<i64: 64, 128>}, {pipeline_mode = #tpu.pipeline_mode<synchronous>, transform_indices = @transform_1, window_bounds = array<i64: 128, 512>}, {pipeline_mode = #tpu.pipeline_mode<synchronous>, transform_indices = @transform_2, window_bounds = array<i64: 1, 512>}, {pipeline_mode = #tpu.pipeline_mode<synchronous>, transform_indices = @transform_3, window_bounds = array<i64: 512, 4>}, {pipeline_mode = #tpu.pipeline_mode<synchronous>, transform_indices = @transform_4, window_bounds = array<i64: 1, 4>}, {transform_indices = @transform_5, window_bounds = array<i64: 64, 4>}]} {
    %c0 = arith.constant 0 : index
    %c0_0 = arith.constant 0 : index
    %0 = vector.load %arg1[%c0, %c0_0] : memref<64x128xbf16, #tpu.memory_space<vmem>>, vector<64x128xbf16>
    %1 = arith.extf %0 : vector<64x128xbf16> to vector<64x128xf32>
    %c0_1 = arith.constant 0 : index
    %c0_2 = arith.constant 0 : index
    %2 = vector.load %arg2[%c0_1, %c0_2] : memref<128x512xf32, #tpu.memory_space<vmem>>, vector<128x512xf32>
    %cst = arith.constant dense<0.000000e+00> : vector<64x512xf32>
    %3 = tpu.matmul %1, %2, %cst {dimension_numbers = #tpu.dot_dimension_numbers<[1], [0], [0], [1], [0, 0, 1, 1], [], []>} : vector<64x128xf32>, vector<128x512xf32>, vector<64x512xf32> -> vector<64x512xf32>
    %c0_3 = arith.constant 0 : index
    %c0_4 = arith.constant 0 : index
    %4 = vector.load %arg3[%c0_3, %c0_4] : memref<1x512xf32, #tpu.memory_space<vmem>>, vector<1x512xf32>
    %5 = vector.broadcast %4 : vector<1x512xf32> to vector<64x512xf32>
    %6 = arith.addf %3, %5 : vector<64x512xf32>
    %cst_5 = arith.constant 5.000000e-01 : f32
    %7 = vector.broadcast %cst_5 : f32 to vector<64x512xf32>
    %8 = arith.mulf %7, %6 : vector<64x512xf32>
    %cst_6 = arith.constant 0.707106769 : f32
    %9 = vector.broadcast %cst_6 : f32 to vector<64x512xf32>
    %10 = arith.mulf %6, %9 : vector<64x512xf32>
    %11 = math.absf %10 : vector<64x512xf32>
    %cst_7 = arith.constant 0.327591091 : f32
    %12 = vector.broadcast %cst_7 : f32 to vector<64x512xf32>
    %13 = arith.mulf %12, %11 : vector<64x512xf32>
    %cst_8 = arith.constant 1.000000e+00 : f32
    %14 = vector.broadcast %cst_8 : f32 to vector<64x512xf32>
    %15 = arith.addf %14, %13 : vector<64x512xf32>
    %16 = tpu.reciprocal %15 {approx = true} : vector<64x512xf32> -> vector<64x512xf32>
    %17 = arith.mulf %15, %16 : vector<64x512xf32>
    %cst_9 = arith.constant 2.000000e+00 : f32
    %18 = vector.broadcast %cst_9 : f32 to vector<64x512xf32>
    %19 = arith.subf %18, %17 : vector<64x512xf32>
    %20 = arith.mulf %16, %19 : vector<64x512xf32>
    %cst_10 = arith.constant 1.06140542 : f32
    %21 = vector.broadcast %cst_10 : f32 to vector<64x512xf32>
    %22 = arith.mulf %21, %20 : vector<64x512xf32>
    %cst_11 = arith.constant -1.45315206 : f32
    %23 = vector.broadcast %cst_11 : f32 to vector<64x512xf32>
    %24 = arith.addf %22, %23 : vector<64x512xf32>
    %25 = arith.mulf %24, %20 : vector<64x512xf32>
    %cst_12 = arith.constant 1.42141378 : f32
    %26 = vector.broadcast %cst_12 : f32 to vector<64x512xf32>
    %27 = arith.addf %25, %26 : vector<64x512xf32>
    %28 = arith.mulf %27, %20 : vector<64x512xf32>
    %cst_13 = arith.constant -0.284496725 : f32
    %29 = vector.broadcast %cst_13 : f32 to vector<64x512xf32>
    %30 = arith.addf %28, %29 : vector<64x512xf32>
    %31 = arith.mulf %30, %20 : vector<64x512xf32>
    %cst_14 = arith.constant 0.254829586 : f32
    %32 = vector.broadcast %cst_14 : f32 to vector<64x512xf32>
    %33 = arith.addf %31, %32 : vector<64x512xf32>
    %34 = arith.mulf %33, %20 : vector<64x512xf32>
    %cst_15 = arith.constant 0.000000e+00 : f32
    %35 = vector.broadcast %cst_15 : f32 to vector<64x512xf32>
    %36 = arith.subf %35, %11 : vector<64x512xf32>
    %37 = arith.mulf %36, %11 : vector<64x512xf32>
    %38 = math.exp %37 : vector<64x512xf32>
    %39 = arith.mulf %34, %38 : vector<64x512xf32>
    %cst_16 = arith.constant 1.000000e+00 : f32
    %40 = vector.broadcast %cst_16 : f32 to vector<64x512xf32>
    %41 = arith.subf %40, %39 : vector<64x512xf32>
    %cst_17 = arith.constant 0.000000e+00 : f32
    %42 = vector.broadcast %cst_17 : f32 to vector<64x512xf32>
    %43 = arith.cmpf oge, %10, %42 : vector<64x512xf32>
    %cst_18 = arith.constant 0.000000e+00 : f32
    %44 = vector.broadcast %cst_18 : f32 to vector<64x512xf32>
    %45 = arith.subf %44, %41 : vector<64x512xf32>
    %46 = arith.select %43, %41, %45 : vector<64x512xi1>, vector<64x512xf32>
    %cst_19 = arith.constant 1.000000e+00 : f32
    %47 = vector.broadcast %cst_19 : f32 to vector<64x512xf32>
    %48 = arith.addf %47, %46 : vector<64x512xf32>
    %49 = arith.mulf %8, %48 : vector<64x512xf32>
    %c0_20 = arith.constant 0 : index
    %c0_21 = arith.constant 0 : index
    %50 = vector.load %arg4[%c0_20, %c0_21] : memref<512x4xf32, #tpu.memory_space<vmem>>, vector<512x4xf32>
    %cst_22 = arith.constant dense<0.000000e+00> : vector<64x4xf32>
    %51 = tpu.matmul %49, %50, %cst_22 {dimension_numbers = #tpu.dot_dimension_numbers<[1], [0], [0], [1], [0, 0, 1, 1], [], []>} : vector<64x512xf32>, vector<512x4xf32>, vector<64x4xf32> -> vector<64x4xf32>
    %c0_23 = arith.constant 0 : index
    %c0_24 = arith.constant 0 : index
    %52 = vector.load %arg5[%c0_23, %c0_24] : memref<1x4xf32, #tpu.memory_space<vmem>>, vector<1x4xf32>
    %53 = vector.broadcast %52 : vector<1x4xf32> to vector<64x4xf32>
    %54 = arith.addf %51, %53 : vector<64x4xf32>
    %c0_25 = arith.constant 0 : index
    %c0_26 = arith.constant 0 : index
    %55 = vector.load %arg6[%c0_25, %c0_26] : memref<64x4xf32, #tpu.memory_space<vmem>>, vector<64x4xf32>
    tpu.vector_store %arg6[%c0_25, %c0_26], %54 {strides = array<i32>} : memref<64x4xf32, #tpu.memory_space<vmem>>, vector<64x4xf32>,
    return
  }
  func.func @transform_0(%arg0: i32) -> (i32, i32) {
    %c0_i32 = arith.constant 0 : i32
    %c0_i32_0 = arith.constant 0 : i32
    return %arg0, %c0_i32 : i32, i32
  }
  func.func @transform_1(%arg0: i32) -> (i32, i32) {
    %c0_i32 = arith.constant 0 : i32
    %c0_i32_0 = arith.constant 0 : i32
    %c0_i32_1 = arith.constant 0 : i32
    return %c0_i32, %c0_i32_0 : i32, i32
  }
  func.func @transform_2(%arg0: i32) -> (i32, i32) {
    %c0_i32 = arith.constant 0 : i32
    %c0_i32_0 = arith.constant 0 : i32
    %c0_i32_1 = arith.constant 0 : i32
    return %c0_i32, %c0_i32_0 : i32, i32
  }
  func.func @transform_3(%arg0: i32) -> (i32, i32) {
    %c0_i32 = arith.constant 0 : i32
    %c0_i32_0 = arith.constant 0 : i32
    %c0_i32_1 = arith.constant 0 : i32
    return %c0_i32, %c0_i32_0 : i32, i32
  }
  func.func @transform_4(%arg0: i32) -> (i32, i32) {
    %c0_i32 = arith.constant 0 : i32
    %c0_i32_0 = arith.constant 0 : i32
    %c0_i32_1 = arith.constant 0 : i32
    return %c0_i32, %c0_i32_0 : i32, i32
  }
  func.func @transform_5(%arg0: i32) -> (i32, i32) {
    %c0_i32 = arith.constant 0 : i32
    %c0_i32_0 = arith.constant 0 : i32
    return %arg0, %c0_i32 : i32, i32
  }
}

</mosaic_0001>

<bundles_post_ra>
// kernel: tile.38
= control target key start
LH: loop header
LB: loop body
LE: loop exit
PB: predicated region body
PF: predicated region fallthrough
CT: control target
= control target key end

     0   :  { %s22_s0 = inlined_call_operand.vmem [shape: f32[32], index: 0, kind: input, shape index: {}]   ;;  %s23_s1 = inlined_call_operand.vmem [shape: f32[2,32], index: 1, kind: output, shape index: {}]  }
   0x1   :  { %v4_v0 = vld [vmem:[%s22_s0] ss:$0 sm:$0xff] }
   0x2   :  { %5 = vst [vmem:[%s23_s1] sm:$0x3] %v4_v0 }

// kernel: tile.39
= control target key start
LH: loop header
LB: loop body
LE: loop exit
PB: predicated region body
PF: predicated region fallthrough
CT: control target
= control target key end

     0   :  { %vm7_vm0 = vcmask 261120   ;;  %vm13_vm1 = vcmask 523520   ;;  %s39_s0 = inlined_call_operand.vmem [shape: f32[2,32], index: 0, kind: input, shape index: {}]   ;;  %s40_s1 = inlined_call_operand.vmem [shape: f32[1,64], index: 1, kind: output, shape index: {}]  }
   0x1   :  { %v4_v0 = vld [vmem:[%s39_s0] sm:$0x3]  ;;  %s22_s0 = smov 32  }
   0x2   :  { %5 = vst [vmem:[#allocation1] sm:$0x3] %v4_v0 }
   0x9   :  { %v10_v1 = vld [vmem:[#allocation1 + $0x1] sm:$0x1]   ;;  %v6_v2 = vld [vmem:[#allocation1] sm:$0x1]  }
   0xa   :  { %11 = vrot.lane.b32.xlu0 %v10_v1, %s22_s0  ;;  %8 = vst.msk [vmem:[#allocation0] sm:$0x1] %vm7_vm0, %v6_v2  }
  0x7c   :  { %v12_v3 = vpop.permute.xlu0 %11  }
  0x7d   :  { %14 = vst.msk [vmem:[#allocation0] sm:$0x1] %vm13_vm1, %v12_v3  }
  0x84   :  { %v18_v4 = vld [vmem:[#allocation0] sm:$0x1] }
  0x85   :  { %20 = vst [vmem:[%s40_s1] sm:$0x1] %v18_v4 }

// kernel: wno2d_forward.10
= control target key start
LH: loop header
LB: loop body
LE: loop exit
PB: predicated region body
PF: predicated region fallthrough
CT: control target
= control target key end

     0   :  { %s1087_s12 = smov 0   ;;  %s1089_s13 = smov 0   ;;  %s1284_s0 = inlined_call_operand.vmem [shape: f32[225,6], index: 0, kind: input, shape index: {}]   ;;  %s1285_s1 = inlined_call_operand.vmem [shape: f32[6,64], index: 1, kind: input, shape index: {}]   ;;  %s1286_s2 = inlined_call_operand.vmem [shape: f32[1,64], index: 2, kind: input, shape index: {}]   ;;  %s1287_s3 = inlined_call_operand.vmem [shape: bf16[225,64], index: 3, kind: output, shape index: {}]  }
   0x1   :  { %s1091_s14 = smov 0  }
   0x2 LB: > { %s1100_s15 = sadd.s32 4294967295, %s1033_s14   ;;  %s1102_s16 = sadd.s32 1, %s1033_s14   ;;  %s1033_s14 = sphi %s1091_s14, %s1294_s14   ;;  %s1029_s13 = sphi %s1089_s13, %s1293_s13   ;;  %s1025_s12 = sphi %s1087_s12, %s1292_s12  }
   0x3   : > { %s85_s17 = ssub.s32 %s1033_s14, %s1102_s16  ;;  %s88_s18 = sadd.s32 1, %s1029_s13 }
   0x4   : > { %p86_p0 = scmp.eq.s32.totalorder %s85_s17, 0  ;;  %p98_p1 = scmp.ne.s32.totalorder %s1029_s13, %s1025_s12 }
   0x5   : > { %p99_p2 = scmp.eq.s32.totalorder %s1100_s15, 1  ;;  %p772_p3 = scmp.ge.s32.totalorder %s1033_s14, 1 }
   0x6   : > { %s1110_s19 = scalar_select %p86_p0, %s1029_s13, %s88_s18  }
   0x7   : > { %p1112_p4 = por %p99_p2, %p98_p1  ;;  %p146_p5 = scmp.lt.s32.totalorder %s1033_s14, 3 }
   0x9   : > { %p147_p6 = pnand %p772_p3, %p146_p5 }
   0xa   : > { %v208_v0 = vld [vmem:[%s1285_s1] sm:$0x3f] (!%p147_p6)  ;;  %vm265_vm0 = vcmask (!%p147_p6), 1045504   ;;  %s1120_s23 = sshll.u32 (!%p147_p6), %s1100_s15, 4  ;;  %vm216_vm1 = vcmask (!%p147_p6), 48128   ;;  %s170_s29 = sand.u32 (!%p147_p6), 1, %s1025_s12  }
   0xb   : > { %150 = sbr.rel (%p147_p6) target bundleno = 314 (0x13a), region = 32  ;;  %863 = vmatprep.subr.msk.mxu0 (!%p147_p6), %vm265_vm0, %v208_v0  ;;  %889 = vmatprep.subr.msk.mxu1 (!%p147_p6), %vm265_vm0, %v208_v0  ;;  %p178_p7 = scmp.lt.s32.totalorder (!%p147_p6), %s1120_s23, 28  ;;  %v776_v17 = vld [vmem:[%s1286_s2] ss:$0 sm:$0xff] (!%p147_p6)  ;;  %vm478_vm2 = vcmask (!%p147_p6), 519168  }
   0xc   : > { %864 = vmatpush3.msk.msra.mxu0 (!%p147_p6), %vm265_vm0, %v208_v0  ;;  %890 = vmatpush3.msk.msra.mxu1 (!%p147_p6), %vm265_vm0, %v208_v0  ;;  %s773_s5 = sshll.u32 (!%p147_p6), %s170_s29, 6 }
   0xd   : > { %s1147_s6 = scalar_lea.vmem (!%p147_p6), [#allocation2], %s773_s5  }
  0x12   : > { %s179_s24 = scalar_select %p178_p7, %s1120_s23, 28 }
  0x13   : > { %s503_s7 = ssub.s32 (%p1112_p4), 29, %s1120_s23  ;;  %s843_s8 = sshll.u32 (%p1112_p4), %s1100_s15, 6 }
  0x14   : > { %s775_s25 = sshll.u32 %s179_s24, 3  ;;  %p504_p8 = scmp.lt.s32.totalorder (%p1112_p4), %s503_s7, 16 }
  0x15   : > { %s181_s28 = scalar_lea.vmem %s1284_s0, %s775_s25  ;;  %s1188_s11 = scalar_lea.vmem (%p1112_p4), %s1287_s3, %s843_s8  }
  0x16   : > { %v192_v1 = vld [vmem:[%s181_s28] sm:$0xff]  ;;  %v193_v3 = vld [vmem:[%s181_s28 + $0x8] sm:$0xff]  ;;  %v194_v5 = vld [vmem:[%s181_s28 + $0x10] sm:$0xff] }
  0x17   : > { %v200_v2 = vld [vmem:[%s181_s28 + $0x40] sm:$0xff]  ;;  %865 = vmatprep.mubr.msk.f32.mxu0 %vm216_vm1, %v192_v1  ;;  %v201_v4 = vld [vmem:[%s181_s28 + $0x48] sm:$0xff]  ;;  %v202_v6 = vld [vmem:[%s181_s28 + $0x50] sm:$0xff] }
  0x18   : > { %877 = vmatprep.mubr.msk.f32.mxu1 %vm216_vm1, %v200_v2  ;;  %866 = vmatmul.mubr.msk.f32.vlgmr.msra.gmra.mrb[0].mxu0 %vm216_vm1, %v193_v3  ;;  %v195_v7 = vld [vmem:[%s181_s28 + $0x18] sm:$0xff]  ;;  %v196_v9 = vld [vmem:[%s181_s28 + $0x20] sm:$0xff]  ;;  %v197_v11 = vld [vmem:[%s181_s28 + $0x28] sm:$0xff] }
  0x19   : > { %878 = vmatmul.mubr.msk.f32.vlgmr.msra.gmra.mrb[0].mxu1 %vm216_vm1, %v201_v4  ;;  %868 = vmatprep.mubr.msk.f32.mxu0 %vm216_vm1, %v194_v5  ;;  %v203_v8 = vld [vmem:[%s181_s28 + $0x58] sm:$0xff]  ;;  %v204_v10 = vld [vmem:[%s181_s28 + $0x60] sm:$0xff]  ;;  %v205_v12 = vld [vmem:[%s181_s28 + $0x68] sm:$0xff] }
  0x1a   : > { %880 = vmatprep.mubr.msk.f32.mxu1 %vm216_vm1, %v202_v6  ;;  %v198_v13 = vld [vmem:[%s181_s28 + $0x30] sm:$0xff]  ;;  %v199_v15 = vld [vmem:[%s181_s28 + $0x38] sm:$0xff] }
  0x1b   : > { %v206_v14 = vld [vmem:[%s181_s28 + $0x70] sm:$0xff]  ;;  %v207_v16 = vld [vmem:[%s181_s28 + $0x78] sm:$0xff] }
  0x1c   : > { %869 = vmatmul.mubr.msk.f32.gmra.mrb[2].mxu0 %vm216_vm1, %v195_v7 }
  0x1d   : > { %881 = vmatmul.mubr.msk.f32.gmra.mrb[2].mxu1 %vm216_vm1, %v203_v8  ;;  %871 = vmatprep.mubr.msk.f32.mxu0 %vm216_vm1, %v196_v9 }
  0x1e   : > { %883 = vmatprep.mubr.msk.f32.mxu1 %vm216_vm1, %v204_v10 }
  0x20   : > { %872 = vmatmul.mubr.msk.f32.gmra.mrb[4].mxu0 %vm216_vm1, %v197_v11 }
  0x21   : > { %884 = vmatmul.mubr.msk.f32.gmra.mrb[4].mxu1 %vm216_vm1, %v205_v12  ;;  %874 = vmatprep.mubr.msk.f32.mxu0 %vm216_vm1, %v198_v13 }
  0x22   : > { %886 = vmatprep.mubr.msk.f32.mxu1 %vm216_vm1, %v206_v14 }
  0x24   : > { %875 = vmatmul.mubr.msk.f32.gmra.mrb[6].mxu0 %vm216_vm1, %v199_v15 }
  0x25   : > { %887 = vmatmul.mubr.msk.f32.gmra.mrb[6].mxu1 %vm216_vm1, %v207_v16 }
  0xeb   : > { %v867_v18 = vpop.f32.mrb[0].mxu0 }
  0xec   : > { %v879_v19 = vpop.f32.mrb[0].mxu1  ;;  %v341_v20 = vadd.f32 %v867_v18, %v776_v17  ;;  %v335_v22 = vpop.f32.mrb[1].mxu0 }
  0xed   : > { %v381_v21 = vadd.f32 %v879_v19, %v776_v17  ;;  %v375_v23 = vpop.f32.mrb[1].mxu1  ;;  %v336_v24 = vadd.f32 %v776_v17, %v335_v22 }
  0xee   : > { %v376_v25 = vadd.f32 %v776_v17, %v375_v23  ;;  %v828_v26 = vpack.c.bf16 %v341_v20, %v341_v20 }
  0xef   : > { %v836_v27 = vpack.c.bf16 %v381_v21, %v381_v21  ;;  %v827_v28 = vpack.c.bf16 %v336_v24, %v336_v24  ;;  %v870_v30 = vpop.f32.mrb[2].mxu0 }
  0xf0   : > { %v835_v29 = vpack.c.bf16 %v376_v25, %v376_v25  ;;  %v882_v31 = vpop.f32.mrb[2].mxu1  ;;  %480 = vst.msk [vmem:[%s1147_s6 + $0x4] sm:$0xf] %vm478_vm2, %v828_v26  ;;  %v351_v32 = vadd.f32 %v870_v30, %v776_v17  ;;  %v345_v34 = vpop.f32.mrb[3].mxu0 }
  0xf1   : > { %488 = vst.msk [vmem:[%s1147_s6 + $0x24] sm:$0xf] %vm478_vm2, %v836_v27  ;;  %v391_v33 = vadd.f32 %v882_v31, %v776_v17  ;;  %v385_v35 = vpop.f32.mrb[3].mxu1  ;;  %479 = vst.msk [vmem:[%s1147_s6] sm:$0xf] %vm478_vm2, %v827_v28  ;;  %v346_v36 = vadd.f32 %v776_v17, %v345_v34 }
  0xf2   : > { %487 = vst.msk [vmem:[%s1147_s6 + $0x20] sm:$0xf] %vm478_vm2, %v835_v29  ;;  %v386_v37 = vadd.f32 %v776_v17, %v385_v35  ;;  %v830_v38 = vpack.c.bf16 %v351_v32, %v351_v32 }
  0xf3   : > { %v838_v39 = vpack.c.bf16 %v391_v33, %v391_v33  ;;  %v829_v40 = vpack.c.bf16 %v346_v36, %v346_v36  ;;  %v873_v42 = vpop.f32.mrb[4].mxu0 }
  0xf4   : > { %v837_v41 = vpack.c.bf16 %v386_v37, %v386_v37  ;;  %v885_v43 = vpop.f32.mrb[4].mxu1  ;;  %482 = vst.msk [vmem:[%s1147_s6 + $0xc] sm:$0xf] %vm478_vm2, %v830_v38  ;;  %v361_v44 = vadd.f32 %v873_v42, %v776_v17  ;;  %v355_v46 = vpop.f32.mrb[5].mxu0 }
  0xf5   : > { %490 = vst.msk [vmem:[%s1147_s6 + $0x2c] sm:$0xf] %vm478_vm2, %v838_v39  ;;  %v401_v45 = vadd.f32 %v885_v43, %v776_v17  ;;  %v395_v47 = vpop.f32.mrb[5].mxu1  ;;  %481 = vst.msk [vmem:[%s1147_s6 + $0x8] sm:$0xf] %vm478_vm2, %v829_v40  ;;  %v356_v48 = vadd.f32 %v776_v17, %v355_v46 }
  0xf6   : > { %489 = vst.msk [vmem:[%s1147_s6 + $0x28] sm:$0xf] %vm478_vm2, %v837_v41  ;;  %v396_v49 = vadd.f32 %v776_v17, %v395_v47  ;;  %v832_v50 = vpack.c.bf16 %v361_v44, %v361_v44 }
  0xf7   : > { %v840_v51 = vpack.c.bf16 %v401_v45, %v401_v45  ;;  %v831_v52 = vpack.c.bf16 %v356_v48, %v356_v48  ;;  %v876_v54 = vpop.f32.mrb[6].mxu0 }
  0xf8   : > { %v839_v53 = vpack.c.bf16 %v396_v49, %v396_v49  ;;  %v888_v55 = vpop.f32.mrb[6].mxu1  ;;  %484 = vst.msk [vmem:[%s1147_s6 + $0x14] sm:$0xf] %vm478_vm2, %v832_v50  ;;  %v371_v56 = vadd.f32 %v876_v54, %v776_v17  ;;  %v365_v58 = vpop.f32.mrb[7].mxu0  ;;  %501 = sbr.rel (!%p1112_p4) target bundleno = 314 (0x13a), region = 36 }
  0xf9   : > { %492 = vst.msk [vmem:[%s1147_s6 + $0x34] sm:$0xf] %vm478_vm2, %v840_v51  ;;  %v411_v57 = vadd.f32 %v888_v55, %v776_v17  ;;  %v405_v59 = vpop.f32.mrb[7].mxu1  ;;  %483 = vst.msk [vmem:[%s1147_s6 + $0x10] sm:$0xf] %vm478_vm2, %v831_v52  ;;  %v366_v60 = vadd.f32 %v776_v17, %v365_v58 }
  0xfa   : > { %491 = vst.msk [vmem:[%s1147_s6 + $0x30] sm:$0xf] %vm478_vm2, %v839_v53  ;;  %v406_v61 = vadd.f32 %v776_v17, %v405_v59  ;;  %v834_v62 = vpack.c.bf16 %v371_v56, %v371_v56 }
  0xfb   : > { %v842_v63 = vpack.c.bf16 %v411_v57, %v411_v57  ;;  %v833_v0 = vpack.c.bf16 %v366_v60, %v366_v60 }
  0xfc   : > { %v841_v1 = vpack.c.bf16 %v406_v61, %v406_v61  ;;  %486 = vst.msk [vmem:[%s1147_s6 + $0x1c] sm:$0xf] %vm478_vm2, %v834_v62 }
  0xfd   : > { %494 = vst.msk [vmem:[%s1147_s6 + $0x3c] sm:$0xf] %vm478_vm2, %v842_v63  ;;  %485 = vst.msk [vmem:[%s1147_s6 + $0x18] sm:$0xf] %vm478_vm2, %v833_v0 }
  0xfe   : > { %493 = vst.msk [vmem:[%s1147_s6 + $0x38] sm:$0xf] %vm478_vm2, %v841_v1 }
  0xff   : > { %s1296_s7 = smov (!%p504_p8, %s503_s7), 16 }
 0x100   : > { %s812_s12 = sshll.u32 %s1296_s7, 6 }
 0x101   : > { %p815_p9 = scmp.eq.s32.totalorder %s812_s12, 0 }
 0x102   : > { %s1194_s14 = sshrl.u32 (!%p815_p9), %s1296_s7, 4 }
 0x103   : > { %512 = sbr.rel (%p815_p9) target bundleno = 314 (0x13a), region = 40  ;;  %p816_p10 = scmp.le.s32.totalorder (!%p815_p9), %s1194_s14, 0 }
 0x10a   : > { %725 = sbr.rel (%p816_p10) target bundleno = 293 (0x125), region = 112  ;;  %s1289_s15 = smov (!%p816_p10), %s1188_s11 }
 0x10b   : > { %s1290_s17 = smov (!%p816_p10), %s1147_s6  ;;  %s1203_s18 = smov (!%p816_p10), 0  }
 0x10c   : > { %s1205_s20 = smov (!%p816_p10), 0  }
 0x111 LB: >> { %v528_v2 = vld [vmem:[%s1041_s17] sm:$0xf]  ;;  %v530_v3 = vld [vmem:[%s1041_s17 + $0x4] sm:$0xf]  ;;  %v532_v4 = vld [vmem:[%s1041_s17 + $0x8] sm:$0xf]  ;;  %s1049_s20 = sphi %s1205_s20, %s522_s20   ;;  %s1045_s18 = sphi %s1203_s18, %s1291_s18   ;;  %s1041_s17 = sphi %s1290_s17, %s565_s17   ;;  %s1037_s15 = sphi %s1289_s15, %s566_s15  }
 0x112   : >> { %529 = vst [vmem:[%s1037_s15] sm:$0xf] %v528_v2  ;;  %531 = vst [vmem:[%s1037_s15 + $0x4] sm:$0xf] %v530_v3  ;;  %v534_v5 = vld [vmem:[%s1041_s17 + $0xc] sm:$0xf]  ;;  %s560_s21 = sadd.s32 1, %s1045_s18 }
 0x113   : >> { %533 = vst [vmem:[%s1037_s15 + $0x8] sm:$0xf] %v532_v4  ;;  %v536_v6 = vld [vmem:[%s1041_s17 + $0x10] sm:$0xf]  ;;  %v538_v7 = vld [vmem:[%s1041_s17 + $0x14] sm:$0xf]  ;;  %p561_p11 = scmp.ge.s32.totalorder %s560_s21, %s1194_s14 }
 0x114   : >> { %535 = vst [vmem:[%s1037_s15 + $0xc] sm:$0xf] %v534_v5  ;;  %537 = vst [vmem:[%s1037_s15 + $0x10] sm:$0xf] %v536_v6  ;;  %v540_v8 = vld [vmem:[%s1041_s17 + $0x18] sm:$0xf] }
 0x115   : >> { %539 = vst [vmem:[%s1037_s15 + $0x14] sm:$0xf] %v538_v7  ;;  %v542_v9 = vld [vmem:[%s1041_s17 + $0x1c] sm:$0xf]  ;;  %v544_v10 = vld [vmem:[%s1041_s17 + $0x20] sm:$0xf] }
 0x116   : >> { %541 = vst [vmem:[%s1037_s15 + $0x18] sm:$0xf] %v540_v8  ;;  %543 = vst [vmem:[%s1037_s15 + $0x1c] sm:$0xf] %v542_v9  ;;  %v546_v11 = vld [vmem:[%s1041_s17 + $0x24] sm:$0xf] }
 0x117   : >> { %545 = vst [vmem:[%s1037_s15 + $0x20] sm:$0xf] %v544_v10  ;;  %v548_v12 = vld [vmem:[%s1041_s17 + $0x28] sm:$0xf]  ;;  %v550_v13 = vld [vmem:[%s1041_s17 + $0x2c] sm:$0xf] }
 0x118   : >> { %547 = vst [vmem:[%s1037_s15 + $0x24] sm:$0xf] %v546_v11  ;;  %549 = vst [vmem:[%s1037_s15 + $0x28] sm:$0xf] %v548_v12  ;;  %v552_v14 = vld [vmem:[%s1041_s17 + $0x30] sm:$0xf] }
 0x119   : >> { %551 = vst [vmem:[%s1037_s15 + $0x2c] sm:$0xf] %v550_v13  ;;  %v554_v15 = vld [vmem:[%s1041_s17 + $0x34] sm:$0xf]  ;;  %v556_v16 = vld [vmem:[%s1041_s17 + $0x38] sm:$0xf] }
 0x11a   : >> { %553 = vst [vmem:[%s1037_s15 + $0x30] sm:$0xf] %v552_v14  ;;  %555 = vst [vmem:[%s1037_s15 + $0x34] sm:$0xf] %v554_v15  ;;  %v558_v17 = vld [vmem:[%s1041_s17 + $0x3c] sm:$0xf] }
 0x11b   : >> { %557 = vst [vmem:[%s1037_s15 + $0x38] sm:$0xf] %v556_v16  ;;  %559 = vst [vmem:[%s1037_s15 + $0x3c] sm:$0xf] %v558_v17  ;;  %s1298_s21 = smov (%p561_p11, %s560_s21), 0  ;;  %s522_s20 = sadd.s32 1, %s1049_s20  }
 0x11c   : >> { %s817_s22 = sshll.u32 %s1298_s21, 6  ;;  %p521_p12 = scmp.ge.s32.totalorder %s522_s20, %s1194_s14 }
 0x11d   : >> { %s565_s17 = scalar_lea.vmem %s1147_s6, %s817_s22 [#allocation2]   ;;  %s566_s15 = scalar_lea.vmem %s1188_s11, %s817_s22  }
 0x11e   : >> { %s1291_s18 = smov %s1298_s21  ;;  %524 = sbr.rel (!%p521_p12) target bundleno = 273 (0x111), region = 118 }
 0x125 PF: > { %s1266_s23 = sand.u32 15, %s1296_s7   ;;  %s844_s24 = sshll.u32 %s1194_s14, 6 }
 0x126   : > { %s571_s25 = scalar_lea.vmem %s1147_s6, %s844_s24 [#allocation2]   ;;  %s573_s26 = scalar_lea.vmem %s1188_s11, %s844_s24  }
 0x127   : > { %p822_p13 = scmp.le.s32.totalorder %s1266_s23, 0 }
 0x128   : > { %s1051_s27 = smov (!%p822_p13), %s573_s26   ;;  %s1055_s28 = smov (!%p822_p13), %s571_s25  }
 0x129   : > { %739 = sbr.rel (%p822_p13) target bundleno = 314 (0x13a), region = 123  ;;  %s1059_s29 = smov (!%p822_p13), 0  }
 0x12a   : > { %s1063_s30 = smov (!%p822_p13), 0  }
 0x130 LB: >> { %v583_v18 = vld [vmem:[%s1057_s28] sm:$0xf]  ;;  %s585_s4 = sadd.s32 1, %s1061_s29  ;;  %s577_s30 = sadd.s32 1, %s1065_s30   ;;  %s1065_s30 = sphi %s1063_s30, %s577_s30   ;;  %s1061_s29 = sphi %s1059_s29, %s1060_s29   ;;  %s1057_s28 = sphi %s1055_s28, %s590_s28   ;;  %s1053_s27 = sphi %s1051_s27, %s591_s27  }
 0x131   : >> { %584 = vst [vmem:[%s1053_s27] sm:$0xf] %v583_v18  ;;  %p586_p0 = scmp.ge.s32.totalorder %s585_s4, %s1266_s23  ;;  %p576_p1 = scmp.ge.s32.totalorder %s577_s30, %s1266_s23 }
 0x133   : >> { %s1300_s4 = smov (%p586_p0, %s585_s4), 0  ;;  %579 = sbr.rel (!%p576_p1) target bundleno = 304 (0x130), region = 129 }
 0x134   : >> { %s823_s5 = sshll.u32 %s1300_s4, 2  ;;  %s1060_s29 = smov %s1300_s4  }
 0x135   : >> { %s590_s28 = scalar_lea.vmem %s571_s25, %s823_s5 [#allocation2]   ;;  %s591_s27 = scalar_lea.vmem %s573_s26, %s823_s5  }
 0x13a PF: > { %p10_p2 = scmp.ge.s32.totalorder %s1102_s16, 4   ;;  %s1292_s12 = smov %s1029_s13 }
 0x13b   : > { %s1293_s13 = smov %s1110_s19  ;;  %s1294_s14 = smov %s1102_s16 }
 0x13c   :  { %12 = sbr.rel (!%p10_p2) target bundleno = 2 (0x2), region = 140 }

// kernel: wno2d_forward.11
= control target key start
LH: loop header
LB: loop body
LE: loop exit
PB: predicated region body
PF: predicated region fallthrough
CT: control target
= control target key end

     0   :  { %s1344_s9 = smov 0   ;;  %s1346_s10 = smov 0   ;;  %s2174_s0 = inlined_call_operand.vmem [shape: bf16[2,32,128], index: 0, kind: input, shape index: {}]   ;;  %s2175_s1 = inlined_call_operand.vmem [shape: bf16[32,32,128], index: 1, kind: input, shape index: {}]   ;;  %s2176_s2 = inlined_call_operand.vmem [shape: f32[2,32,128], index: 2, kind: output, shape index: {}]  }
   0x1   :  { %s1348_s11 = smov 0  }
   0x2 LB: > { %s24_s12 = sadd.s32 1, %s1323_s10  ;;  %p944_p0 = scmp.ge.s32.totalorder %s1327_s11, 1  ;;  %s1327_s11 = sphi %s1348_s11, %s12_s11   ;;  %s1323_s10 = sphi %s1346_s10, %s2461_s10   ;;  %s1319_s9 = sphi %s1344_s9, %s2460_s9  }
   0x3   : > { %p26_p1 = scmp.ge.s32.totalorder %s24_s12, 2  ;;  %p140_p2 = scmp.lt.s32.totalorder %s1327_s11, 3 }
   0x5   : > { %s2463_s12 = smov (%p26_p1, %s24_s12), 0  ;;  %p141_p3 = pnand %p944_p0, %p140_p2 }
   0x7   : > { %144 = sbr.rel (%p141_p3) target bundleno = 150 (0x96), region = 28 }
   0xe   : > { %p172_p4 = scmp.lt.s32.totalorder %s1319_s9, 1  ;;  %v1365_v0 = vld [vmem:[%s2175_s1] sm:$0xff]   ;;  %v1370_v1 = vld [vmem:[%s2175_s1 + $0x8] sm:$0xff]   ;;  %v1375_v2 = vld [vmem:[%s2175_s1 + $0x10] sm:$0xff]  }
   0xf   : > { %v1380_v3 = vld [vmem:[%s2175_s1 + $0x18] sm:$0xff]   ;;  %v1385_v4 = vld [vmem:[%s2175_s1 + $0x20] sm:$0xff]   ;;  %v1393_v6 = vld [vmem:[%s2175_s1 + $0x28] sm:$0xff]  }
  0x10   : > { %s2465_s9 = smov (!%p172_p4, %s1319_s9), 1  ;;  %v1398_v7 = vld [vmem:[%s2175_s1 + $0x30] sm:$0xff]   ;;  %v1407_v13 = vld [vmem:[%s2175_s1 + $0x38] sm:$0xff]   ;;  %v1412_v14 = vld [vmem:[%s2175_s1 + $0x40] sm:$0xff]  }
  0x11   : > { %s951_s3 = sshll.u32 %s2465_s9, 4  ;;  %v1422_v19 = vld [vmem:[%s2175_s1 + $0x48] sm:$0xff]   ;;  %v1427_v20 = vld [vmem:[%s2175_s1 + $0x50] sm:$0xff]   ;;  %v1439_v25 = vld [vmem:[%s2175_s1 + $0x58] sm:$0xff]   ;;  %s952_s25 = sshll.u32 %s2465_s9, 5 }
  0x12   : > { %s179_s14 = scalar_lea.vmem %s2174_s0, %s951_s3  ;;  %v1448_v32 = vld [vmem:[%s2175_s1 + $0x60] sm:$0xff]   ;;  %v1457_v37 = vld [vmem:[%s2175_s1 + $0x68] sm:$0xff]   ;;  %v1462_v38 = vld [vmem:[%s2175_s1 + $0x70] sm:$0xff]   ;;  %s191_s27 = scalar_lea.vmem %s2176_s2, %s952_s25 }
  0x13   : > { %v954_v26 = vld [vmem:[%s179_s14] sm:$0xff]   ;;  %v1217_v27 = vld [vmem:[%s179_s14 + $0x8] sm:$0xff]   ;;  %v1472_v43 = vld [vmem:[%s2175_s1 + $0x78] sm:$0xff]  }
  0x14   : > { %v1464_v39 = vunpack.c.l.bf16 %v954_v26  ;;  %v1477_v44 = vld [vmem:[%s2175_s1 + $0x80] sm:$0xff]   ;;  %v1479_v45 = vunpack.c.h.bf16 %v954_v26  ;;  %v1481_v46 = vunpack.c.l.bf16 %v1217_v27  ;;  %v1483_v47 = vunpack.c.h.bf16 %v1217_v27  ;;  %v1489_v49 = vld [vmem:[%s2175_s1 + $0x88] sm:$0xff]   ;;  %v1494_v50 = vld [vmem:[%s2175_s1 + $0x90] sm:$0xff]  }
  0x15   : > { %v1503_v55 = vld [vmem:[%s2175_s1 + $0x98] sm:$0xff]   ;;  %v1508_v56 = vld [vmem:[%s2175_s1 + $0xa0] sm:$0xff]   ;;  %v1517_v61 = vld [vmem:[%s2175_s1 + $0xa8] sm:$0xff]  }
  0x16   : > { %2253 = vst [vmem:[#allocation2_spill] sm:$0xff] %v1481_v46  ;;  %2254 = vst [vmem:[#allocation3_spill] sm:$0xff] %v1483_v47  ;;  %v1522_v62 = vld [vmem:[%s2175_s1 + $0xb0] sm:$0xff]   ;;  %v1531_v60 = vld [vmem:[%s2175_s1 + $0xb8] sm:$0xff]  }
  0x17   : > { %v1536_v58 = vld [vmem:[%s2175_s1 + $0xc0] sm:$0xff]   ;;  %v1545_v59 = vld [vmem:[%s2175_s1 + $0xc8] sm:$0xff]   ;;  %v1550_v54 = vld [vmem:[%s2175_s1 + $0xd0] sm:$0xff]  }
  0x18   : > { %v1559_v27 = vld [vmem:[%s2175_s1 + $0xd8] sm:$0xff]   ;;  %v1564_v52 = vld [vmem:[%s2175_s1 + $0xe0] sm:$0xff]   ;;  %v1573_v26 = vld [vmem:[%s2175_s1 + $0xe8] sm:$0xff]  }
  0x19   : > { %2255 = vst [vmem:[#allocation4_spill] sm:$0xff] %v1559_v27  ;;  %2256 = vst [vmem:[#allocation5_spill] sm:$0xff] %v1564_v52  ;;  %v1578_v48 = vld [vmem:[%s2175_s1 + $0xf0] sm:$0xff]   ;;  %v1587_v63 = vld [vmem:[%s2175_s1 + $0xf8] sm:$0xff]  }
  0x1a   : > { %2257 = vst [vmem:[#allocation6_spill] sm:$0xff] %v1573_v26  ;;  %2258 = vst [vmem:[#allocation7_spill] sm:$0xff] %v1578_v48  ;;  %v1592_v41 = vld [vmem:[%s2175_s1 + $0x100] sm:$0xff]   ;;  %v1601_v57 = vld [vmem:[%s2175_s1 + $0x108] sm:$0xff]  }
  0x1b   : > { %2259 = vst [vmem:[#allocation8_spill] sm:$0xff] %v1587_v63  ;;  %2260 = vst [vmem:[#allocation9_spill] sm:$0xff] %v1592_v41  ;;  %v1606_v36 = vld [vmem:[%s2175_s1 + $0x110] sm:$0xff]   ;;  %v1615_v53 = vld [vmem:[%s2175_s1 + $0x118] sm:$0xff]  }
  0x1c   : > { %2261 = vst [vmem:[#allocation10_spill] sm:$0xff] %v1601_v57  ;;  %2262 = vst [vmem:[#allocation11_spill] sm:$0xff] %v1606_v36  ;;  %v1620_v34 = vld [vmem:[%s2175_s1 + $0x120] sm:$0xff]   ;;  %v1629_v51 = vld [vmem:[%s2175_s1 + $0x128] sm:$0xff]   ;;  %v2298_v36 = vunpack.c.h.bf16 %v1375_v2 }
  0x1d   : > { %2263 = vst [vmem:[#allocation12_spill] sm:$0xff] %v1615_v53  ;;  %2264 = vst [vmem:[#allocation13_spill] sm:$0xff] %v1620_v34  ;;  %v1634_v31 = vld [vmem:[%s2175_s1 + $0x130] sm:$0xff]   ;;  %v1643_v42 = vld [vmem:[%s2175_s1 + $0x138] sm:$0xff]   ;;  %v2297_v34 = vunpack.c.l.bf16 %v1375_v2 }
  0x1e   : > { %2265 = vst [vmem:[#allocation14_spill] sm:$0xff] %v1629_v51  ;;  %2266 = vst [vmem:[#allocation15_spill] sm:$0xff] %v1634_v31  ;;  %v1648_v29 = vld [vmem:[%s2175_s1 + $0x140] sm:$0xff]   ;;  %v1657_v40 = vld [vmem:[%s2175_s1 + $0x148] sm:$0xff]   ;;  %v2296_v31 = vunpack.c.h.bf16 %v1370_v1 }
  0x1f   : > { %2267 = vst [vmem:[#allocation16_spill] sm:$0xff] %v1643_v42  ;;  %2268 = vst [vmem:[#allocation17_spill] sm:$0xff] %v1648_v29  ;;  %v1662_v24 = vld [vmem:[%s2175_s1 + $0x150] sm:$0xff]   ;;  %v1671_v35 = vld [vmem:[%s2175_s1 + $0x158] sm:$0xff]   ;;  %v2295_v29 = vunpack.c.l.bf16 %v1370_v1  ;;  %v2303_v1 = vunpack.c.l.bf16 %v1393_v6 }
  0x20   : > { %2269 = vst [vmem:[#allocation18_spill] sm:$0xff] %v1657_v40  ;;  %2270 = vst [vmem:[#allocation19_spill] sm:$0xff] %v1662_v24  ;;  %v1676_v22 = vld [vmem:[%s2175_s1 + $0x160] sm:$0xff]   ;;  %v1685_v33 = vld [vmem:[%s2175_s1 + $0x168] sm:$0xff]   ;;  %v2294_v24 = vunpack.c.h.bf16 %v1365_v0 }
  0x21   : > { %2271 = vst [vmem:[#allocation20_spill] sm:$0xff] %v1671_v35  ;;  %2272 = vst [vmem:[#allocation21_spill] sm:$0xff] %v1676_v22  ;;  %v1690_v18 = vld [vmem:[%s2175_s1 + $0x170] sm:$0xff]   ;;  %v1699_v30 = vld [vmem:[%s2175_s1 + $0x178] sm:$0xff]  }
  0x22   : > { %2273 = vst [vmem:[#allocation22_spill] sm:$0xff] %v1685_v33  ;;  %2274 = vst [vmem:[#allocation23_spill] sm:$0xff] %v1690_v18  ;;  %v1704_v16 = vld [vmem:[%s2175_s1 + $0x180] sm:$0xff]   ;;  %v1713_v28 = vld [vmem:[%s2175_s1 + $0x188] sm:$0xff]  }
  0x23   : > { %2275 = vst [vmem:[#allocation24_spill] sm:$0xff] %v1699_v30  ;;  %2276 = vst [vmem:[#allocation25_spill] sm:$0xff] %v1704_v16  ;;  %v1718_v12 = vld [vmem:[%s2175_s1 + $0x190] sm:$0xff]   ;;  %v1727_v23 = vld [vmem:[%s2175_s1 + $0x198] sm:$0xff]  }
  0x24   : > { %2277 = vst [vmem:[#allocation26_spill] sm:$0xff] %v1713_v28  ;;  %2278 = vst [vmem:[#allocation27_spill] sm:$0xff] %v1718_v12  ;;  %v1732_v10 = vld [vmem:[%s2175_s1 + $0x1a0] sm:$0xff]   ;;  %v1741_v21 = vld [vmem:[%s2175_s1 + $0x1a8] sm:$0xff]  }
  0x25   : > { %2279 = vst [vmem:[#allocation28_spill] sm:$0xff] %v1727_v23  ;;  %2280 = vst [vmem:[#allocation29_spill] sm:$0xff] %v1732_v10  ;;  %v1746_v5 = vld [vmem:[%s2175_s1 + $0x1b0] sm:$0xff]   ;;  %v1755_v17 = vld [vmem:[%s2175_s1 + $0x1b8] sm:$0xff]  }
  0x26   : > { %2281 = vst [vmem:[#allocation30_spill] sm:$0xff] %v1741_v21  ;;  %2282 = vst [vmem:[#allocation31_spill] sm:$0xff] %v1746_v5  ;;  %v1760_v47 = vld [vmem:[%s2175_s1 + $0x1c0] sm:$0xff]   ;;  %v1769_v15 = vld [vmem:[%s2175_s1 + $0x1c8] sm:$0xff]  }
  0x27   : > { %2283 = vst [vmem:[#allocation32_spill] sm:$0xff] %v1755_v17  ;;  %2284 = vst [vmem:[#allocation33_spill] sm:$0xff] %v1760_v47  ;;  %v1774_v28 = vld [vmem:[%s2175_s1 + $0x1d0] sm:$0xff]   ;;  %v1783_v11 = vld [vmem:[%s2175_s1 + $0x1d8] sm:$0xff]   ;;  %v2292_v47 = vlaneseq }
  0x28   : > { %2285 = vst [vmem:[#allocation34_spill] sm:$0xff] %v1769_v15  ;;  %2286 = vst [vmem:[#allocation35_spill] sm:$0xff] %v1774_v28  ;;  %v1788_v23 = vld [vmem:[%s2175_s1 + $0x1e0] sm:$0xff]   ;;  %v1797_v9 = vld [vmem:[%s2175_s1 + $0x1e8] sm:$0xff]  }
  0x29   : > { %2287 = vst [vmem:[#allocation36_spill] sm:$0xff] %v1783_v11  ;;  %2288 = vst [vmem:[#allocation37_spill] sm:$0xff] %v1788_v23  ;;  %v1806_v16 = vld [vmem:[%s2175_s1 + $0x1f0] sm:$0xff]   ;;  %v1811_v8 = vld [vmem:[%s2175_s1 + $0x1f8] sm:$0xff]   ;;  %v457_v17 = vshrl.u32 %v2292_v47, 7  ;;  %v2293_v11 = vunpack.c.l.bf16 %v1365_v0  ;;  %v2301_v0 = vunpack.c.l.bf16 %v1385_v4 }
  0x2a   : > { %2289 = vst [vmem:[#allocation38_spill] sm:$0xff] %v1797_v9  ;;  %2290 = vst [vmem:[#allocation39_spill] sm:$0xff] %v1806_v16 }
  0x2b   : > { %2291 = vst [vmem:[#allocation40_spill] sm:$0xff] %v1811_v8  ;;  %v1825_v28 = vsub.s32 0, %v457_v17  ;;  %v1827_v10 = vsub.s32 1, %v457_v17  ;;  %v1829_v18 = vsub.s32 2, %v457_v17  ;;  %v1831_v33 = vsub.s32 3, %v457_v17 }
  0x2c   : > { %v1833_v12 = vsub.s32 4, %v457_v17  ;;  %v1835_v15 = vsub.s32 5, %v457_v17  ;;  %v1837_v47 = vsub.s32 6, %v457_v17  ;;  %v1839_v5 = vsub.s32 7, %v457_v17 }
  0x2d   : > { %v459_v30 = vrot.slane %v1464_v39, %v1825_v28  ;;  %v467_v21 = vrot.slane %v1464_v39, %v1827_v10  ;;  %v479_v22 = vrot.slane %v1464_v39, %v1829_v18  ;;  %v491_v8 = vrot.slane %v1464_v39, %v1831_v33 }
  0x2e   : > { %v503_v16 = vrot.slane %v1464_v39, %v1833_v12  ;;  %v515_v9 = vrot.slane %v1464_v39, %v1835_v15  ;;  %v527_v17 = vrot.slane %v1464_v39, %v1837_v47  ;;  %v539_v23 = vrot.slane %v1464_v39, %v1839_v5 }
  0x2f   : > { %v460_v35 = vmul.f32 %v2293_v11, %v459_v30  ;;  %v461_v40 = vmul.f32 %v2294_v24, %v459_v30  ;;  %v462_v42 = vmul.f32 %v2295_v29, %v459_v30  ;;  %v463_v51 = vmul.f32 %v2296_v31, %v459_v30 }
  0x30   : > { %v468_v53 = vmul.f32 %v2297_v34, %v467_v21  ;;  %v469_v57 = vmul.f32 %v2298_v36, %v467_v21  ;;  %v2299_v39 = vunpack.c.l.bf16 %v1380_v3  ;;  %v2300_v11 = vunpack.c.h.bf16 %v1380_v3 }
  0x31   : > { %v480_v24 = vmul.f32 %v2301_v0, %v479_v22  ;;  %v2302_v29 = vunpack.c.h.bf16 %v1385_v4  ;;  %v482_v30 = vmul.f32 %v2303_v1, %v479_v22  ;;  %v2304_v31 = vunpack.c.h.bf16 %v1393_v6 }
  0x32   : > { %v470_v41 = vmul.f32 %v2299_v39, %v467_v21  ;;  %v471_v46 = vmul.f32 %v2300_v11, %v467_v21  ;;  %v472_v2 = vadd.f32 %v468_v53, %v460_v35  ;;  %v473_v36 = vadd.f32 %v469_v57, %v461_v40 }
  0x33   : > { %v481_v63 = vmul.f32 %v2302_v29, %v479_v22  ;;  %v483_v34 = vmul.f32 %v2304_v31, %v479_v22  ;;  %v2305_v39 = vunpack.c.l.bf16 %v1398_v7  ;;  %v2306_v21 = vunpack.c.h.bf16 %v1398_v7 }
  0x34   : > { %v474_v48 = vadd.f32 %v470_v41, %v462_v42  ;;  %v475_v26 = vadd.f32 %v471_v46, %v463_v51  ;;  %v2307_v0 = vunpack.c.l.bf16 %v1407_v13  ;;  %v2308_v29 = vunpack.c.h.bf16 %v1407_v13 }
  0x35   : > { %v492_v3 = vmul.f32 %v2305_v39, %v491_v8  ;;  %v493_v11 = vmul.f32 %v2306_v21, %v491_v8  ;;  %v484_v1 = vadd.f32 %v480_v24, %v472_v2  ;;  %v485_v27 = vadd.f32 %v481_v63, %v473_v36 }
  0x36   : > { %v494_v4 = vmul.f32 %v2307_v0, %v491_v8  ;;  %v495_v52 = vmul.f32 %v2308_v29, %v491_v8  ;;  %v486_v6 = vadd.f32 %v482_v30, %v474_v48  ;;  %v487_v22 = vadd.f32 %v483_v34, %v475_v26 }
  0x37   : > { %v2309_v35 = vunpack.c.l.bf16 %v1412_v14  ;;  %v2310_v41 = vunpack.c.h.bf16 %v1412_v14  ;;  %v2311_v46 = vunpack.c.l.bf16 %v1422_v19  ;;  %v2312_v51 = vunpack.c.h.bf16 %v1422_v19 }
  0x38   : > { %v496_v57 = vadd.f32 %v492_v3, %v484_v1  ;;  %v497_v31 = vadd.f32 %v493_v11, %v485_v27  ;;  %v498_v13 = vadd.f32 %v494_v4, %v486_v6  ;;  %v499_v8 = vadd.f32 %v495_v52, %v487_v22 }
  0x39   : > { %v504_v40 = vmul.f32 %v2309_v35, %v503_v16  ;;  %v505_v42 = vmul.f32 %v2310_v41, %v503_v16  ;;  %v506_v7 = vmul.f32 %v2311_v46, %v503_v16  ;;  %v507_v53 = vmul.f32 %v2312_v51, %v503_v16 }
  0x3a   : > { %v2313_v63 = vunpack.c.l.bf16 %v1427_v20  ;;  %v2314_v26 = vunpack.c.h.bf16 %v1427_v20  ;;  %v2315_v30 = vunpack.c.l.bf16 %v1439_v25  ;;  %v2316_v34 = vunpack.c.h.bf16 %v1439_v25 }
  0x3b   : > { %v508_v36 = vadd.f32 %v504_v40, %v496_v57  ;;  %v509_v39 = vadd.f32 %v505_v42, %v497_v31  ;;  %v510_v19 = vadd.f32 %v506_v7, %v498_v13  ;;  %v511_v16 = vadd.f32 %v507_v53, %v499_v8 }
  0x3c   : > { %v516_v48 = vmul.f32 %v2313_v63, %v515_v9  ;;  %v517_v24 = vmul.f32 %v2314_v26, %v515_v9  ;;  %v518_v14 = vmul.f32 %v2315_v30, %v515_v9  ;;  %v519_v2 = vmul.f32 %v2316_v34, %v515_v9 }
  0x3d   : > { %v2317_v27 = vunpack.c.l.bf16 %v1448_v32  ;;  %v2318_v52 = vunpack.c.h.bf16 %v1448_v32  ;;  %v2319_v11 = vunpack.c.l.bf16 %v1457_v37  ;;  %v2320_v0 = vunpack.c.h.bf16 %v1457_v37 }
  0x3e   : > { %v520_v29 = vadd.f32 %v516_v48, %v508_v36  ;;  %v521_v1 = vadd.f32 %v517_v24, %v509_v39  ;;  %v522_v25 = vadd.f32 %v518_v14, %v510_v19  ;;  %v523_v9 = vadd.f32 %v519_v2, %v511_v16 }
  0x3f   : > { %v528_v3 = vmul.f32 %v2317_v27, %v527_v17  ;;  %v529_v21 = vmul.f32 %v2318_v52, %v527_v17  ;;  %v530_v20 = vmul.f32 %v2319_v11, %v527_v17  ;;  %v531_v4 = vmul.f32 %v2320_v0, %v527_v17 }
  0x40   : > { %v2321_v6 = vunpack.c.l.bf16 %v1462_v38  ;;  %v2322_v35 = vunpack.c.h.bf16 %v1462_v38  ;;  %v2323_v41 = vunpack.c.l.bf16 %v1472_v43  ;;  %v2324_v42 = vunpack.c.h.bf16 %v1472_v43 }
  0x41   : > { %v532_v7 = vadd.f32 %v528_v3, %v520_v29  ;;  %v533_v51 = vadd.f32 %v529_v21, %v521_v1  ;;  %v534_v37 = vadd.f32 %v530_v20, %v522_v25  ;;  %v535_v17 = vadd.f32 %v531_v4, %v523_v9 }
  0x42   : > { %v540_v22 = vmul.f32 %v2321_v6, %v539_v23  ;;  %v541_v40 = vmul.f32 %v2322_v35, %v539_v23  ;;  %v542_v32 = vmul.f32 %v2323_v41, %v539_v23  ;;  %v543_v46 = vmul.f32 %v2324_v42, %v539_v23 }
  0x43   : > { %v551_v53 = vrot.slane %v1479_v45, %v1825_v28  ;;  %v563_v57 = vrot.slane %v1479_v45, %v1827_v10  ;;  %v575_v38 = vrot.slane %v1479_v45, %v1829_v18  ;;  %v587_v31 = vrot.slane %v1479_v45, %v1831_v33 }
  0x44   : > { %v544_v13 = vadd.f32 %v540_v22, %v532_v7  ;;  %v545_v8 = vadd.f32 %v541_v40, %v533_v51  ;;  %v546_v43 = vadd.f32 %v542_v32, %v534_v37  ;;  %v547_v23 = vadd.f32 %v543_v46, %v535_v17 }
  0x45   : > { %v2325_v63 = vunpack.c.l.bf16 %v1477_v44  ;;  %v2326_v26 = vunpack.c.h.bf16 %v1477_v44  ;;  %v2327_v30 = vunpack.c.l.bf16 %v1489_v49  ;;  %v2328_v34 = vunpack.c.h.bf16 %v1489_v49 }
  0x46   : > { %v2329_v36 = vunpack.c.l.bf16 %v1494_v50  ;;  %v2330_v19 = vunpack.c.h.bf16 %v1494_v50  ;;  %v2331_v27 = vunpack.c.l.bf16 %v1503_v55  ;;  %v2332_v52 = vunpack.c.h.bf16 %v1503_v55 }
  0x47   : > { %v552_v48 = vmul.f32 %v2325_v63, %v551_v53  ;;  %v553_v24 = vmul.f32 %v2326_v26, %v551_v53  ;;  %v554_v14 = vmul.f32 %v2327_v30, %v551_v53  ;;  %v555_v2 = vmul.f32 %v2328_v34, %v551_v53 }
  0x48   : > { %v564_v39 = vmul.f32 %v2329_v36, %v563_v57  ;;  %v565_v16 = vmul.f32 %v2330_v19, %v563_v57  ;;  %v566_v3 = vmul.f32 %v2331_v27, %v563_v57  ;;  %v567_v21 = vmul.f32 %v2332_v52, %v563_v57 }
  0x49   : > { %v556_v44 = vadd.f32 %v552_v48, %v544_v13  ;;  %v557_v11 = vadd.f32 %v553_v24, %v545_v8  ;;  %v558_v20 = vadd.f32 %v554_v14, %v546_v43  ;;  %v559_v0 = vadd.f32 %v555_v2, %v547_v23 }
  0x4a   : > { %v2333_v4 = vunpack.c.l.bf16 %v1508_v56  ;;  %v2334_v29 = vunpack.c.h.bf16 %v1508_v56  ;;  %v2335_v25 = vunpack.c.l.bf16 %v1517_v61  ;;  %v2336_v9 = vunpack.c.h.bf16 %v1517_v61 }
  0x4b   : > { %v568_v22 = vadd.f32 %v564_v39, %v556_v44  ;;  %v569_v35 = vadd.f32 %v565_v16, %v557_v11  ;;  %v570_v55 = vadd.f32 %v566_v3, %v558_v20  ;;  %v571_v40 = vadd.f32 %v567_v21, %v559_v0  ;;  %v2347_v16 = vld [vmem:[#allocation4_spill] sm:$0xff]  ;;  %v2350_v0 = vld [vmem:[#allocation5_spill] sm:$0xff] }
  0x4c   : > { %v576_v49 = vmul.f32 %v2333_v4, %v575_v38  ;;  %v577_v1 = vmul.f32 %v2334_v29, %v575_v38  ;;  %v578_v50 = vmul.f32 %v2335_v25, %v575_v38  ;;  %v579_v6 = vmul.f32 %v2336_v9, %v575_v38 }
  0x4d   : > { %v2337_v41 = vunpack.c.l.bf16 %v1522_v62  ;;  %v2338_v42 = vunpack.c.h.bf16 %v1522_v62  ;;  %v2339_v7 = vunpack.c.l.bf16 %v1531_v60  ;;  %v2340_v51 = vunpack.c.h.bf16 %v1531_v60 }
  0x4e   : > { %v580_v17 = vadd.f32 %v576_v49, %v568_v22  ;;  %v581_v53 = vadd.f32 %v577_v1, %v569_v35  ;;  %v582_v61 = vadd.f32 %v578_v50, %v570_v55  ;;  %v583_v57 = vadd.f32 %v579_v6, %v571_v40  ;;  %v2353_v1 = vld [vmem:[#allocation6_spill] sm:$0xff]  ;;  %v2356_v40 = vld [vmem:[#allocation7_spill] sm:$0xff] }
  0x4f   : > { %v588_v32 = vmul.f32 %v2337_v41, %v587_v31  ;;  %v589_v46 = vmul.f32 %v2338_v42, %v587_v31  ;;  %v590_v56 = vmul.f32 %v2339_v7, %v587_v31  ;;  %v591_v37 = vmul.f32 %v2340_v51, %v587_v31  ;;  %v2359_v7 = vld [vmem:[#allocation8_spill] sm:$0xff] }
  0x50   : > { %v599_v38 = vrot.slane %v1479_v45, %v1833_v12  ;;  %v611_v13 = vrot.slane %v1479_v45, %v1835_v15  ;;  %v623_v62 = vrot.slane %v1479_v45, %v1837_v47  ;;  %v635_v8 = vrot.slane %v1479_v45, %v1839_v5 }
  0x51   : > { %v592_v43 = vadd.f32 %v588_v32, %v580_v17  ;;  %v593_v23 = vadd.f32 %v589_v46, %v581_v53  ;;  %v594_v60 = vadd.f32 %v590_v56, %v582_v61  ;;  %v595_v31 = vadd.f32 %v591_v37, %v583_v57 }
  0x52   : > { %v2341_v63 = vunpack.c.l.bf16 %v1536_v58  ;;  %v2342_v26 = vunpack.c.h.bf16 %v1536_v58  ;;  %v2343_v30 = vunpack.c.l.bf16 %v1545_v59  ;;  %v2344_v34 = vunpack.c.h.bf16 %v1545_v59 }
  0x53   : > { %v2345_v36 = vunpack.c.l.bf16 %v1550_v54  ;;  %v2346_v45 = vunpack.c.h.bf16 %v1550_v54  ;;  %v2348_v27 = vunpack.c.l.bf16 %v2347_v16  ;;  %v2349_v52 = vunpack.c.h.bf16 %v2347_v16  ;;  %v2369_v16 = vld [vmem:[#allocation11_spill] sm:$0xff] }
  0x54   : > { %v600_v48 = vmul.f32 %v2341_v63, %v599_v38  ;;  %v601_v24 = vmul.f32 %v2342_v26, %v599_v38  ;;  %v602_v14 = vmul.f32 %v2343_v30, %v599_v38  ;;  %v603_v2 = vmul.f32 %v2344_v34, %v599_v38  ;;  %v2363_v26 = vld [vmem:[#allocation9_spill] sm:$0xff] }
  0x55   : > { %v612_v39 = vmul.f32 %v2345_v36, %v611_v13  ;;  %v613_v19 = vmul.f32 %v2346_v45, %v611_v13  ;;  %v614_v3 = vmul.f32 %v2348_v27, %v611_v13  ;;  %v615_v21 = vmul.f32 %v2349_v52, %v611_v13  ;;  %v2362_v13 = vld [vmem:[#allocation2_spill] sm:$0xff] }
  0x56   : > { %v604_v58 = vadd.f32 %v600_v48, %v592_v43  ;;  %v605_v44 = vadd.f32 %v601_v24, %v593_v23  ;;  %v606_v11 = vadd.f32 %v602_v14, %v594_v60  ;;  %v607_v20 = vadd.f32 %v603_v2, %v595_v31  ;;  %v2366_v2 = vld [vmem:[#allocation10_spill] sm:$0xff] }
  0x57   : > { %v2351_v4 = vunpack.c.l.bf16 %v2350_v0  ;;  %v2352_v49 = vunpack.c.h.bf16 %v2350_v0  ;;  %v2354_v25 = vunpack.c.l.bf16 %v2353_v1  ;;  %v2355_v50 = vunpack.c.h.bf16 %v2353_v1  ;;  %v2375_v1 = vld [vmem:[#allocation13_spill] sm:$0xff] }
  0x58   : > { %v616_v6 = vadd.f32 %v612_v39, %v604_v58  ;;  %v617_v22 = vadd.f32 %v613_v19, %v605_v44  ;;  %v618_v35 = vadd.f32 %v614_v3, %v606_v11  ;;  %v619_v55 = vadd.f32 %v615_v21, %v607_v20  ;;  %v2372_v58 = vld [vmem:[#allocation12_spill] sm:$0xff] }
  0x59   : > { %v624_v59 = vmul.f32 %v2351_v4, %v623_v62  ;;  %v625_v29 = vmul.f32 %v2352_v49, %v623_v62  ;;  %v626_v54 = vmul.f32 %v2354_v25, %v623_v62  ;;  %v627_v9 = vmul.f32 %v2355_v50, %v623_v62 }
  0x5a   : > { %v2357_v41 = vunpack.c.l.bf16 %v2356_v40  ;;  %v2358_v42 = vunpack.c.h.bf16 %v2356_v40  ;;  %v2360_v56 = vunpack.c.l.bf16 %v2359_v7  ;;  %v2361_v37 = vunpack.c.h.bf16 %v2359_v7  ;;  %v2381_v7 = vld [vmem:[#allocation15_spill] sm:$0xff] }
  0x5b   : > { %v628_v53 = vadd.f32 %v624_v59, %v616_v6  ;;  %v629_v61 = vadd.f32 %v625_v29, %v617_v22  ;;  %v630_v57 = vadd.f32 %v626_v54, %v618_v35  ;;  %v631_v38 = vadd.f32 %v627_v9, %v619_v55  ;;  %v2378_v6 = vld [vmem:[#allocation14_spill] sm:$0xff] }
  0x5c   : > { %v636_v32 = vmul.f32 %v2357_v41, %v635_v8  ;;  %v637_v46 = vmul.f32 %v2358_v42, %v635_v8  ;;  %v638_v51 = vmul.f32 %v2360_v56, %v635_v8  ;;  %v639_v17 = vmul.f32 %v2361_v37, %v635_v8 }
  0x5d   : > { %v647_v62 = vrot.slane %v2362_v13, %v1825_v28  ;;  %v659_v43 = vrot.slane %v2362_v13, %v1827_v10  ;;  %v671_v23 = vrot.slane %v2362_v13, %v1829_v18  ;;  %v683_v60 = vrot.slane %v2362_v13, %v1831_v33 }
  0x5e   : > { %v640_v31 = vadd.f32 %v636_v32, %v628_v53  ;;  %v641_v63 = vadd.f32 %v637_v46, %v629_v61  ;;  %v642_v48 = vadd.f32 %v638_v51, %v630_v57  ;;  %v643_v8 = vadd.f32 %v639_v17, %v631_v38  ;;  %v2384_v53 = vld [vmem:[#allocation16_spill] sm:$0xff] }
  0x5f   : > { %v2364_v24 = vunpack.c.l.bf16 %v2363_v26  ;;  %v2365_v14 = vunpack.c.h.bf16 %v2363_v26  ;;  %v2367_v36 = vunpack.c.l.bf16 %v2366_v2  ;;  %v2368_v45 = vunpack.c.h.bf16 %v2366_v2  ;;  %v2387_v2 = vld [vmem:[#allocation17_spill] sm:$0xff] }
  0x60   : > { %v2370_v27 = vunpack.c.l.bf16 %v2369_v16  ;;  %v2371_v52 = vunpack.c.h.bf16 %v2369_v16  ;;  %v2373_v44 = vunpack.c.l.bf16 %v2372_v58  ;;  %v2374_v20 = vunpack.c.h.bf16 %v2372_v58  ;;  %v2390_v16 = vld [vmem:[#allocation18_spill] sm:$0xff]  ;;  %v2393_v58 = vld [vmem:[#allocation19_spill] sm:$0xff] }
  0x61   : > { %v648_v30 = vmul.f32 %v2364_v24, %v647_v62  ;;  %v649_v34 = vmul.f32 %v2365_v14, %v647_v62  ;;  %v650_v39 = vmul.f32 %v2367_v36, %v647_v62  ;;  %v651_v19 = vmul.f32 %v2368_v45, %v647_v62 }
  0x62   : > { %v660_v3 = vmul.f32 %v2370_v27, %v659_v43  ;;  %v661_v21 = vmul.f32 %v2371_v52, %v659_v43  ;;  %v662_v11 = vmul.f32 %v2373_v44, %v659_v43  ;;  %v663_v0 = vmul.f32 %v2374_v20, %v659_v43 }
  0x63   : > { %v652_v4 = vadd.f32 %v648_v30, %v640_v31  ;;  %v653_v59 = vadd.f32 %v649_v34, %v641_v63  ;;  %v654_v49 = vadd.f32 %v650_v39, %v642_v48  ;;  %v655_v29 = vadd.f32 %v651_v19, %v643_v8 }
  0x64   : > { %v2376_v25 = vunpack.c.l.bf16 %v2375_v1  ;;  %v2377_v50 = vunpack.c.h.bf16 %v2375_v1  ;;  %v2379_v22 = vunpack.c.l.bf16 %v2378_v6  ;;  %v2380_v55 = vunpack.c.h.bf16 %v2378_v6 }
  0x65   : > { %v664_v41 = vadd.f32 %v660_v3, %v652_v4  ;;  %v665_v32 = vadd.f32 %v661_v21, %v653_v59  ;;  %v666_v42 = vadd.f32 %v662_v11, %v654_v49  ;;  %v667_v46 = vadd.f32 %v663_v0, %v655_v29  ;;  %v2396_v0 = vld [vmem:[#allocation20_spill] sm:$0xff] }
  0x66   : > { %v672_v54 = vmul.f32 %v2376_v25, %v671_v23  ;;  %v673_v9 = vmul.f32 %v2377_v50, %v671_v23  ;;  %v674_v35 = vmul.f32 %v2379_v22, %v671_v23  ;;  %v675_v40 = vmul.f32 %v2380_v55, %v671_v23 }
  0x67   : > { %v2382_v56 = vunpack.c.l.bf16 %v2381_v7  ;;  %v2383_v37 = vunpack.c.h.bf16 %v2381_v7  ;;  %v2385_v61 = vunpack.c.l.bf16 %v2384_v53  ;;  %v2386_v38 = vunpack.c.h.bf16 %v2384_v53 }
  0x68   : > { %v676_v43 = vadd.f32 %v672_v54, %v664_v41  ;;  %v677_v31 = vadd.f32 %v673_v9, %v665_v32  ;;  %v678_v63 = vadd.f32 %v674_v35, %v666_v42  ;;  %v679_v23 = vadd.f32 %v675_v40, %v667_v46  ;;  %v2399_v9 = vld [vmem:[#allocation21_spill] sm:$0xff]  ;;  %v2402_v40 = vld [vmem:[#allocation22_spill] sm:$0xff] }
  0x69   : > { %v684_v51 = vmul.f32 %v2382_v56, %v683_v60  ;;  %v685_v17 = vmul.f32 %v2383_v37, %v683_v60  ;;  %v686_v57 = vmul.f32 %v2385_v61, %v683_v60  ;;  %v687_v62 = vmul.f32 %v2386_v38, %v683_v60 }
  0x6a   : > { %v695_v48 = vrot.slane %v2362_v13, %v1833_v12  ;;  %v707_v8 = vrot.slane %v2362_v13, %v1835_v15  ;;  %v719_v26 = vrot.slane %v2362_v13, %v1837_v47  ;;  %v731_v24 = vrot.slane %v2362_v13, %v1839_v5 }
  0x6b   : > { %v688_v30 = vadd.f32 %v684_v51, %v676_v43  ;;  %v689_v14 = vadd.f32 %v685_v17, %v677_v31  ;;  %v690_v34 = vadd.f32 %v686_v57, %v678_v63  ;;  %v691_v60 = vadd.f32 %v687_v62, %v679_v23  ;;  %v2405_v17 = vld [vmem:[#allocation23_spill] sm:$0xff]  ;;  %v2408_v62 = vld [vmem:[#allocation24_spill] sm:$0xff] }
  0x6c   : > { %v2388_v36 = vunpack.c.l.bf16 %v2387_v2  ;;  %v2389_v45 = vunpack.c.h.bf16 %v2387_v2  ;;  %v2391_v27 = vunpack.c.l.bf16 %v2390_v16  ;;  %v2392_v52 = vunpack.c.h.bf16 %v2390_v16  ;;  %v2412_v16 = vld [vmem:[#allocation25_spill] sm:$0xff] }
  0x6d   : > { %v2394_v44 = vunpack.c.l.bf16 %v2393_v58  ;;  %v2395_v13 = vunpack.c.h.bf16 %v2393_v58  ;;  %v2397_v4 = vunpack.c.l.bf16 %v2396_v0  ;;  %v2398_v49 = vunpack.c.h.bf16 %v2396_v0 }
  0x6e   : > { %v696_v39 = vmul.f32 %v2388_v36, %v695_v48  ;;  %v697_v19 = vmul.f32 %v2389_v45, %v695_v48  ;;  %v698_v3 = vmul.f32 %v2391_v27, %v695_v48  ;;  %v699_v21 = vmul.f32 %v2392_v52, %v695_v48 }
  0x6f   : > { %v708_v11 = vmul.f32 %v2394_v44, %v707_v8  ;;  %v709_v20 = vmul.f32 %v2395_v13, %v707_v8  ;;  %v710_v59 = vmul.f32 %v2397_v4, %v707_v8  ;;  %v711_v29 = vmul.f32 %v2398_v49, %v707_v8  ;;  %v2421_v4 = vld [vmem:[#allocation28_spill] sm:$0xff] }
  0x70   : > { %v700_v1 = vadd.f32 %v696_v39, %v688_v30  ;;  %v701_v25 = vadd.f32 %v697_v19, %v689_v14  ;;  %v702_v54 = vadd.f32 %v698_v3, %v690_v34  ;;  %v703_v50 = vadd.f32 %v699_v21, %v691_v60  ;;  %v2411_v14 = vld [vmem:[#allocation3_spill] sm:$0xff] }
  0x71   : > { %v2400_v6 = vunpack.c.l.bf16 %v2399_v9  ;;  %v2401_v35 = vunpack.c.h.bf16 %v2399_v9  ;;  %v2403_v41 = vunpack.c.l.bf16 %v2402_v40  ;;  %v2404_v42 = vunpack.c.h.bf16 %v2402_v40 }
  0x72   : > { %v712_v7 = vadd.f32 %v708_v11, %v700_v1  ;;  %v713_v56 = vadd.f32 %v709_v20, %v701_v25  ;;  %v714_v51 = vadd.f32 %v710_v59, %v702_v54  ;;  %v715_v37 = vadd.f32 %v711_v29, %v703_v50 }
  0x73   : > { %v720_v22 = vmul.f32 %v2400_v6, %v719_v26  ;;  %v721_v55 = vmul.f32 %v2401_v35, %v719_v26  ;;  %v722_v32 = vmul.f32 %v2403_v41, %v719_v26  ;;  %v723_v46 = vmul.f32 %v2404_v42, %v719_v26  ;;  %v2424_v6 = vld [vmem:[#allocation29_spill] sm:$0xff]  ;;  %v2427_v41 = vld [vmem:[#allocation30_spill] sm:$0xff] }
  0x74   : > { %v2406_v53 = vunpack.c.l.bf16 %v2405_v17  ;;  %v2407_v57 = vunpack.c.h.bf16 %v2405_v17  ;;  %v2409_v43 = vunpack.c.l.bf16 %v2408_v62  ;;  %v2410_v63 = vunpack.c.h.bf16 %v2408_v62 }
  0x75   : > { %v724_v48 = vadd.f32 %v720_v22, %v712_v7  ;;  %v725_v8 = vadd.f32 %v721_v55, %v713_v56  ;;  %v726_v30 = vadd.f32 %v722_v32, %v714_v51  ;;  %v727_v26 = vadd.f32 %v723_v46, %v715_v37 }
  0x76   : > { %v732_v61 = vmul.f32 %v2406_v53, %v731_v24  ;;  %v733_v38 = vmul.f32 %v2407_v57, %v731_v24  ;;  %v734_v31 = vmul.f32 %v2409_v43, %v731_v24  ;;  %v735_v23 = vmul.f32 %v2410_v63, %v731_v24  ;;  %v2430_v53 = vld [vmem:[#allocation31_spill] sm:$0xff]  ;;  %v2433_v43 = vld [vmem:[#allocation32_spill] sm:$0xff] }
  0x77   : > { %v743_v34 = vrot.slane %v2411_v14, %v1825_v28  ;;  %v755_v60 = vrot.slane %v2411_v14, %v1827_v10  ;;  %v767_v2 = vrot.slane %v2411_v14, %v1829_v18  ;;  %v779_v36 = vrot.slane %v2411_v14, %v1831_v33  ;;  %v2415_v28 = vld [vmem:[#allocation26_spill] sm:$0xff]  ;;  %v2418_v18 = vld [vmem:[#allocation27_spill] sm:$0xff] }
  0x78   : > { %v736_v39 = vadd.f32 %v732_v61, %v724_v48  ;;  %v737_v45 = vadd.f32 %v733_v38, %v725_v8  ;;  %v738_v19 = vadd.f32 %v734_v31, %v726_v30  ;;  %v739_v24 = vadd.f32 %v735_v23, %v727_v26 }
  0x79   : > { %v2413_v27 = vunpack.c.l.bf16 %v2412_v16  ;;  %v2414_v52 = vunpack.c.h.bf16 %v2412_v16  ;;  %v2416_v58 = vunpack.c.l.bf16 %v2415_v28  ;;  %v2417_v10 = vunpack.c.h.bf16 %v2415_v28  ;;  %v2439_v28 = vld [vmem:[#allocation34_spill] sm:$0xff] }
  0x7a   : > { %v2419_v13 = vunpack.c.l.bf16 %v2418_v18  ;;  %v2420_v33 = vunpack.c.h.bf16 %v2418_v18  ;;  %v2422_v59 = vunpack.c.l.bf16 %v2421_v4  ;;  %v2423_v29 = vunpack.c.h.bf16 %v2421_v4 }
  0x7b   : > { %v744_v3 = vmul.f32 %v2413_v27, %v743_v34  ;;  %v745_v21 = vmul.f32 %v2414_v52, %v743_v34  ;;  %v746_v44 = vmul.f32 %v2416_v58, %v743_v34  ;;  %v747_v11 = vmul.f32 %v2417_v10, %v743_v34  ;;  %v2436_v27 = vld [vmem:[#allocation33_spill] sm:$0xff]  ;;  %v2442_v10 = vld [vmem:[#allocation35_spill] sm:$0xff] }
  0x7c   : > { %v756_v20 = vmul.f32 %v2419_v13, %v755_v60  ;;  %v757_v0 = vmul.f32 %v2420_v33, %v755_v60  ;;  %v758_v49 = vmul.f32 %v2422_v59, %v755_v60  ;;  %v759_v1 = vmul.f32 %v2423_v29, %v755_v60  ;;  %v2445_v13 = vld [vmem:[#allocation36_spill] sm:$0xff] }
  0x7d   : > { %v748_v25 = vadd.f32 %v744_v3, %v736_v39  ;;  %v749_v54 = vadd.f32 %v745_v21, %v737_v45  ;;  %v750_v50 = vadd.f32 %v746_v44, %v738_v19  ;;  %v751_v9 = vadd.f32 %v747_v11, %v739_v24 }
  0x7e   : > { %v2425_v22 = vunpack.c.l.bf16 %v2424_v6  ;;  %v2426_v55 = vunpack.c.h.bf16 %v2424_v6  ;;  %v2428_v32 = vunpack.c.l.bf16 %v2427_v41  ;;  %v2429_v46 = vunpack.c.h.bf16 %v2427_v41 }
  0x7f   : > { %v760_v56 = vadd.f32 %v756_v20, %v748_v25  ;;  %v761_v51 = vadd.f32 %v757_v0, %v749_v54  ;;  %v762_v37 = vadd.f32 %v758_v49, %v750_v50  ;;  %v763_v17 = vadd.f32 %v759_v1, %v751_v9  ;;  %v2448_v25 = vld [vmem:[#allocation37_spill] sm:$0xff] }
  0x80   : > { %v768_v35 = vmul.f32 %v2425_v22, %v767_v2  ;;  %v769_v40 = vmul.f32 %v2426_v55, %v767_v2  ;;  %v770_v42 = vmul.f32 %v2428_v32, %v767_v2  ;;  %v771_v7 = vmul.f32 %v2429_v46, %v767_v2  ;;  %v2451_v22 = vld [vmem:[#allocation38_spill] sm:$0xff] }
  0x81   : > { %v2431_v61 = vunpack.c.l.bf16 %v2430_v53  ;;  %v2432_v38 = vunpack.c.h.bf16 %v2430_v53  ;;  %v2434_v31 = vunpack.c.l.bf16 %v2433_v43  ;;  %v2435_v23 = vunpack.c.h.bf16 %v2433_v43 }
  0x82   : > { %v772_v8 = vadd.f32 %v768_v35, %v760_v56  ;;  %v773_v30 = vadd.f32 %v769_v40, %v761_v51  ;;  %v774_v26 = vadd.f32 %v770_v42, %v762_v37  ;;  %v775_v34 = vadd.f32 %v771_v7, %v763_v17  ;;  %v2454_v56 = vld [vmem:[#allocation39_spill] sm:$0xff] }
  0x83   : > { %v780_v57 = vmul.f32 %v2431_v61, %v779_v36  ;;  %v781_v62 = vmul.f32 %v2432_v38, %v779_v36  ;;  %v782_v63 = vmul.f32 %v2434_v31, %v779_v36  ;;  %v783_v48 = vmul.f32 %v2435_v23, %v779_v36  ;;  %v2457_v61 = vld [vmem:[#allocation40_spill] sm:$0xff] }
  0x84   : > { %v791_v60 = vrot.slane %v2411_v14, %v1833_v12  ;;  %v803_v2 = vrot.slane %v2411_v14, %v1835_v15  ;;  %v815_v39 = vrot.slane %v2411_v14, %v1837_v47  ;;  %v827_v45 = vrot.slane %v2411_v14, %v1839_v5 }
  0x85   : > { %v784_v19 = vadd.f32 %v780_v57, %v772_v8  ;;  %v785_v24 = vadd.f32 %v781_v62, %v773_v30  ;;  %v786_v16 = vadd.f32 %v782_v63, %v774_v26  ;;  %v787_v36 = vadd.f32 %v783_v48, %v775_v34 }
  0x86   : > { %v2437_v3 = vunpack.c.l.bf16 %v2436_v27  ;;  %v2438_v21 = vunpack.c.h.bf16 %v2436_v27  ;;  %v2440_v58 = vunpack.c.l.bf16 %v2439_v28  ;;  %v2441_v44 = vunpack.c.h.bf16 %v2439_v28 }
  0x87   : > { %v2443_v11 = vunpack.c.l.bf16 %v2442_v10  ;;  %v2444_v14 = vunpack.c.h.bf16 %v2442_v10  ;;  %v2446_v20 = vunpack.c.l.bf16 %v2445_v13  ;;  %v2447_v0 = vunpack.c.h.bf16 %v2445_v13 }
  0x88   : > { %v792_v52 = vmul.f32 %v2437_v3, %v791_v60  ;;  %v793_v12 = vmul.f32 %v2438_v21, %v791_v60  ;;  %v794_v15 = vmul.f32 %v2440_v58, %v791_v60  ;;  %v795_v47 = vmul.f32 %v2441_v44, %v791_v60 }
  0x89   : > { %v804_v5 = vmul.f32 %v2443_v11, %v803_v2  ;;  %v805_v18 = vmul.f32 %v2444_v14, %v803_v2  ;;  %v806_v33 = vmul.f32 %v2446_v20, %v803_v2  ;;  %v807_v4 = vmul.f32 %v2447_v0, %v803_v2 }
  0x8a   : > { %v796_v59 = vadd.f32 %v792_v52, %v784_v19  ;;  %v797_v49 = vadd.f32 %v793_v12, %v785_v24  ;;  %v798_v29 = vadd.f32 %v794_v15, %v786_v16  ;;  %v799_v1 = vadd.f32 %v795_v47, %v787_v36 }
  0x8b   : > { %v2449_v54 = vunpack.c.l.bf16 %v2448_v25  ;;  %v2450_v9 = vunpack.c.h.bf16 %v2448_v25  ;;  %v2452_v35 = vunpack.c.l.bf16 %v2451_v22  ;;  %v2453_v40 = vunpack.c.h.bf16 %v2451_v22 }
  0x8c   : > { %v808_v32 = vadd.f32 %v804_v5, %v796_v59  ;;  %v809_v42 = vadd.f32 %v805_v18, %v797_v49  ;;  %v810_v46 = vadd.f32 %v806_v33, %v798_v29  ;;  %v811_v7 = vadd.f32 %v807_v4, %v799_v1 }
  0x8d   : > { %v816_v50 = vmul.f32 %v2449_v54, %v815_v39  ;;  %v817_v6 = vmul.f32 %v2450_v9, %v815_v39  ;;  %v818_v55 = vmul.f32 %v2452_v35, %v815_v39  ;;  %v819_v41 = vmul.f32 %v2453_v40, %v815_v39 }
  0x8e   : > { %v2455_v51 = vunpack.c.l.bf16 %v2454_v56  ;;  %v2456_v17 = vunpack.c.h.bf16 %v2454_v56  ;;  %v2458_v57 = vunpack.c.l.bf16 %v2457_v61  ;;  %v2459_v62 = vunpack.c.h.bf16 %v2457_v61 }
  0x8f   : > { %v820_v31 = vadd.f32 %v816_v50, %v808_v32  ;;  %v821_v63 = vadd.f32 %v817_v6, %v809_v42  ;;  %v822_v23 = vadd.f32 %v818_v55, %v810_v46  ;;  %v823_v48 = vadd.f32 %v819_v41, %v811_v7 }
  0x90   : > { %v828_v37 = vmul.f32 %v2455_v51, %v827_v45  ;;  %v829_v53 = vmul.f32 %v2456_v17, %v827_v45  ;;  %v830_v38 = vmul.f32 %v2458_v57, %v827_v45  ;;  %v831_v43 = vmul.f32 %v2459_v62, %v827_v45 }
  0x92   : > { %v832_v8 = vadd.f32 %v828_v37, %v820_v31  ;;  %v833_v30 = vadd.f32 %v829_v53, %v821_v63  ;;  %v834_v26 = vadd.f32 %v830_v38, %v822_v23  ;;  %v835_v34 = vadd.f32 %v831_v43, %v823_v48 }
  0x94   : > { %836 = vst [vmem:[%s191_s27] sm:$0xff] %v832_v8  ;;  %837 = vst [vmem:[%s191_s27 + $0x8] sm:$0xff] %v833_v30 }
  0x95   : > { %838 = vst [vmem:[%s191_s27 + $0x10] sm:$0xff] %v834_v26  ;;  %839 = vst [vmem:[%s191_s27 + $0x18] sm:$0xff] %v835_v34 }
  0x96 PF: > { %s12_s11 = sadd.s32 1, %s1327_s11   ;;  %s2460_s9 = smov %s1323_s10 }
  0x97   : > { %p9_p5 = scmp.ge.s32.totalorder %s12_s11, 4   ;;  %s2461_s10 = smov %s2463_s12 }
  0x99   :  { %11 = sbr.rel (!%p9_p5) target bundleno = 2 (0x2), region = 61 }

// kernel: tile.43
= control target key start
LH: loop header
LB: loop body
LE: loop exit
PB: predicated region body
PF: predicated region fallthrough
CT: control target
= control target key end

     0   :  { %s22_s0 = inlined_call_operand.vmem [shape: f32[32], index: 0, kind: input, shape index: {}]   ;;  %s23_s1 = inlined_call_operand.vmem [shape: f32[4,32], index: 1, kind: output, shape index: {}]  }
   0x1   :  { %v4_v0 = vld [vmem:[%s22_s0] ss:$0 sm:$0xff] }
   0x2   :  { %5 = vst [vmem:[%s23_s1] sm:$0xf] %v4_v0 }

// kernel: tile.44
= control target key start
LH: loop header
LB: loop body
LE: loop exit
PB: predicated region body
PF: predicated region fallthrough
CT: control target
= control target key end

     0   :  { %vm7_vm0 = vcmask 261120   ;;  %s37_s8 = smov 32   ;;  %s38_s9 = smov 64   ;;  %vm13_vm1 = vcmask 1048320   ;;  %vm19_vm2 = vcmask 785920   ;;  %vm25_vm3 = vcmask 523520   ;;  %s55_s0 = inlined_call_operand.vmem [shape: f32[4,32], index: 0, kind: input, shape index: {}]   ;;  %s56_s1 = inlined_call_operand.vmem [shape: f32[1,128], index: 1, kind: output, shape index: {}]  }
   0x1   :  { %v4_v0 = vld [vmem:[%s55_s0] sm:$0xf]  ;;  %s36_s0 = smov 96  }
   0x2   :  { %5 = vst [vmem:[#allocation1] sm:$0xf] %v4_v0 }
   0x9   :  { %v10_v1 = vld [vmem:[#allocation1 + $0x3] sm:$0x1]   ;;  %v22_v2 = vld [vmem:[#allocation1 + $0x1] sm:$0x1]   ;;  %v6_v3 = vld [vmem:[#allocation1] sm:$0x1]  }
   0xa   :  { %11 = vrot.lane.b32.xlu0 %v10_v1, %s36_s0  ;;  %23 = vrot.lane.b32.xlu1 %v22_v2, %s37_s8  ;;  %v16_v4 = vld [vmem:[#allocation1 + $0x2] sm:$0x1]   ;;  %8 = vst.msk [vmem:[#allocation0] sm:$0x1] %vm7_vm0, %v6_v3  }
   0xe   :  { %17 = vrot.lane.b32.xlu0 %v16_v4, %s38_s9 }
  0x7c   :  { %v12_v5 = vpop.permute.xlu0 %11   ;;  %v24_v6 = vpop.permute.xlu1 %23  }
  0x7d   :  { %14 = vst.msk [vmem:[#allocation0] sm:$0x1] %vm13_vm1, %v12_v5  }
  0x80   :  { %v18_v7 = vpop.permute.xlu0 %17  }
  0x81   :  { %20 = vst.msk [vmem:[#allocation0] sm:$0x1] %vm19_vm2, %v18_v7  }
  0x82   :  { %26 = vst.msk [vmem:[#allocation0] sm:$0x1] %vm25_vm3, %v24_v6  }
  0x89   :  { %v30_v8 = vld [vmem:[#allocation0] sm:$0x1] }
  0x8a   :  { %32 = vst [vmem:[%s56_s1] sm:$0x1] %v30_v8 }

// kernel: wno2d_forward.12
= control target key start
LH: loop header
LB: loop body
LE: loop exit
PB: predicated region body
PF: predicated region fallthrough
CT: control target
= control target key end

     0   :  { %s1011_s15 = smov 0   ;;  %s1255_s0 = inlined_call_operand.vmem [shape: bf16[128,128], index: 0, kind: input, shape index: {}]   ;;  %s1256_s1 = inlined_call_operand.vmem [shape: f32[128,128], index: 1, kind: input, shape index: {}]   ;;  %s1257_s2 = inlined_call_operand.vmem [shape: f32[1,128], index: 2, kind: input, shape index: {}]   ;;  %s1258_s3 = inlined_call_operand.vmem [shape: bf16[128,128], index: 3, kind: input, shape index: {}]   ;;  %s1259_s4 = inlined_call_operand.vmem [shape: bf16[128,128], index: 4, kind: output, shape index: {}]  }
   0x1 LB: > { %s731_s16 = sadd.s32 4294967295, %s984_s15   ;;  %p735_p0 = scmp.ge.s32.totalorder %s984_s15, 1  ;;  %s984_s15 = sphi %s1011_s15, %s14_s15  }
   0x2   : > { %p174_p1 = scmp.lt.s32.totalorder %s984_s15, 3 }
   0x4   : > { %p175_p2 = pnand %p735_p0, %p174_p1 }
   0x5   : > { %v239_v0 = vld [vmem:[%s1256_s1] sm:$0xff] (!%p175_p2)  ;;  %v240_v1 = vld [vmem:[%s1256_s1 + $0x8] sm:$0xff] (!%p175_p2)  ;;  %v241_v2 = vld [vmem:[%s1256_s1 + $0x10] sm:$0xff] (!%p175_p2)  ;;  %s736_s23 = sshll.u32 (!%p175_p2), %s731_s16, 3 }
   0x6   : > { %178 = sbr.rel (%p175_p2) target bundleno = 331 (0x14b), region = 36  ;;  %v890_v3 = vpack.c.bf16 (!%p175_p2), %v240_v1, %v239_v0  ;;  %v242_v4 = vld [vmem:[%s1256_s1 + $0x18] sm:$0xff] (!%p175_p2)  ;;  %p206_p3 = scmp.lt.s32.totalorder (!%p175_p2), %s736_s23, 15  ;;  %v243_v6 = vld [vmem:[%s1256_s1 + $0x20] sm:$0xff] (!%p175_p2)  ;;  %v244_v7 = vld [vmem:[%s1256_s1 + $0x28] sm:$0xff] (!%p175_p2) }
   0x7   : > { %v894_v5 = vpack.c.bf16 (!%p175_p2), %v242_v4, %v241_v2  ;;  %v898_v8 = vpack.c.bf16 (!%p175_p2), %v244_v7, %v243_v6  ;;  %v245_v9 = vld [vmem:[%s1256_s1 + $0x30] sm:$0xff] (!%p175_p2)  ;;  %v246_v10 = vld [vmem:[%s1256_s1 + $0x38] sm:$0xff] (!%p175_p2)  ;;  %v247_v16 = vld [vmem:[%s1256_s1 + $0x40] sm:$0xff] (!%p175_p2) }
   0x8   : > { %891 = vmatprep.subr.bf16.mxu0 (!%p175_p2), %v890_v3  ;;  %922 = vmatprep.subr.bf16.mxu1 (!%p175_p2), %v890_v3  ;;  %v902_v15 = vpack.c.bf16 (!%p175_p2), %v246_v10, %v245_v9  ;;  %v248_v17 = vld [vmem:[%s1256_s1 + $0x48] sm:$0xff] (!%p175_p2)  ;;  %v249_v19 = vld [vmem:[%s1256_s1 + $0x50] sm:$0xff] (!%p175_p2)  ;;  %v250_v20 = vld [vmem:[%s1256_s1 + $0x58] sm:$0xff] (!%p175_p2) }
   0x9   : > { %893 = vmatpush3.bf16.msra.mxu0 (!%p175_p2), %v890_v3  ;;  %930 = vmatpush3.bf16.msra.mxu1 (!%p175_p2), %v890_v3  ;;  %v906_v18 = vpack.c.bf16 (!%p175_p2), %v248_v17, %v247_v16  ;;  %v910_v21 = vpack.c.bf16 (!%p175_p2), %v250_v20, %v249_v19  ;;  %v251_v22 = vld [vmem:[%s1256_s1 + $0x60] sm:$0xff] (!%p175_p2)  ;;  %v252_v23 = vld [vmem:[%s1256_s1 + $0x68] sm:$0xff] (!%p175_p2)  ;;  %v253_v25 = vld [vmem:[%s1256_s1 + $0x70] sm:$0xff] (!%p175_p2) }
   0xa   : > { %895 = vmatprep.subr.bf16.mxu0 (!%p175_p2), %v894_v5  ;;  %923 = vmatprep.subr.bf16.mxu1 (!%p175_p2), %v894_v5  ;;  %v914_v24 = vpack.c.bf16 (!%p175_p2), %v252_v23, %v251_v22  ;;  %v254_v26 = vld [vmem:[%s1256_s1 + $0x78] sm:$0xff] (!%p175_p2)  ;;  %v742_v38 = vld [vmem:[%s1257_s2] ss:$0 sm:$0xff] (!%p175_p2) }
   0xb   : > { %v918_v27 = vpack.c.bf16 (!%p175_p2), %v254_v26, %v253_v25 }
   0xd   : > { %s1261_s23 = smov (!%p206_p3, %s736_s23), 15  ;;  %897 = vmatpush3.bf16.msra.mxu0 %v894_v5  ;;  %931 = vmatpush3.bf16.msra.mxu1 %v894_v5 }
   0xe   : > { %s1037_s30 = sshll.u32 %s1261_s23, 2  ;;  %899 = vmatprep.subr.bf16.mxu0 %v898_v8  ;;  %924 = vmatprep.subr.bf16.mxu1 %v898_v8 }
   0xf   : > { %s1049_s11 = scalar_lea.vmem %s1255_s0, %s1037_s30  ;;  %s1083_s6 = scalar_lea.vmem %s1258_s3, %s1037_s30 }
  0x10   : > { %v762_v11 = vld [vmem:[%s1049_s11] sm:$0xff]   ;;  %v814_v12 = vld [vmem:[%s1049_s11 + $0x10] sm:$0xff]   ;;  %v813_v28 = vld [vmem:[%s1049_s11 + $0x8] sm:$0xff]  }
  0x11   : > { %v763_v13 = vunpack.c.l.bf16 %v762_v11  ;;  %v771_v14 = vunpack.c.l.bf16 %v814_v12  ;;  %901 = vmatpush3.bf16.msra.mxu0 %v898_v8  ;;  %932 = vmatpush3.bf16.msra.mxu1 %v898_v8  ;;  %v815_v29 = vld [vmem:[%s1049_s11 + $0x18] sm:$0xff]   ;;  %v764_v30 = vunpack.c.h.bf16 %v762_v11  ;;  %v772_v31 = vunpack.c.h.bf16 %v814_v12  ;;  %v778_v36 = vld [vmem:[%s1083_s6] sm:$0xff]   ;;  %v817_v37 = vld [vmem:[%s1083_s6 + $0x10] sm:$0xff]   ;;  %s1234_s11 = scalar_lea.vmem %s1259_s4, %s1037_s30 }
  0x12   : > { %903 = vmatprep.subr.bf16.mxu0 %v902_v15  ;;  %925 = vmatprep.subr.bf16.mxu1 %v902_v15  ;;  %v767_v32 = vunpack.c.l.bf16 %v813_v28  ;;  %v775_v33 = vunpack.c.l.bf16 %v815_v29  ;;  %v768_v34 = vunpack.c.h.bf16 %v813_v28  ;;  %v776_v35 = vunpack.c.h.bf16 %v815_v29  ;;  %v816_v1 = vld [vmem:[%s1083_s6 + $0x8] sm:$0xff]   ;;  %v818_v4 = vld [vmem:[%s1083_s6 + $0x18] sm:$0xff]  }
  0x13   : > { %878 = vmatprep.mubr.f32.mxu0 %v763_v13  ;;  %884 = vmatprep.mubr.f32.mxu1 %v771_v14  ;;  %v780_v39 = vunpack.c.h.bf16 %v778_v36  ;;  %v788_v40 = vunpack.c.h.bf16 %v817_v37  ;;  %v779_v43 = vunpack.c.l.bf16 %v778_v36  ;;  %v787_v44 = vunpack.c.l.bf16 %v817_v37 }
  0x14   : > { %v784_v9 = vunpack.c.h.bf16 %v816_v1  ;;  %v792_v12 = vunpack.c.h.bf16 %v818_v4  ;;  %v791_v17 = vunpack.c.l.bf16 %v818_v4 }
  0x15   : > { %905 = vmatpush3.bf16.msra.mxu0 %v902_v15  ;;  %933 = vmatpush3.bf16.msra.mxu1 %v902_v15  ;;  %v783_v15 = vunpack.c.l.bf16 %v816_v1 }
  0x16   : > { %907 = vmatprep.subr.bf16.mxu0 %v906_v18  ;;  %926 = vmatprep.subr.bf16.mxu1 %v906_v18 }
  0x19   : > { %909 = vmatpush3.bf16.msra.mxu0 %v906_v18  ;;  %934 = vmatpush3.bf16.msra.mxu1 %v906_v18 }
  0x1a   : > { %911 = vmatprep.subr.bf16.mxu0 %v910_v21  ;;  %927 = vmatprep.subr.bf16.mxu1 %v910_v21 }
  0x1d   : > { %913 = vmatpush3.bf16.msra.mxu0 %v910_v21  ;;  %935 = vmatpush3.bf16.msra.mxu1 %v910_v21 }
  0x1e   : > { %915 = vmatprep.subr.bf16.mxu0 %v914_v24  ;;  %928 = vmatprep.subr.bf16.mxu1 %v914_v24 }
  0x21   : > { %917 = vmatpush3.bf16.msra.mxu0 %v914_v24  ;;  %936 = vmatpush3.bf16.msra.mxu1 %v914_v24 }
  0x22   : > { %919 = vmatprep.subr.bf16.mxu0 %v918_v27  ;;  %929 = vmatprep.subr.bf16.mxu1 %v918_v27 }
  0x25   : > { %921 = vmatpush3.bf16.msra.mxu0 %v918_v27  ;;  %937 = vmatpush3.bf16.msra.mxu1 %v918_v27 }
  0x28   : > { %879 = vmatmul.mubr.f32.vlgmr.msra.gmra.mrb[0].mxu0 %v764_v30  ;;  %885 = vmatmul.mubr.f32.vlgmr.msra.gmra.mrb[0].mxu1 %v772_v31 }
  0x29   : > { %881 = vmatprep.mubr.f32.mxu0 %v767_v32  ;;  %887 = vmatprep.mubr.f32.mxu1 %v775_v33 }
  0x2c   : > { %882 = vmatmul.mubr.f32.gmra.mrb[2].mxu0 %v768_v34  ;;  %888 = vmatmul.mubr.f32.gmra.mrb[2].mxu1 %v776_v35 }
  0xfb   : > { %v880_v41 = vpop.f32.mrb[0].mxu0  ;;  %v886_v42 = vpop.f32.mrb[0].mxu1 }
  0xfc   : > { %v334_v45 = vadd.f32 %v880_v41, %v742_v38  ;;  %v354_v46 = vadd.f32 %v886_v42, %v742_v38  ;;  %v328_v47 = vpop.f32.mrb[1].mxu0  ;;  %v348_v48 = vpop.f32.mrb[1].mxu1 }
  0xfd   : > { %v329_v49 = vadd.f32 %v742_v38, %v328_v47  ;;  %v349_v50 = vadd.f32 %v742_v38, %v348_v48 }
  0xfe   : > { %v384_v51 = vadd.f32 %v780_v39, %v334_v45  ;;  %v1090_v52 = vadd.f32 %v788_v40, %v354_v46 }
  0xff   : > { %v1092_v53 = vadd.f32 %v779_v43, %v329_v49  ;;  %v1094_v54 = vadd.f32 %v787_v44, %v349_v50  ;;  %v883_v55 = vpop.f32.mrb[2].mxu0  ;;  %v889_v56 = vpop.f32.mrb[2].mxu1 }
 0x100   : > { %v1096_v57 = vmul.f32 0.70710677, %v384_v51  ;;  %v1099_v58 = vmul.f32 0.70710677, %v1090_v52  ;;  %v338_v10 = vpop.f32.mrb[3].mxu0  ;;  %v358_v11 = vpop.f32.mrb[3].mxu1  ;;  %v344_v14 = vadd.f32 %v883_v55, %v742_v38  ;;  %v364_v16 = vadd.f32 %v889_v56, %v742_v38 }
 0x101   : > { %v1102_v59 = vmul.f32 0.70710677, %v1092_v53  ;;  %v1105_v60 = vmul.f32 0.70710677, %v1094_v54  ;;  %v339_v20 = vadd.f32 %v742_v38, %v338_v10  ;;  %v359_v21 = vadd.f32 %v742_v38, %v358_v11 }
 0x102   : > { %v408_v61 = vand.u32 2147483647, %v1096_v57  ;;  %v412_v62 = vand.u32 2147483647, %v1099_v58  ;;  %v1113_v19 = vadd.f32 %v784_v9, %v344_v14  ;;  %v1115_v22 = vadd.f32 %v792_v12, %v364_v16 }
 0x103   : > { %v407_v63 = vand.u32 2147483647, %v1102_v59  ;;  %v411_v0 = vand.u32 2147483647, %v1105_v60  ;;  %v1120_v25 = vadd.f32 %v783_v15, %v339_v20  ;;  %v1125_v28 = vadd.f32 %v791_v17, %v359_v21 }
 0x104   : > { %v416_v2 = vmul.f32 0.3275911, %v408_v61  ;;  %v420_v3 = vmul.f32 0.3275911, %v412_v62  ;;  %v536_v23 = vsub.f32 0.0, %v408_v61  ;;  %v540_v26 = vsub.f32 0.0, %v412_v62 }
 0x105   : > { %v415_v5 = vmul.f32 0.3275911, %v407_v63  ;;  %v419_v8 = vmul.f32 0.3275911, %v411_v0  ;;  %v1118_v24 = vmul.f32 0.70710677, %v1113_v19 }
 0x106   : > { %v424_v6 = vadd.f32 1.0, %v416_v2  ;;  %v428_v7 = vadd.f32 1.0, %v420_v3  ;;  %v1123_v27 = vmul.f32 0.70710677, %v1115_v22  ;;  %v535_v29 = vsub.f32 0.0, %v407_v63 }
 0x107   : > { %v423_v13 = vadd.f32 1.0, %v415_v5  ;;  %v427_v18 = vadd.f32 1.0, %v419_v8  ;;  %v410_v30 = vand.u32 2147483647, %v1118_v24  ;;  %v539_v31 = vsub.f32 0.0, %v411_v0 }
 0x108   : > { %946 = vrcp.f32 %v424_v6  ;;  %v414_v32 = vand.u32 2147483647, %v1123_v27  ;;  %v1130_v33 = vmul.f32 0.70710677, %v1120_v25  ;;  %v544_v34 = vmul.f32 %v536_v23, %v408_v61 }
 0x109   : > { %948 = vrcp.f32 %v428_v7  ;;  %v418_v35 = vmul.f32 0.3275911, %v410_v30  ;;  %v1133_v36 = vmul.f32 0.70710677, %v1125_v28  ;;  %v1135_v37 = vmul.f32 0.5, %v384_v51 }
 0x10a   : > { %950 = vrcp.f32 %v423_v13  ;;  %v548_v38 = vmul.f32 %v540_v26, %v412_v62  ;;  %v422_v39 = vmul.f32 0.3275911, %v414_v32  ;;  %v409_v40 = vand.u32 2147483647, %v1130_v33 }
 0x10b   : > { %952 = vrcp.f32 %v427_v18  ;;  %v543_v42 = vmul.f32 %v535_v29, %v407_v63  ;;  %v426_v43 = vadd.f32 1.0, %v418_v35  ;;  %v538_v44 = vsub.f32 0.0, %v410_v30 }
 0x10c   : > { %v413_v45 = vand.u32 2147483647, %v1133_v36  ;;  %v547_v48 = vmul.f32 %v539_v31, %v411_v0  ;;  %v430_v49 = vadd.f32 1.0, %v422_v39  ;;  %v417_v50 = vmul.f32 0.3275911, %v409_v40 }
 0x10d   : > { %v553_v55 = vmul.f32 1.442695, %v544_v34  ;;  %954 = vrcp.f32 %v426_v43  ;;  %v542_v51 = vsub.f32 0.0, %v414_v32  ;;  %v561_v62 = vmul.f32 1.442695, %v548_v38 }
 0x10e   : > { %956 = vrcp.f32 %v430_v49  ;;  %v1139_v1 = vadd.f32 1.0, %v417_v50  ;;  %v546_v3 = vmul.f32 %v538_v44, %v410_v30  ;;  %v537_v4 = vsub.f32 0.0, %v409_v40 }
 0x10f   : > { %v421_v5 = vmul.f32 0.3275911, %v413_v45  ;;  %v551_v0 = vmul.f32 1.442695, %v543_v42  ;;  %v559_v9 = vmul.f32 1.442695, %v547_v48 }
 0x110   : > { %958 = vrcp.f32 %v1139_v1  ;;  %v557_v20 = vmul.f32 1.442695, %v546_v3  ;;  %v541_v31 = vsub.f32 0.0, %v413_v45  ;;  %v1158_v38 = vmul.f32 0.5, %v1090_v52 }
 0x111   : > { %v1146_v12 = vadd.f32 1.0, %v421_v5  ;;  %960 = vpow2.f32 %v553_v55  ;;  %vm584_vm0 = vcmp.ge.f32.partialorder %v1096_v57, 0.0  ;;  %vm588_vm1 = vcmp.ge.f32.partialorder %v1099_v58, 0.0 }
 0x112   : > { %v947_v41 = vpop.eup %946  ;;  %962 = vpow2.f32 %v561_v62  ;;  %v549_v55 = vmul.f32 %v541_v31, %v413_v45  ;;  %vm583_vm2 = vcmp.ge.f32.partialorder %v1102_v59, 0.0  ;;  %vm587_vm3 = vcmp.ge.f32.partialorder %v1105_v60, 0.0 }
 0x113   : > { %v949_v46 = vpop.eup %948  ;;  %v440_v47 = vmul.f32 %v947_v41, %v424_v6  ;;  %964 = vrcp.f32 %v1146_v12  ;;  %vm586_vm4 = vcmp.ge.f32.partialorder %v1118_v24, 0.0  ;;  %vm590_vm5 = vcmp.ge.f32.partialorder %v1123_v27, 0.0 }
 0x114   : > { %v444_v56 = vmul.f32 %v949_v46, %v428_v7  ;;  %v951_v2 = vpop.eup %950  ;;  %v550_v7 = vmul.f32 %v542_v51, %v414_v32  ;;  %966 = vpow2.f32 %v551_v0  ;;  %vm585_vm6 = vcmp.ge.f32.partialorder %v1130_v33, 0.0 }
 0x115   : > { %v448_v61 = vsub.f32 2.0, %v440_v47  ;;  %v439_v6 = vmul.f32 %v951_v2, %v423_v13  ;;  %v953_v10 = vpop.eup %952  ;;  %v545_v13 = vmul.f32 %v537_v4, %v409_v40  ;;  %968 = vpow2.f32 %v559_v9 }
 0x116   : > { %v452_v63 = vsub.f32 2.0, %v444_v56  ;;  %v443_v16 = vmul.f32 %v953_v10, %v427_v18  ;;  %v565_v30 = vmul.f32 1.442695, %v550_v7  ;;  %970 = vpow2.f32 %v557_v20 }
 0x117   : > { %v1141_v8 = vmul.f32 %v947_v41, %v448_v61  ;;  %v447_v15 = vsub.f32 2.0, %v439_v6  ;;  %v955_v35 = vpop.eup %954  ;;  %v555_v40 = vmul.f32 1.442695, %v545_v13  ;;  %v1174_v7 = vmul.f32 1.442695, %v549_v55 }
 0x118   : > { %v1143_v11 = vmul.f32 %v949_v46, %v452_v63  ;;  %v451_v26 = vsub.f32 2.0, %v443_v16  ;;  %v957_v41 = vpop.eup %956  ;;  %v442_v47 = vmul.f32 %v955_v35, %v426_v43  ;;  %972 = vpow2.f32 %v565_v30 }
 0x119   : > { %v464_v14 = vmul.f32 1.0614054, %v1141_v8  ;;  %v1150_v23 = vmul.f32 %v951_v2, %v447_v15  ;;  %v446_v50 = vmul.f32 %v957_v41, %v430_v49  ;;  %v1166_v63 = vmul.f32 0.5, %v1092_v53 }
 0x11a   : > { %v468_v17 = vmul.f32 1.0614054, %v1143_v11  ;;  %v1155_v18 = vmul.f32 %v953_v10, %v451_v26  ;;  %v450_v61 = vsub.f32 2.0, %v442_v47  ;;  %v959_v62 = vpop.eup %958  ;;  %974 = vpow2.f32 %v555_v40 }
 0x11b   : > { %v472_v21 = vadd.f32 -1.4531521, %v464_v14  ;;  %v463_v34 = vmul.f32 1.0614054, %v1150_v23  ;;  %v454_v3 = vsub.f32 2.0, %v446_v50  ;;  %v961_v4 = vpop.eup %960  ;;  %v441_v10 = vmul.f32 %v959_v62, %v1139_v1 }
 0x11c   : > { %v476_v29 = vadd.f32 -1.4531521, %v468_v17  ;;  %v467_v46 = vmul.f32 1.0614054, %v1155_v18  ;;  %v1169_v45 = vmul.f32 %v955_v35, %v450_v61  ;;  %v963_v6 = vpop.eup %962  ;;  %976 = vpow2.f32 %v1174_v7 }
 0x11d   : > { %v480_v32 = vmul.f32 %v472_v21, %v1141_v8  ;;  %v471_v44 = vadd.f32 -1.4531521, %v463_v34  ;;  %v1171_v9 = vmul.f32 %v957_v41, %v454_v3  ;;  %v965_v14 = vpop.eup %964  ;;  %v449_v26 = vsub.f32 2.0, %v441_v10 }
 0x11e   : > { %v484_v39 = vmul.f32 %v476_v29, %v1143_v11  ;;  %v475_v52 = vadd.f32 -1.4531521, %v467_v46  ;;  %v466_v17 = vmul.f32 1.0614054, %v1169_v45  ;;  %v967_v20 = vpop.eup %966  ;;  %v445_v29 = vmul.f32 %v965_v14, %v1146_v12 }
 0x11f   : > { %v488_v42 = vadd.f32 1.4214138, %v480_v32  ;;  %v479_v51 = vmul.f32 %v471_v44, %v1150_v23  ;;  %v470_v21 = vmul.f32 1.0614054, %v1171_v9  ;;  %v969_v30 = vpop.eup %968  ;;  %v1186_v41 = vmul.f32 %v959_v62, %v449_v26 }
 0x120   : > { %v492_v48 = vadd.f32 1.4214138, %v484_v39  ;;  %v483_v49 = vmul.f32 %v475_v52, %v1155_v18  ;;  %v474_v34 = vadd.f32 -1.4531521, %v466_v17  ;;  %v1183_v35 = vpop.eup %970  ;;  %v395_v7 = vmul.f32 0.5, %v1094_v54 }
 0x121   : > { %v496_v56 = vmul.f32 %v488_v42, %v1141_v8  ;;  %v487_v5 = vadd.f32 1.4214138, %v479_v51  ;;  %v478_v40 = vadd.f32 -1.4531521, %v470_v21  ;;  %v453_v42 = vsub.f32 2.0, %v445_v29 }
 0x122   : > { %v500_v2 = vmul.f32 %v492_v48, %v1143_v11  ;;  %v491_v16 = vadd.f32 1.4214138, %v483_v49  ;;  %v482_v47 = vmul.f32 %v474_v34, %v1169_v45  ;;  %v973_v48 = vpop.eup %972  ;;  %v398_v27 = vmul.f32 0.5, %v1115_v22 }
 0x123   : > { %v504_v43 = vadd.f32 -0.28449672, %v496_v56  ;;  %v495_v15 = vmul.f32 %v487_v5, %v1150_v23  ;;  %v486_v55 = vmul.f32 %v478_v40, %v1171_v9  ;;  %v465_v56 = vmul.f32 1.0614054, %v1186_v41 }
 0x124   : > { %v508_v0 = vadd.f32 -0.28449672, %v500_v2  ;;  %v499_v32 = vmul.f32 %v491_v16, %v1155_v18  ;;  %v1195_v51 = vmul.f32 %v965_v14, %v453_v42  ;;  %v490_v62 = vadd.f32 1.4214138, %v482_v47  ;;  %v1198_v2 = vpop.eup %974 }
 0x125   : > { %v512_v53 = vmul.f32 %v504_v43, %v1141_v8  ;;  %v503_v31 = vadd.f32 -0.28449672, %v495_v15  ;;  %v494_v43 = vadd.f32 1.4214138, %v486_v55  ;;  %v473_v5 = vadd.f32 -1.4531521, %v465_v56 }
 0x126   : > { %v516_v13 = vmul.f32 %v508_v0, %v1143_v11  ;;  %v507_v46 = vadd.f32 -0.28449672, %v499_v32  ;;  %v498_v14 = vmul.f32 %v490_v62, %v1169_v45  ;;  %vm589_vm7 = vcmp.ge.f32.partialorder %v1133_v36, 0.0 }
 0x127   : > { %v520_v1 = vadd.f32 0.2548296, %v512_v53  ;;  %v511_v12 = vmul.f32 %v503_v31, %v1150_v23  ;;  %v502_v53 = vmul.f32 %v494_v43, %v1171_v9  ;;  %v481_v15 = vmul.f32 %v473_v5, %v1186_v41 }
 0x128   : > { %v524_v39 = vadd.f32 0.2548296, %v516_v13  ;;  %v506_v21 = vadd.f32 -0.28449672, %v498_v14  ;;  %v397_v33 = vmul.f32 0.5, %v1125_v28 }
 0x129   : > { %v528_v44 = vmul.f32 %v520_v1, %v1141_v8  ;;  %v519_v61 = vadd.f32 0.2548296, %v511_v12  ;;  %v515_v8 = vmul.f32 %v507_v46, %v1155_v18  ;;  %v510_v29 = vadd.f32 -0.28449672, %v502_v53 }
 0x12a   : > { %v532_v50 = vmul.f32 %v524_v39, %v1143_v11  ;;  %v469_v11 = vmul.f32 1.0614054, %v1195_v51  ;;  %v489_v1 = vadd.f32 1.4214138, %v481_v15  ;;  %v514_v39 = vmul.f32 %v506_v21, %v1169_v45 }
 0x12b   : > { %v568_v52 = vmul.f32 %v961_v4, %v528_v44  ;;  %v527_v0 = vmul.f32 %v519_v61, %v1150_v23  ;;  %v523_v10 = vadd.f32 0.2548296, %v515_v8  ;;  %v394_v21 = vmul.f32 0.5, %v1113_v19 }
 0x12c   : > { %v572_v3 = vmul.f32 %v963_v6, %v532_v50  ;;  %v477_v6 = vadd.f32 -1.4531521, %v469_v11  ;;  %v522_v47 = vadd.f32 0.2548296, %v514_v39 }
 0x12d   : > { %v576_v49 = vsub.f32 1.0, %v568_v52  ;;  %v567_v17 = vmul.f32 %v967_v20, %v527_v0  ;;  %v531_v13 = vmul.f32 %v523_v10, %v1155_v18  ;;  %v518_v20 = vmul.f32 %v510_v29, %v1171_v9 }
 0x12e   : > { %v580_v4 = vsub.f32 1.0, %v572_v3  ;;  %v485_v23 = vmul.f32 %v477_v6, %v1195_v51  ;;  %v497_v18 = vmul.f32 %v489_v1, %v1186_v41  ;;  %v530_v52 = vmul.f32 %v522_v47, %v1169_v45  ;;  %v977_v6 = vpop.eup %976 }
 0x12f   : > { %v592_v16 = vsub.f32 0.0, %v576_v49  ;;  %v575_v32 = vsub.f32 1.0, %v567_v17  ;;  %v571_v34 = vmul.f32 %v969_v30, %v531_v13  ;;  %v526_v50 = vadd.f32 0.2548296, %v518_v20 }
 0x130   : > { %v596_v26 = vsub.f32 0.0, %v580_v4  ;;  %v505_v55 = vadd.f32 -0.28449672, %v497_v18  ;;  %v493_v57 = vadd.f32 1.4214138, %v485_v23  ;;  %v570_v59 = vmul.f32 %v1183_v35, %v530_v52 }
 0x131   : > { %v600_v31 = vsel %vm584_vm0, %v576_v49, %v592_v16  ;;  %v591_v12 = vsub.f32 0.0, %v575_v32  ;;  %v579_v46 = vsub.f32 1.0, %v571_v34  ;;  %v534_v8 = vmul.f32 %v526_v50, %v1171_v9 }
 0x132   : > { %v608_v40 = vadd.f32 1.0, %v600_v31  ;;  %v604_v42 = vsel %vm588_vm1, %v580_v4, %v596_v26  ;;  %v513_v62 = vmul.f32 %v505_v55, %v1186_v41  ;;  %v501_v3 = vmul.f32 %v493_v57, %v1195_v51 }
 0x133   : > { %v612_v44 = vadd.f32 1.0, %v604_v42  ;;  %v599_v58 = vsel %vm583_vm2, %v575_v32, %v591_v12  ;;  %v595_v56 = vsub.f32 0.0, %v579_v46  ;;  %v574_v45 = vmul.f32 %v973_v48, %v534_v8 }
 0x134   : > { %v616_v30 = vmul.f32 %v608_v40, %v1135_v37  ;;  %v607_v61 = vadd.f32 1.0, %v599_v58  ;;  %v521_v49 = vadd.f32 0.2548296, %v513_v62  ;;  %v578_v9 = vsub.f32 1.0, %v570_v59 }
 0x135   : > { %v620_v43 = vmul.f32 %v612_v44, %v1158_v38  ;;  %v603_v37 = vsel %vm587_vm3, %v579_v46, %v595_v56  ;;  %v509_v38 = vadd.f32 -0.28449672, %v501_v3  ;;  %v582_v60 = vsub.f32 1.0, %v574_v45 }
 0x136   : > { %v615_v5 = vmul.f32 %v607_v61, %v1166_v63  ;;  %v611_v11 = vadd.f32 1.0, %v603_v37  ;;  %v529_v10 = vmul.f32 %v521_v49, %v1186_v41  ;;  %v594_v35 = vsub.f32 0.0, %v578_v9 }
 0x137   : > { %v517_v63 = vmul.f32 %v509_v38, %v1195_v51  ;;  %v598_v53 = vsub.f32 0.0, %v582_v60  ;;  %v393_v1 = vmul.f32 0.5, %v1120_v25 }
 0x138   : > { %v796_v54 = vpack.c.bf16 %v616_v30, %v615_v5  ;;  %v619_v0 = vmul.f32 %v611_v11, %v395_v7  ;;  %v569_v14 = vmul.f32 %v1198_v2, %v529_v10  ;;  %v602_v4 = vsel %vm586_vm4, %v578_v9, %v594_v35 }
 0x139   : > { %v525_v15 = vadd.f32 0.2548296, %v517_v63  ;;  %v610_v17 = vadd.f32 1.0, %v602_v4  ;;  %v606_v26 = vsel %vm590_vm5, %v582_v60, %v598_v53 }
 0x13a   : > { %797 = vst [vmem:[%s1234_s11] sm:$0xff] %v796_v54   ;;  %v806_v48 = vpack.c.bf16 %v620_v43, %v619_v0  ;;  %v577_v16 = vsub.f32 1.0, %v569_v14  ;;  %v614_v32 = vadd.f32 1.0, %v606_v26 }
 0x13b   : > { %v533_v13 = vmul.f32 %v525_v15, %v1195_v51  ;;  %v618_v29 = vmul.f32 %v610_v17, %v394_v21 }
 0x13c   : > { %820 = vst [vmem:[%s1234_s11 + $0x10] sm:$0xff] %v806_v48   ;;  %v593_v41 = vsub.f32 0.0, %v577_v16  ;;  %v622_v40 = vmul.f32 %v614_v32, %v398_v27 }
 0x13d   : > { %v573_v24 = vmul.f32 %v977_v6, %v533_v13 }
 0x13e   : > { %v601_v2 = vsel %vm585_vm6, %v577_v16, %v593_v41 }
 0x13f   : > { %v609_v23 = vadd.f32 1.0, %v601_v2  ;;  %v581_v31 = vsub.f32 1.0, %v573_v24 }
 0x141   : > { %v617_v34 = vmul.f32 %v609_v23, %v393_v1  ;;  %v597_v51 = vsub.f32 0.0, %v581_v31 }
 0x143   : > { %v801_v19 = vpack.c.bf16 %v618_v29, %v617_v34  ;;  %v605_v39 = vsel %vm589_vm7, %v581_v31, %v597_v51 }
 0x144   : > { %v613_v42 = vadd.f32 1.0, %v605_v39 }
 0x145   : > { %819 = vst [vmem:[%s1234_s11 + $0x8] sm:$0xff] %v801_v19  }
 0x146   : > { %v621_v20 = vmul.f32 %v613_v42, %v397_v33 }
 0x148   : > { %v811_v18 = vpack.c.bf16 %v622_v40, %v621_v20 }
 0x14a   : > { %821 = vst [vmem:[%s1234_s11 + $0x18] sm:$0xff] %v811_v18  }
 0x14b PF: > { %s14_s15 = sadd.s32 1, %s984_s15  }
 0x14c   : > { %p11_p4 = scmp.ge.s32.totalorder %s14_s15, 4  }
 0x14e   :  { %13 = sbr.rel (!%p11_p4) target bundleno = 1 (0x1), region = 69 }

// kernel: wno2d_forward.18
= control target key start
LH: loop header
LB: loop body
LE: loop exit
PB: predicated region body
PF: predicated region fallthrough
CT: control target
= control target key end

     0   :  { %s747_s15 = smov 0   ;;  %s829_s0 = inlined_call_operand.vmem [shape: bf16[128,128], index: 0, kind: input, shape index: {}]   ;;  %s830_s1 = inlined_call_operand.vmem [shape: f32[128,128], index: 1, kind: input, shape index: {}]   ;;  %s831_s2 = inlined_call_operand.vmem [shape: f32[1,128], index: 2, kind: input, shape index: {}]   ;;  %s832_s3 = inlined_call_operand.vmem [shape: bf16[128,128], index: 3, kind: input, shape index: {}]   ;;  %s833_s4 = inlined_call_operand.vmem [shape: bf16[128,128], index: 4, kind: output, shape index: {}]  }
   0x1 LB: > { %s499_s16 = sadd.s32 4294967295, %s720_s15   ;;  %p503_p0 = scmp.ge.s32.totalorder %s720_s15, 1  ;;  %s720_s15 = sphi %s747_s15, %s14_s15  }
   0x2   : > { %p174_p1 = scmp.lt.s32.totalorder %s720_s15, 3 }
   0x4   : > { %p175_p2 = pnand %p503_p0, %p174_p1 }
   0x5   : > { %v239_v0 = vld [vmem:[%s830_s1] sm:$0xff] (!%p175_p2)  ;;  %v240_v1 = vld [vmem:[%s830_s1 + $0x8] sm:$0xff] (!%p175_p2)  ;;  %v241_v2 = vld [vmem:[%s830_s1 + $0x10] sm:$0xff] (!%p175_p2)  ;;  %s504_s23 = sshll.u32 (!%p175_p2), %s499_s16, 3 }
   0x6   : > { %178 = sbr.rel (%p175_p2) target bundleno = 264 (0x108), region = 36  ;;  %v658_v3 = vpack.c.bf16 (!%p175_p2), %v240_v1, %v239_v0  ;;  %v242_v4 = vld [vmem:[%s830_s1 + $0x18] sm:$0xff] (!%p175_p2)  ;;  %p206_p3 = scmp.lt.s32.totalorder (!%p175_p2), %s504_s23, 15  ;;  %v243_v6 = vld [vmem:[%s830_s1 + $0x20] sm:$0xff] (!%p175_p2)  ;;  %v244_v7 = vld [vmem:[%s830_s1 + $0x28] sm:$0xff] (!%p175_p2) }
   0x7   : > { %v662_v5 = vpack.c.bf16 (!%p175_p2), %v242_v4, %v241_v2  ;;  %v666_v8 = vpack.c.bf16 (!%p175_p2), %v244_v7, %v243_v6  ;;  %v245_v9 = vld [vmem:[%s830_s1 + $0x30] sm:$0xff] (!%p175_p2)  ;;  %v246_v10 = vld [vmem:[%s830_s1 + $0x38] sm:$0xff] (!%p175_p2)  ;;  %v247_v16 = vld [vmem:[%s830_s1 + $0x40] sm:$0xff] (!%p175_p2) }
   0x8   : > { %659 = vmatprep.subr.bf16.mxu0 (!%p175_p2), %v658_v3  ;;  %690 = vmatprep.subr.bf16.mxu1 (!%p175_p2), %v658_v3  ;;  %v670_v15 = vpack.c.bf16 (!%p175_p2), %v246_v10, %v245_v9  ;;  %v248_v17 = vld [vmem:[%s830_s1 + $0x48] sm:$0xff] (!%p175_p2)  ;;  %v249_v19 = vld [vmem:[%s830_s1 + $0x50] sm:$0xff] (!%p175_p2)  ;;  %v250_v20 = vld [vmem:[%s830_s1 + $0x58] sm:$0xff] (!%p175_p2) }
   0x9   : > { %661 = vmatpush3.bf16.msra.mxu0 (!%p175_p2), %v658_v3  ;;  %698 = vmatpush3.bf16.msra.mxu1 (!%p175_p2), %v658_v3  ;;  %v674_v18 = vpack.c.bf16 (!%p175_p2), %v248_v17, %v247_v16  ;;  %v678_v21 = vpack.c.bf16 (!%p175_p2), %v250_v20, %v249_v19  ;;  %v251_v22 = vld [vmem:[%s830_s1 + $0x60] sm:$0xff] (!%p175_p2)  ;;  %v252_v23 = vld [vmem:[%s830_s1 + $0x68] sm:$0xff] (!%p175_p2)  ;;  %v253_v25 = vld [vmem:[%s830_s1 + $0x70] sm:$0xff] (!%p175_p2) }
   0xa   : > { %663 = vmatprep.subr.bf16.mxu0 (!%p175_p2), %v662_v5  ;;  %691 = vmatprep.subr.bf16.mxu1 (!%p175_p2), %v662_v5  ;;  %v682_v24 = vpack.c.bf16 (!%p175_p2), %v252_v23, %v251_v22  ;;  %v254_v26 = vld [vmem:[%s830_s1 + $0x78] sm:$0xff] (!%p175_p2)  ;;  %v510_v38 = vld [vmem:[%s831_s2] ss:$0 sm:$0xff] (!%p175_p2) }
   0xb   : > { %v686_v27 = vpack.c.bf16 (!%p175_p2), %v254_v26, %v253_v25 }
   0xd   : > { %s835_s23 = smov (!%p206_p3, %s504_s23), 15  ;;  %665 = vmatpush3.bf16.msra.mxu0 %v662_v5  ;;  %699 = vmatpush3.bf16.msra.mxu1 %v662_v5 }
   0xe   : > { %s773_s30 = sshll.u32 %s835_s23, 2  ;;  %667 = vmatprep.subr.bf16.mxu0 %v666_v8  ;;  %692 = vmatprep.subr.bf16.mxu1 %v666_v8 }
   0xf   : > { %s785_s11 = scalar_lea.vmem %s829_s0, %s773_s30  ;;  %s215_s6 = scalar_lea.vmem %s832_s3, %s773_s30 }
  0x10   : > { %v530_v11 = vld [vmem:[%s785_s11] sm:$0xff]   ;;  %v582_v12 = vld [vmem:[%s785_s11 + $0x10] sm:$0xff]   ;;  %v581_v28 = vld [vmem:[%s785_s11 + $0x8] sm:$0xff]  }
  0x11   : > { %v531_v13 = vunpack.c.l.bf16 %v530_v11  ;;  %v539_v14 = vunpack.c.l.bf16 %v582_v12  ;;  %669 = vmatpush3.bf16.msra.mxu0 %v666_v8  ;;  %700 = vmatpush3.bf16.msra.mxu1 %v666_v8  ;;  %v583_v29 = vld [vmem:[%s785_s11 + $0x18] sm:$0xff]   ;;  %v532_v30 = vunpack.c.h.bf16 %v530_v11  ;;  %v540_v31 = vunpack.c.h.bf16 %v582_v12  ;;  %v546_v36 = vld [vmem:[%s215_s6] sm:$0xff]   ;;  %v585_v37 = vld [vmem:[%s215_s6 + $0x10] sm:$0xff]   ;;  %s221_s11 = scalar_lea.vmem %s833_s4, %s773_s30 }
  0x12   : > { %671 = vmatprep.subr.bf16.mxu0 %v670_v15  ;;  %693 = vmatprep.subr.bf16.mxu1 %v670_v15  ;;  %v535_v32 = vunpack.c.l.bf16 %v581_v28  ;;  %v543_v33 = vunpack.c.l.bf16 %v583_v29  ;;  %v536_v34 = vunpack.c.h.bf16 %v581_v28  ;;  %v544_v35 = vunpack.c.h.bf16 %v583_v29  ;;  %v584_v45 = vld [vmem:[%s215_s6 + $0x8] sm:$0xff]   ;;  %v586_v46 = vld [vmem:[%s215_s6 + $0x18] sm:$0xff]  }
  0x13   : > { %646 = vmatprep.mubr.f32.mxu0 %v531_v13  ;;  %652 = vmatprep.mubr.f32.mxu1 %v539_v14  ;;  %v548_v39 = vunpack.c.h.bf16 %v546_v36  ;;  %v556_v40 = vunpack.c.h.bf16 %v585_v37  ;;  %v547_v43 = vunpack.c.l.bf16 %v546_v36  ;;  %v555_v44 = vunpack.c.l.bf16 %v585_v37 }
  0x14   : > { %v552_v55 = vunpack.c.h.bf16 %v584_v45  ;;  %v560_v56 = vunpack.c.h.bf16 %v586_v46  ;;  %v551_v61 = vunpack.c.l.bf16 %v584_v45  ;;  %v559_v62 = vunpack.c.l.bf16 %v586_v46 }
  0x15   : > { %673 = vmatpush3.bf16.msra.mxu0 %v670_v15  ;;  %701 = vmatpush3.bf16.msra.mxu1 %v670_v15 }
  0x16   : > { %675 = vmatprep.subr.bf16.mxu0 %v674_v18  ;;  %694 = vmatprep.subr.bf16.mxu1 %v674_v18 }
  0x19   : > { %677 = vmatpush3.bf16.msra.mxu0 %v674_v18  ;;  %702 = vmatpush3.bf16.msra.mxu1 %v674_v18 }
  0x1a   : > { %679 = vmatprep.subr.bf16.mxu0 %v678_v21  ;;  %695 = vmatprep.subr.bf16.mxu1 %v678_v21 }
  0x1d   : > { %681 = vmatpush3.bf16.msra.mxu0 %v678_v21  ;;  %703 = vmatpush3.bf16.msra.mxu1 %v678_v21 }
  0x1e   : > { %683 = vmatprep.subr.bf16.mxu0 %v682_v24  ;;  %696 = vmatprep.subr.bf16.mxu1 %v682_v24 }
  0x21   : > { %685 = vmatpush3.bf16.msra.mxu0 %v682_v24  ;;  %704 = vmatpush3.bf16.msra.mxu1 %v682_v24 }
  0x22   : > { %687 = vmatprep.subr.bf16.mxu0 %v686_v27  ;;  %697 = vmatprep.subr.bf16.mxu1 %v686_v27 }
  0x25   : > { %689 = vmatpush3.bf16.msra.mxu0 %v686_v27  ;;  %705 = vmatpush3.bf16.msra.mxu1 %v686_v27 }
  0x28   : > { %647 = vmatmul.mubr.f32.vlgmr.msra.gmra.mrb[0].mxu0 %v532_v30  ;;  %653 = vmatmul.mubr.f32.vlgmr.msra.gmra.mrb[0].mxu1 %v540_v31 }
  0x29   : > { %649 = vmatprep.mubr.f32.mxu0 %v535_v32  ;;  %655 = vmatprep.mubr.f32.mxu1 %v543_v33 }
  0x2c   : > { %650 = vmatmul.mubr.f32.gmra.mrb[2].mxu0 %v536_v34  ;;  %656 = vmatmul.mubr.f32.gmra.mrb[2].mxu1 %v544_v35 }
  0xfb   : > { %v648_v41 = vpop.f32.mrb[0].mxu0  ;;  %v654_v42 = vpop.f32.mrb[0].mxu1 }
  0xfc   : > { %v334_v47 = vadd.f32 %v648_v41, %v510_v38  ;;  %v354_v48 = vadd.f32 %v654_v42, %v510_v38  ;;  %v328_v49 = vpop.f32.mrb[1].mxu0  ;;  %v348_v50 = vpop.f32.mrb[1].mxu1 }
  0xfd   : > { %v329_v51 = vadd.f32 %v510_v38, %v328_v49  ;;  %v349_v52 = vadd.f32 %v510_v38, %v348_v50 }
  0xfe   : > { %v384_v53 = vadd.f32 %v548_v39, %v334_v47  ;;  %v388_v54 = vadd.f32 %v556_v40, %v354_v48 }
  0xff   : > { %v383_v57 = vadd.f32 %v547_v43, %v329_v51  ;;  %v387_v58 = vadd.f32 %v555_v44, %v349_v52  ;;  %v651_v59 = vpop.f32.mrb[2].mxu0  ;;  %v657_v60 = vpop.f32.mrb[2].mxu1 }
 0x100   : > { %v344_v63 = vadd.f32 %v651_v59, %v510_v38  ;;  %v364_v0 = vadd.f32 %v657_v60, %v510_v38  ;;  %v338_v1 = vpop.f32.mrb[3].mxu0  ;;  %v358_v2 = vpop.f32.mrb[3].mxu1 }
 0x101   : > { %v564_v3 = vpack.c.bf16 %v384_v53, %v383_v57  ;;  %v574_v4 = vpack.c.bf16 %v388_v54, %v387_v58  ;;  %v339_v5 = vadd.f32 %v510_v38, %v338_v1  ;;  %v359_v6 = vadd.f32 %v510_v38, %v358_v2 }
 0x102   : > { %v386_v7 = vadd.f32 %v552_v55, %v344_v63  ;;  %v390_v8 = vadd.f32 %v560_v56, %v364_v0 }
 0x103   : > { %565 = vst [vmem:[%s221_s11] sm:$0xff] %v564_v3   ;;  %588 = vst [vmem:[%s221_s11 + $0x10] sm:$0xff] %v574_v4   ;;  %v385_v9 = vadd.f32 %v551_v61, %v339_v5  ;;  %v389_v10 = vadd.f32 %v559_v62, %v359_v6 }
 0x105   : > { %v569_v11 = vpack.c.bf16 %v386_v7, %v385_v9  ;;  %v579_v12 = vpack.c.bf16 %v390_v8, %v389_v10 }
 0x107   : > { %587 = vst [vmem:[%s221_s11 + $0x8] sm:$0xff] %v569_v11   ;;  %589 = vst [vmem:[%s221_s11 + $0x18] sm:$0xff] %v579_v12  }
 0x108 PF: > { %s14_s15 = sadd.s32 1, %s720_s15  }
 0x109   : > { %p11_p4 = scmp.ge.s32.totalorder %s14_s15, 4  }
 0x10b   :  { %13 = sbr.rel (!%p11_p4) target bundleno = 1 (0x1), region = 69 }

// kernel: tile.63
= control target key start
LH: loop header
LB: loop body
LE: loop exit
PB: predicated region body
PF: predicated region fallthrough
CT: control target
= control target key end

     0   :  { %s22_s0 = inlined_call_operand.vmem [shape: f32[128], index: 0, kind: input, shape index: {}]   ;;  %s23_s1 = inlined_call_operand.vmem [shape: f32[4,128], index: 1, kind: output, shape index: {}]  }
   0x1   :  { %v4_v0 = vld [vmem:[%s22_s0] ss:$0 sm:$0xff] }
   0x2   :  { %5 = vst [vmem:[%s23_s1] sm:$0xf] %v4_v0 }

// kernel: wno2d_forward.19
= control target key start
LH: loop header
LB: loop body
LE: loop exit
PB: predicated region body
PF: predicated region fallthrough
CT: control target
= control target key end

     0   :  { %s2277_s18 = smov 0   ;;  %s3699_s0 = inlined_call_operand.vmem [shape: bf16[128,128], index: 0, kind: input, shape index: {}]   ;;  %s3700_s1 = inlined_call_operand.vmem [shape: f32[128,512], index: 1, kind: input, shape index: {}]   ;;  %s3701_s2 = inlined_call_operand.vmem [shape: f32[1,512], index: 2, kind: input, shape index: {}]   ;;  %s3702_s3 = inlined_call_operand.vmem [shape: f32[512,4], index: 3, kind: input, shape index: {}]   ;;  %s3703_s4 = inlined_call_operand.vmem [shape: f32[1,4], index: 4, kind: input, shape index: {}]   ;;  %s3704_s5 = inlined_call_operand.vmem [shape: f32[128,4], index: 5, kind: output, shape index: {}]  }
   0x1 LB: > { %s1830_s19 = sadd.s32 4294967295, %s2244_s18   ;;  %p1834_p0 = scmp.ge.s32.totalorder %s2244_s18, 1  ;;  %s2244_s18 = sphi %s2277_s18, %s15_s18  }
   0x2   : > { %p188_p1 = scmp.lt.s32.totalorder %s2244_s18, 3 }
   0x4   : > { %p189_p2 = pnand %p1834_p0, %p188_p1 }
   0x6   : > { %192 = sbr.rel (%p189_p2) target bundleno = 739 (0x2e3), region = 40 }
   0xd   : > { %v245_v0 = vld [vmem:[%s3700_s1 + $0x8] sm:$0xff]  ;;  %v247_v2 = vld [vmem:[%s3700_s1 + $0x18] sm:$0xff]  ;;  %v244_v5 = vld [vmem:[%s3700_s1] sm:$0xff]  ;;  %v2246_v7 = vmov 0.0   ;;  %s2397_s23 = sshll.u32 %s1830_s19, 3 }
   0xe   : > { %v249_v1 = vld [vmem:[%s3700_s1 + $0x28] sm:$0xff]  ;;  %v251_v4 = vld [vmem:[%s3700_s1 + $0x38] sm:$0xff]  ;;  %v248_v6 = vld [vmem:[%s3700_s1 + $0x20] sm:$0xff]  ;;  %394 = vmatprep.mubr.f32.mxu0 %v2246_v7  ;;  %507 = vmatprep.mubr.f32.mxu1 %v2246_v7  ;;  %p217_p3 = scmp.lt.s32.totalorder %s2397_s23, 15 }
   0xf   : > { %v1973_v3 = vpack.c.bf16 %v249_v1, %v245_v0  ;;  %v2005_v8 = vpack.c.bf16 %v251_v4, %v247_v2  ;;  %v1975_v9 = vpack.c.bf16 %v248_v6, %v244_v5  ;;  %v246_v10 = vld [vmem:[%s3700_s1 + $0x10] sm:$0xff]  ;;  %v253_v12 = vld [vmem:[%s3700_s1 + $0x48] sm:$0xff]  ;;  %v255_v15 = vld [vmem:[%s3700_s1 + $0x58] sm:$0xff] }
  0x10   : > { %v250_v11 = vld [vmem:[%s3700_s1 + $0x30] sm:$0xff]  ;;  %v257_v14 = vld [vmem:[%s3700_s1 + $0x68] sm:$0xff]  ;;  %v259_v16 = vld [vmem:[%s3700_s1 + $0x78] sm:$0xff]  ;;  %s3943_s23 = smov (!%p217_p3, %s2397_s23), 15 }
  0x11   : > { %1974 = vmatprep.subr.bf16.mxu0 %v1973_v3  ;;  %v2007_v13 = vpack.c.bf16 %v250_v11, %v246_v10  ;;  %2006 = vmatprep.subr.bf16.mxu1 %v2005_v8  ;;  %v1977_v17 = vpack.c.bf16 %v257_v14, %v253_v12  ;;  %v2009_v18 = vpack.c.bf16 %v259_v16, %v255_v15  ;;  %v252_v19 = vld [vmem:[%s3700_s1 + $0x40] sm:$0xff]  ;;  %v254_v21 = vld [vmem:[%s3700_s1 + $0x50] sm:$0xff]  ;;  %v261_v24 = vld [vmem:[%s3700_s1 + $0x88] sm:$0xff]  ;;  %s1836_s21 = sshll.u32 %s3943_s23, 2  ;;  %s1838_s6 = sshll.u32 %s3943_s23, 3 }
  0x12   : > { %1976 = vmatpush1.bf16.msra.mxu0 %v1975_v9  ;;  %v256_v20 = vld [vmem:[%s3700_s1 + $0x60] sm:$0xff]  ;;  %v258_v23 = vld [vmem:[%s3700_s1 + $0x70] sm:$0xff]  ;;  %v265_v25 = vld [vmem:[%s3700_s1 + $0xa8] sm:$0xff]  ;;  %s2487_s7 = scalar_lea.vmem %s3699_s0, %s1836_s21  ;;  %s3671_s9 = scalar_lea.vmem %s3704_s5, %s1838_s6 }
  0x13   : > { %2008 = vmatpush1.bf16.msra.mxu1 %v2007_v13  ;;  %v1979_v22 = vpack.c.bf16 %v256_v20, %v252_v19  ;;  %1978 = vmatprep.subr.bf16.mxu0 %v1977_v17  ;;  %v2011_v26 = vpack.c.bf16 %v258_v23, %v254_v21  ;;  %v1981_v27 = vpack.c.bf16 %v265_v25, %v261_v24  ;;  %v263_v28 = vld [vmem:[%s3700_s1 + $0x98] sm:$0xff]  ;;  %v260_v30 = vld [vmem:[%s3700_s1 + $0x80] sm:$0xff]  ;;  %v262_v33 = vld [vmem:[%s3700_s1 + $0x90] sm:$0xff] }
  0x14   : > { %2010 = vmatprep.subr.bf16.mxu1 %v2009_v18  ;;  %v267_v29 = vld [vmem:[%s3700_s1 + $0xb8] sm:$0xff]  ;;  %v264_v32 = vld [vmem:[%s3700_s1 + $0xa0] sm:$0xff]  ;;  %v266_v34 = vld [vmem:[%s3700_s1 + $0xb0] sm:$0xff] }
  0x15   : > { %v2013_v31 = vpack.c.bf16 %v267_v29, %v263_v28  ;;  %v1983_v35 = vpack.c.bf16 %v264_v32, %v260_v30  ;;  %v269_v36 = vld [vmem:[%s3700_s1 + $0xc8] sm:$0xff]  ;;  %v271_v38 = vld [vmem:[%s3700_s1 + $0xd8] sm:$0xff]  ;;  %v2015_v39 = vpack.c.bf16 %v266_v34, %v262_v33  ;;  %v268_v42 = vld [vmem:[%s3700_s1 + $0xc0] sm:$0xff] }
  0x16   : > { %1980 = vmatpush1.bf16.msra.mxu0 %v1979_v22  ;;  %v273_v37 = vld [vmem:[%s3700_s1 + $0xe8] sm:$0xff]  ;;  %v275_v41 = vld [vmem:[%s3700_s1 + $0xf8] sm:$0xff]  ;;  %v272_v43 = vld [vmem:[%s3700_s1 + $0xe0] sm:$0xff] }
  0x17   : > { %2012 = vmatpush1.bf16.msra.mxu1 %v2011_v26  ;;  %1982 = vmatprep.subr.bf16.mxu0 %v1981_v27  ;;  %v1985_v40 = vpack.c.bf16 %v273_v37, %v269_v36  ;;  %v2017_v44 = vpack.c.bf16 %v275_v41, %v271_v38  ;;  %v270_v45 = vld [vmem:[%s3700_s1 + $0xd0] sm:$0xff]  ;;  %v277_v47 = vld [vmem:[%s3700_s1 + $0x108] sm:$0xff]  ;;  %v279_v49 = vld [vmem:[%s3700_s1 + $0x118] sm:$0xff]  ;;  %v1987_v51 = vpack.c.bf16 %v272_v43, %v268_v42 }
  0x18   : > { %2014 = vmatprep.subr.bf16.mxu1 %v2013_v31  ;;  %v274_v46 = vld [vmem:[%s3700_s1 + $0xf0] sm:$0xff]  ;;  %v281_v48 = vld [vmem:[%s3700_s1 + $0x128] sm:$0xff]  ;;  %v283_v50 = vld [vmem:[%s3700_s1 + $0x138] sm:$0xff] }
  0x19   : > { %v2019_v52 = vpack.c.bf16 %v274_v46, %v270_v45  ;;  %v1989_v53 = vpack.c.bf16 %v281_v48, %v277_v47  ;;  %v276_v54 = vld [vmem:[%s3700_s1 + $0x100] sm:$0xff]  ;;  %v278_v56 = vld [vmem:[%s3700_s1 + $0x110] sm:$0xff]  ;;  %v2021_v57 = vpack.c.bf16 %v283_v50, %v279_v49  ;;  %v285_v59 = vld [vmem:[%s3700_s1 + $0x148] sm:$0xff] }
  0x1a   : > { %1984 = vmatpush1.bf16.msra.mxu0 %v1983_v35  ;;  %v280_v55 = vld [vmem:[%s3700_s1 + $0x120] sm:$0xff]  ;;  %v282_v58 = vld [vmem:[%s3700_s1 + $0x130] sm:$0xff]  ;;  %v289_v60 = vld [vmem:[%s3700_s1 + $0x168] sm:$0xff] }
  0x1b   : > { %2016 = vmatpush1.bf16.msra.mxu1 %v2015_v39  ;;  %1986 = vmatprep.subr.bf16.mxu0 %v1985_v40  ;;  %v287_v61 = vld [vmem:[%s3700_s1 + $0x158] sm:$0xff]  ;;  %v1991_v63 = vpack.c.bf16 %v280_v55, %v276_v54  ;;  %v2023_v0 = vpack.c.bf16 %v282_v58, %v278_v56  ;;  %v1993_v1 = vpack.c.bf16 %v289_v60, %v285_v59  ;;  %v284_v2 = vld [vmem:[%s3700_s1 + $0x140] sm:$0xff]  ;;  %v286_v4 = vld [vmem:[%s3700_s1 + $0x150] sm:$0xff] }
  0x1c   : > { %2018 = vmatprep.subr.bf16.mxu1 %v2017_v44  ;;  %v291_v62 = vld [vmem:[%s3700_s1 + $0x178] sm:$0xff]  ;;  %v288_v3 = vld [vmem:[%s3700_s1 + $0x160] sm:$0xff]  ;;  %v290_v6 = vld [vmem:[%s3700_s1 + $0x170] sm:$0xff] }
  0x1d   : > { %v2025_v5 = vpack.c.bf16 %v291_v62, %v287_v61  ;;  %v293_v8 = vld [vmem:[%s3700_s1 + $0x188] sm:$0xff]  ;;  %v295_v10 = vld [vmem:[%s3700_s1 + $0x198] sm:$0xff]  ;;  %v1995_v12 = vpack.c.bf16 %v288_v3, %v284_v2  ;;  %v2027_v13 = vpack.c.bf16 %v290_v6, %v286_v4  ;;  %v292_v15 = vld [vmem:[%s3700_s1 + $0x180] sm:$0xff] }
  0x1e   : > { %1988 = vmatpush1.bf16.msra.mxu0 %v1987_v51  ;;  %v297_v9 = vld [vmem:[%s3700_s1 + $0x1a8] sm:$0xff]  ;;  %v299_v11 = vld [vmem:[%s3700_s1 + $0x1b8] sm:$0xff]  ;;  %v296_v16 = vld [vmem:[%s3700_s1 + $0x1a0] sm:$0xff] }
  0x1f   : > { %2020 = vmatpush1.bf16.msra.mxu1 %v2019_v52  ;;  %1990 = vmatprep.subr.bf16.mxu0 %v1989_v53  ;;  %v1997_v14 = vpack.c.bf16 %v297_v9, %v293_v8  ;;  %v294_v17 = vld [vmem:[%s3700_s1 + $0x190] sm:$0xff]  ;;  %v2029_v18 = vpack.c.bf16 %v299_v11, %v295_v10  ;;  %v301_v20 = vld [vmem:[%s3700_s1 + $0x1c8] sm:$0xff]  ;;  %v303_v22 = vld [vmem:[%s3700_s1 + $0x1d8] sm:$0xff]  ;;  %v1999_v24 = vpack.c.bf16 %v296_v16, %v292_v15 }
  0x20   : > { %2022 = vmatprep.subr.bf16.mxu1 %v2021_v57  ;;  %v298_v19 = vld [vmem:[%s3700_s1 + $0x1b0] sm:$0xff]  ;;  %v305_v21 = vld [vmem:[%s3700_s1 + $0x1e8] sm:$0xff]  ;;  %v307_v23 = vld [vmem:[%s3700_s1 + $0x1f8] sm:$0xff]  ;;  %v310_v57 = vlaneseq }
  0x21   : > { %v2031_v25 = vpack.c.bf16 %v298_v19, %v294_v17  ;;  %v2001_v26 = vpack.c.bf16 %v305_v21, %v301_v20  ;;  %v300_v27 = vld [vmem:[%s3700_s1 + $0x1c0] sm:$0xff]  ;;  %v2033_v29 = vpack.c.bf16 %v307_v23, %v303_v22  ;;  %v302_v30 = vld [vmem:[%s3700_s1 + $0x1d0] sm:$0xff]  ;;  %v1858_v37 = vld [vmem:[%s2487_s7 + $0x8] sm:$0xff]  }
  0x22   : > { %1992 = vmatpush1.bf16.msra.mxu0 %v1991_v63  ;;  %v304_v28 = vld [vmem:[%s3700_s1 + $0x1e0] sm:$0xff]  ;;  %v306_v31 = vld [vmem:[%s3700_s1 + $0x1f0] sm:$0xff]  ;;  %v1848_v38 = vunpack.c.l.bf16 %v1858_v37  ;;  %v1849_v39 = vunpack.c.h.bf16 %v1858_v37  ;;  %v1860_v43 = vld [vmem:[%s2487_s7 + $0x18] sm:$0xff]   ;;  %v2537_v58 = vshrl.u32 %v310_v57, 7 }
  0x23   : > { %2024 = vmatpush1.bf16.msra.mxu1 %v2023_v0  ;;  %1994 = vmatprep.subr.bf16.mxu0 %v1993_v1  ;;  %v2003_v32 = vpack.c.bf16 %v304_v28, %v300_v27  ;;  %v1843_v33 = vld [vmem:[%s2487_s7] sm:$0xff]   ;;  %v2035_v34 = vpack.c.bf16 %v306_v31, %v302_v30  ;;  %v1859_v40 = vld [vmem:[%s2487_s7 + $0x10] sm:$0xff]   ;;  %v1856_v44 = vunpack.c.l.bf16 %v1860_v43  ;;  %v1857_v45 = vunpack.c.h.bf16 %v1860_v43  ;;  %v1501_v47 = vld [vmem:[%s3702_s3 + $0x88] sm:$0xff] }
  0x24   : > { %2026 = vmatprep.subr.bf16.mxu1 %v2025_v5  ;;  %v1844_v35 = vunpack.c.l.bf16 %v1843_v33  ;;  %v1845_v36 = vunpack.c.h.bf16 %v1843_v33  ;;  %v1852_v41 = vunpack.c.l.bf16 %v1859_v40  ;;  %v1853_v42 = vunpack.c.h.bf16 %v1859_v40  ;;  %v1500_v46 = vld [vmem:[%s3702_s3 + $0x80] sm:$0xff]  ;;  %v1533_v51 = vld [vmem:[%s3702_s3 + $0x188] sm:$0xff]  ;;  %v1502_v59 = vld [vmem:[%s3702_s3 + $0x90] sm:$0xff] }
  0x25   : > { %v1532_v48 = vld [vmem:[%s3702_s3 + $0x180] sm:$0xff]  ;;  %v2037_v49 = vpack.c.bf16 %v1501_v47, %v1500_v46  ;;  %v1517_v55 = vld [vmem:[%s3702_s3 + $0x108] sm:$0xff]  ;;  %v1503_v60 = vld [vmem:[%s3702_s3 + $0x98] sm:$0xff]  ;;  %v312_v9 = vsub.s32 0, %v2537_v58 }
  0x26   : > { %1996 = vmatpush1.bf16.msra.mxu0 %v1995_v12  ;;  %v1484_v50 = vld [vmem:[%s3702_s3] sm:$0xff]  ;;  %v2069_v53 = vpack.c.bf16 %v1533_v51, %v1532_v48  ;;  %v1534_v61 = vld [vmem:[%s3702_s3 + $0x190] sm:$0xff]  ;;  %v2041_v62 = vpack.c.bf16 %v1503_v60, %v1502_v59  ;;  %v1487_v0 = vld [vmem:[%s3702_s3 + $0x18] sm:$0xff] }
  0x27   : > { %2028 = vmatpush1.bf16.msra.mxu1 %v2027_v13  ;;  %1998 = vmatprep.subr.bf16.mxu0 %v1997_v14  ;;  %v1516_v54 = vld [vmem:[%s3702_s3 + $0x100] sm:$0xff]  ;;  %v1486_v63 = vld [vmem:[%s3702_s3 + $0x10] sm:$0xff]  ;;  %v1535_v1 = vld [vmem:[%s3702_s3 + $0x198] sm:$0xff]  ;;  %v320_v13 = vsub.s32 2, %v2537_v58 }
  0x28   : > { %2030 = vmatprep.subr.bf16.mxu1 %v2029_v18  ;;  %v2071_v56 = vpack.c.bf16 %v1517_v55, %v1516_v54  ;;  %v2043_v2 = vpack.c.bf16 %v1487_v0, %v1486_v63  ;;  %v2073_v3 = vpack.c.bf16 %v1535_v1, %v1534_v61  ;;  %v1518_v4 = vld [vmem:[%s3702_s3 + $0x110] sm:$0xff]  ;;  %v1519_v5 = vld [vmem:[%s3702_s3 + $0x118] sm:$0xff]  ;;  %v308_v6 = vld [vmem:[%s3701_s2] sm:$0xf] }
  0x29   : > { %v2075_v8 = vpack.c.bf16 %v1519_v5, %v1518_v4  ;;  %v1504_v10 = vld [vmem:[%s3702_s3 + $0xa0] sm:$0xff]  ;;  %v1505_v11 = vld [vmem:[%s3702_s3 + $0xa8] sm:$0xff]  ;;  %v2592_v23 = vrot.slane %v308_v6, %v312_v9  ;;  %v1538_v27 = vld [vmem:[%s3702_s3 + $0x1b0] sm:$0xff]  ;;  %v2604_v28 = vrot.slane %v308_v6, %v320_v13 }
  0x2a   : > { %2000 = vmatpush1.bf16.msra.mxu0 %v1999_v24  ;;  %v1536_v12 = vld [vmem:[%s3702_s3 + $0x1a0] sm:$0xff]  ;;  %v2045_v14 = vpack.c.bf16 %v1505_v11, %v1504_v10  ;;  %v1489_v16 = vld [vmem:[%s3702_s3 + $0x28] sm:$0xff]  ;;  %v316_v24 = vsub.s32 1, %v2537_v58  ;;  %v1490_v31 = vld [vmem:[%s3702_s3 + $0x30] sm:$0xff] }
  0x2b   : > { %2032 = vmatpush1.bf16.msra.mxu1 %v2031_v25  ;;  %2002 = vmatprep.subr.bf16.mxu0 %v2001_v26  ;;  %v1488_v15 = vld [vmem:[%s3702_s3 + $0x20] sm:$0xff]  ;;  %v1537_v17 = vld [vmem:[%s3702_s3 + $0x1a8] sm:$0xff]  ;;  %v1506_v25 = vld [vmem:[%s3702_s3 + $0xb0] sm:$0xff] }
  0x2c   : > { %2034 = vmatprep.subr.bf16.mxu1 %v2033_v29  ;;  %v2047_v18 = vpack.c.bf16 %v1489_v16, %v1488_v15  ;;  %v2077_v19 = vpack.c.bf16 %v1537_v17, %v1536_v12  ;;  %v1520_v20 = vld [vmem:[%s3702_s3 + $0x120] sm:$0xff]  ;;  %v1521_v21 = vld [vmem:[%s3702_s3 + $0x128] sm:$0xff]  ;;  %v1507_v26 = vld [vmem:[%s3702_s3 + $0xb8] sm:$0xff]  ;;  %v324_v29 = vsub.s32 3, %v2537_v58 }
  0x2d   : > { %v2079_v22 = vpack.c.bf16 %v1521_v21, %v1520_v20  ;;  %v2049_v30 = vpack.c.bf16 %v1507_v26, %v1506_v25  ;;  %v1539_v33 = vld [vmem:[%s3702_s3 + $0x1b8] sm:$0xff] }
  0x2e   : > { %2004 = vmatpush1.bf16.msra.mxu0 %v2003_v32  ;;  %v1491_v32 = vld [vmem:[%s3702_s3 + $0x38] sm:$0xff]  ;;  %v2634_v47 = vrot.slane %v308_v6, %v324_v29 }
  0x2f   : > { %2036 = vmatpush1.bf16.msra.mxu1 %v2035_v34  ;;  %2038 = vmatprep.subr.bf16.mxu0 %v2037_v49  ;;  %v2051_v34 = vpack.c.bf16 %v1491_v32, %v1490_v31  ;;  %v1523_v37 = vld [vmem:[%s3702_s3 + $0x138] sm:$0xff] }
  0x30   : > { %2070 = vmatprep.subr.bf16.mxu1 %v2069_v53 }
  0x31   : > { %395 = vmatmul.mubr.f32.vlgmr.msra.gmra.mrb[0].mxu0 %v1844_v35 }
  0x32   : > { %508 = vmatmul.mubr.f32.vlgmr.msra.gmra.mrb[0].mxu1 %v1844_v35  ;;  %400 = vmatprep.mubr.f32.mxu0 %v2246_v7  ;;  %v2081_v35 = vpack.c.bf16 %v1539_v33, %v1538_v27 }
  0x33   : > { %513 = vmatprep.mubr.f32.mxu1 %v2246_v7  ;;  %2072 = vmatpush3.bf16.msra.mxu1 %v2071_v56 }
  0x34   : > { %2074 = vmatprep.subr.bf16.mxu1 %v2073_v3 }
  0x35   : > { %401 = vmatmul.mubr.f32.gmra.mrb[2].mxu0 %v1845_v36 }
  0x36   : > { %514 = vmatmul.mubr.f32.gmra.mrb[2].mxu1 %v1845_v36  ;;  %406 = vmatprep.mubr.f32.mxu0 %v2246_v7  ;;  %v1522_v36 = vld [vmem:[%s3702_s3 + $0x130] sm:$0xff] }
  0x37   : > { %519 = vmatprep.mubr.f32.mxu1 %v2246_v7  ;;  %2076 = vmatpush3.bf16.msra.mxu1 %v2075_v8 }
  0x38   : > { %2078 = vmatprep.subr.bf16.mxu1 %v2077_v19 }
  0x39   : > { %407 = vmatmul.mubr.f32.gmra.mrb[4].mxu0 %v1848_v38 }
  0x3a   : > { %520 = vmatmul.mubr.f32.gmra.mrb[4].mxu1 %v1848_v38  ;;  %412 = vmatprep.mubr.f32.mxu0 %v2246_v7 }
  0x3b   : > { %525 = vmatprep.mubr.f32.mxu1 %v2246_v7  ;;  %2080 = vmatpush3.bf16.msra.mxu1 %v2079_v22 }
  0x3c   : > { %2082 = vmatprep.subr.bf16.mxu1 %v2081_v35 }
  0x3d   : > { %413 = vmatmul.mubr.f32.gmra.mrb[6].mxu0 %v1849_v39 }
  0x3e   : > { %526 = vmatmul.mubr.f32.gmra.mrb[6].mxu1 %v1849_v39  ;;  %418 = vmatprep.mubr.f32.mxu0 %v2246_v7  ;;  %v2083_v39 = vpack.c.bf16 %v1523_v37, %v1522_v36 }
  0x3f   : > { %531 = vmatprep.mubr.f32.mxu1 %v2246_v7 }
  0x40   : > { %2084 = vmatpush3.bf16.msra.mxu1 %v2083_v39 }
  0x41   : > { %419 = vmatmul.mubr.f32.gmra.mrb[8].mxu0 %v1852_v41 }
  0x42   : > { %532 = vmatmul.mubr.f32.gmra.mrb[8].mxu1 %v1852_v41  ;;  %424 = vmatprep.mubr.f32.mxu0 %v2246_v7 }
  0x43   : > { %537 = vmatprep.mubr.f32.mxu1 %v2246_v7 }
  0x45   : > { %425 = vmatmul.mubr.f32.gmra.mrb[10].mxu0 %v1853_v42 }
  0x46   : > { %538 = vmatmul.mubr.f32.gmra.mrb[10].mxu1 %v1853_v42  ;;  %430 = vmatprep.mubr.f32.mxu0 %v2246_v7  ;;  %v2625_v42 = vrot.slane %v308_v6, %v316_v24 }
  0x47   : > { %543 = vmatprep.mubr.f32.mxu1 %v2246_v7 }
  0x49   : > { %431 = vmatmul.mubr.f32.gmra.mrb[12].mxu0 %v1856_v44 }
  0x4a   : > { %544 = vmatmul.mubr.f32.gmra.mrb[12].mxu1 %v1856_v44  ;;  %436 = vmatprep.mubr.f32.mxu0 %v2246_v7  ;;  %v1508_v44 = vld [vmem:[%s3702_s3 + $0xc0] sm:$0xff] }
  0x4b   : > { %549 = vmatprep.mubr.f32.mxu1 %v2246_v7  ;;  %v1485_v7 = vld [vmem:[%s3702_s3 + $0x8] sm:$0xff] }
  0x4c   : > { %v2039_v52 = vpack.c.bf16 %v1485_v7, %v1484_v50  ;;  %v1492_v50 = vld [vmem:[%s3702_s3 + $0x40] sm:$0xff]  ;;  %v1493_v7 = vld [vmem:[%s3702_s3 + $0x48] sm:$0xff] }
  0x4d   : > { %437 = vmatmul.mubr.f32.gmra.mrb[14].mxu0 %v1857_v45 }
  0x4e   : > { %550 = vmatmul.mubr.f32.gmra.mrb[14].mxu1 %v1857_v45  ;;  %2040 = vmatpush3.bf16.msra.mxu0 %v2039_v52  ;;  %v1509_v45 = vld [vmem:[%s3702_s3 + $0xc8] sm:$0xff]  ;;  %v2055_v52 = vpack.c.bf16 %v1493_v7, %v1492_v50 }
  0x4f   : > { %2042 = vmatprep.subr.bf16.mxu0 %v2041_v62  ;;  %v2053_v49 = vpack.c.bf16 %v1509_v45, %v1508_v44 }
  0x52   : > { %2044 = vmatpush3.bf16.msra.mxu0 %v2043_v2 }
  0x53   : > { %2046 = vmatprep.subr.bf16.mxu0 %v2045_v14 }
  0x56   : > { %2048 = vmatpush3.bf16.msra.mxu0 %v2047_v18 }
  0x57   : > { %2050 = vmatprep.subr.bf16.mxu0 %v2049_v30 }
  0x5a   : > { %2052 = vmatpush3.bf16.msra.mxu0 %v2051_v34 }
  0x5b   : > { %2054 = vmatprep.subr.bf16.mxu0 %v2053_v49 }
  0x5e   : > { %2056 = vmatpush3.bf16.msra.mxu0 %v2055_v52 }
 0x104   : > { %v396_v38 = vpop.f32.mrb[0].mxu0 }
 0x105   : > { %v2623_v40 = vadd.f32 %v396_v38, %v2592_v23  ;;  %v509_v41 = vpop.f32.mrb[0].mxu1  ;;  %v398_v43 = vpop.f32.mrb[1].mxu0 }
 0x106   : > { %v510_v46 = vadd.f32 %v509_v41, %v2604_v28  ;;  %v511_v48 = vpop.f32.mrb[1].mxu1  ;;  %v2649_v55 = vadd.f32 %v398_v43, %v2625_v42 }
 0x107   : > { %v2643_v51 = vmul.f32 0.70710677, %v2623_v40  ;;  %v2653_v57 = vadd.f32 %v511_v48, %v2634_v47  ;;  %v2705_v35 = vmul.f32 0.5, %v2623_v40 }
 0x108   : > { %v2645_v53 = vmul.f32 0.70710677, %v510_v46  ;;  %v2656_v61 = vmul.f32 0.70710677, %v2649_v55  ;;  %v402_v62 = vpop.f32.mrb[2].mxu0  ;;  %v2712_v41 = vmul.f32 0.5, %v510_v46 }
 0x109   : > { %v620_v54 = vand.u32 2147483647, %v2643_v51  ;;  %v515_v63 = vpop.f32.mrb[2].mxu1  ;;  %v2659_v1 = vmul.f32 0.70710677, %v2653_v57  ;;  %v404_v2 = vpop.f32.mrb[3].mxu0  ;;  %v2664_v6 = vadd.f32 %v402_v62, %v2592_v23 }
 0x10a   : > { %v622_v56 = vand.u32 2147483647, %v2645_v53  ;;  %3769 = vst [vmem:[#allocation2_spill] sm:$0xff] %v2656_v61  ;;  %v517_v3 = vpop.f32.mrb[3].mxu1  ;;  %v621_v10 = vand.u32 2147483647, %v2656_v61  ;;  %v2684_v18 = vadd.f32 %v515_v63, %v2604_v28  ;;  %v2687_v20 = vadd.f32 %v404_v2, %v2625_v42 }
 0x10b   : > { %v652_v58 = vmul.f32 0.3275911, %v620_v54  ;;  %3770 = vst [vmem:[#allocation3_spill] sm:$0xff] %v2659_v1  ;;  %v1132_v13 = vsub.f32 0.0, %v620_v54  ;;  %v623_v14 = vand.u32 2147483647, %v2659_v1  ;;  %v2692_v24 = vadd.f32 %v517_v3, %v2634_v47 }
 0x10c   : > { %v654_v59 = vmul.f32 0.3275911, %v622_v56  ;;  %v408_v4 = vpop.f32.mrb[4].mxu0  ;;  %v2681_v17 = vmul.f32 0.70710677, %v2664_v6  ;;  %v1134_v19 = vsub.f32 0.0, %v622_v56 }
 0x10d   : > { %v684_v60 = vadd.f32 1.0, %v652_v58  ;;  %v2661_v5 = vpop.f32.mrb[4].mxu1  ;;  %v2666_v8 = vpop.f32.mrb[5].mxu0  ;;  %v653_v22 = vmul.f32 0.3275911, %v621_v10  ;;  %v1164_v27 = vmul.f32 %v1132_v13, %v620_v54  ;;  %v1133_v29 = vsub.f32 0.0, %v621_v10 }
 0x10e   : > { %v686_v0 = vadd.f32 1.0, %v654_v59  ;;  %v2668_v9 = vpop.f32.mrb[5].mxu1  ;;  %3771 = vst [vmem:[#allocation4_spill] sm:$0xff] %v2681_v17  ;;  %v1135_v30 = vsub.f32 0.0, %v623_v14  ;;  %v655_v32 = vmul.f32 0.3275911, %v623_v14  ;;  %v1166_v36 = vmul.f32 %v1134_v19, %v622_v56 }
 0x10f   : > { %2110 = vrcp.f32 %v684_v60  ;;  %v624_v33 = vand.u32 2147483647, %v2681_v17  ;;  %v2702_v34 = vmul.f32 0.70710677, %v2684_v18  ;;  %v2708_v37 = vmul.f32 0.70710677, %v2687_v20 }
 0x110   : > { %2112 = vrcp.f32 %v686_v0  ;;  %v2671_v11 = vpop.f32.mrb[6].mxu0  ;;  %v2714_v43 = vadd.f32 1.0, %v653_v22  ;;  %v2717_v44 = vmul.f32 0.70710677, %v2692_v24  ;;  %v1196_v50 = vmul.f32 1.442695, %v1164_v27 }
 0x111   : > { %v2673_v12 = vpop.f32.mrb[6].mxu1  ;;  %v2676_v15 = vpop.f32.mrb[7].mxu0  ;;  %3772 = vst [vmem:[#allocation5_spill] sm:$0xff] %v2702_v34  ;;  %3773 = vst [vmem:[#allocation6_spill] sm:$0xff] %v2708_v37  ;;  %v1165_v7 = vmul.f32 %v1133_v29, %v621_v10  ;;  %v1167_v52 = vmul.f32 %v1135_v30, %v623_v14  ;;  %v2725_v58 = vadd.f32 1.0, %v655_v32  ;;  %v1136_v30 = vsub.f32 0.0, %v624_v33 }
 0x112   : > { %v2678_v16 = vpop.f32.mrb[7].mxu1  ;;  %3774 = vst [vmem:[#allocation7_spill] sm:$0xff] %v2717_v44  ;;  %v656_v46 = vmul.f32 0.3275911, %v624_v33  ;;  %v626_v59 = vand.u32 2147483647, %v2702_v34  ;;  %2114 = vrcp.f32 %v2714_v43 }
 0x113   : > { %v1200_v63 = vmul.f32 1.442695, %v1166_v36  ;;  %v625_v2 = vand.u32 2147483647, %v2708_v37  ;;  %v2735_v10 = vand.u32 2147483647, %v2717_v44  ;;  %2116 = vrcp.f32 %v2725_v58 }
 0x114   : > { %v2689_v21 = vpop.f32.mrb[8].mxu0  ;;  %v1198_v27 = vmul.f32 1.442695, %v1165_v7  ;;  %v1202_v29 = vmul.f32 1.442695, %v1167_v52  ;;  %2118 = vpow2.f32 %v1196_v50  ;;  %vm1324_vm0 = vcmp.ge.f32.partialorder %v2643_v51, 0.0 }
 0x115   : > { %v2694_v25 = vpop.f32.mrb[8].mxu1  ;;  %v2696_v26 = vpop.f32.mrb[9].mxu0  ;;  %vm1326_vm1 = vcmp.ge.f32.partialorder %v2645_v53, 0.0 }
 0x116   : > { %v2698_v31 = vpop.f32.mrb[9].mxu1 }
 0x118   : > { %v2710_v38 = vpop.f32.mrb[10].mxu0 }
 0x119   : > { %v2111_v39 = vpop.eup %2110  ;;  %v2719_v45 = vpop.f32.mrb[10].mxu1 }
 0x11a   : > { %v2721_v48 = vpop.f32.mrb[11].mxu0  ;;  %v2113_v40 = vpop.eup %2112  ;;  %v748_v49 = vmul.f32 %v2111_v39, %v684_v60  ;;  %v2732_v60 = vmul.f32 0.5, %v2649_v55  ;;  %v2751_v55 = vadd.f32 1.0, %v656_v46  ;;  %v2767_v46 = vadd.f32 %v2661_v5, %v2604_v28 }
 0x11b   : > { %v2723_v54 = vpop.f32.mrb[11].mxu1  ;;  %v750_v56 = vmul.f32 %v2113_v40, %v686_v0  ;;  %v2738_v0 = vadd.f32 %v408_v4, %v2592_v23 }
 0x11c   : > { %v780_v62 = vsub.f32 2.0, %v748_v49  ;;  %v2729_v3 = vpop.f32.mrb[12].mxu0  ;;  %3775 = vst [vmem:[#allocation8_spill] sm:$0xff] %v2732_v60  ;;  %v658_v49 = vmul.f32 0.3275911, %v626_v59  ;;  %2120 = vrcp.f32 %v2751_v55 }
 0x11d   : > { %v782_v13 = vsub.f32 2.0, %v750_v56  ;;  %v2740_v14 = vpop.f32.mrb[12].mxu1  ;;  %v2742_v19 = vpop.f32.mrb[13].mxu0  ;;  %v2755_v56 = vmul.f32 0.5, %v2653_v57  ;;  %v1168_v57 = vmul.f32 %v1136_v30, %v624_v33  ;;  %v1137_v33 = vsub.f32 0.0, %v625_v2 }
 0x11e   : > { %v2744_v22 = vmul.f32 %v2111_v39, %v780_v62  ;;  %v2746_v32 = vpop.f32.mrb[13].mxu1  ;;  %v657_v39 = vmul.f32 0.3275911, %v625_v2  ;;  %v2763_v62 = vmul.f32 0.70710677, %v2738_v0  ;;  %v2774_v44 = vadd.f32 1.0, %v658_v49 }
 0x11f   : > { %v2748_v36 = vmul.f32 %v2113_v40, %v782_v13  ;;  %3776 = vst [vmem:[#allocation9_spill] sm:$0xff] %v2755_v56  ;;  %v659_v40 = vmul.f32 0.3275911, %v2735_v10  ;;  %v1138_v56 = vsub.f32 0.0, %v626_v59  ;;  %v2785_v50 = vmul.f32 0.70710677, %v2767_v46 }
 0x120   : > { %v844_v4 = vmul.f32 1.0614054, %v2744_v22  ;;  %v2758_v7 = vpop.f32.mrb[14].mxu0  ;;  %3777 = vst [vmem:[#allocation10_spill] sm:$0xff] %v2763_v62  ;;  %v2777_v37 = vand.u32 2147483647, %v2763_v62  ;;  %2122 = vpow2.f32 %v1200_v63  ;;  %v1169_v63 = vmul.f32 %v1137_v33, %v625_v2 }
 0x121   : > { %v846_v52 = vmul.f32 1.0614054, %v2748_v36  ;;  %v2769_v60 = vpop.f32.mrb[14].mxu1  ;;  %v2771_v34 = vpop.f32.mrb[15].mxu0  ;;  %3781 = vst [vmem:[#allocation14_spill] sm:$0xff] %v2785_v50  ;;  %v2792_v62 = vmul.f32 0.5, %v2664_v6  ;;  %2124 = vrcp.f32 %v2774_v44  ;;  %v2805_v6 = vadd.f32 %v2666_v8, %v2625_v42 }
 0x122   : > { %v876_v13 = vadd.f32 -1.4531521, %v844_v4  ;;  %3778 = vst [vmem:[#allocation11_spill] sm:$0xff] %v2769_v60  ;;  %3779 = vst [vmem:[#allocation12_spill] sm:$0xff] %v2771_v34  ;;  %v2779_v1 = vpop.f32.mrb[15].mxu1  ;;  %v2782_v4 = vadd.f32 1.0, %v657_v39  ;;  %v1170_v39 = vmul.f32 %v1138_v56, %v626_v59 }
 0x123   : > { %v878_v17 = vadd.f32 -1.4531521, %v846_v52  ;;  %3780 = vst [vmem:[#allocation13_spill] sm:$0xff] %v2779_v1  ;;  %v2788_v52 = vadd.f32 1.0, %v659_v40  ;;  %v660_v49 = vmul.f32 0.3275911, %v2777_v37  ;;  %v2115_v40 = vpop.eup %2114 }
 0x124   : > { %v908_v5 = vmul.f32 %v876_v13, %v2744_v22  ;;  %3782 = vst [vmem:[#allocation15_spill] sm:$0xff] %v2792_v62  ;;  %v2795_v1 = vmul.f32 0.5, %v2684_v18  ;;  %v1204_v34 = vmul.f32 1.442695, %v1168_v57  ;;  %v2799_v60 = vand.u32 2147483647, %v2785_v50  ;;  %v2812_v57 = vpop.eup %2116 }
 0x125   : > { %v910_v30 = vmul.f32 %v878_v17, %v2748_v36  ;;  %2126 = vrcp.f32 %v2782_v4  ;;  %v1139_v59 = vsub.f32 0.0, %v2735_v10  ;;  %v2810_v56 = vadd.f32 1.0, %v660_v49 }
 0x126   : > { %v940_v61 = vadd.f32 1.4214138, %v908_v5  ;;  %3783 = vst [vmem:[#allocation16_spill] sm:$0xff] %v2795_v1  ;;  %2128 = vrcp.f32 %v2788_v52  ;;  %v2818_v2 = vmul.f32 0.5, %v2692_v24  ;;  %v1208_v33 = vmul.f32 1.442695, %v1170_v39 }
 0x127   : > { %v942_v13 = vadd.f32 1.4214138, %v910_v30  ;;  %2130 = vpow2.f32 %v1198_v27  ;;  %v662_v30 = vmul.f32 0.3275911, %v2799_v60  ;;  %v749_v49 = vmul.f32 %v2115_v40, %v2714_v43 }
 0x128   : > { %v972_v17 = vmul.f32 %v940_v61, %v2744_v22  ;;  %v2815_v61 = vmul.f32 0.5, %v2687_v20  ;;  %3785 = vst [vmem:[#allocation18_spill] sm:$0xff] %v2818_v2  ;;  %2132 = vpow2.f32 %v1202_v29  ;;  %v1206_v1 = vmul.f32 1.442695, %v1169_v63 }
 0x129   : > { %v974_v18 = vmul.f32 %v942_v13, %v2748_v36  ;;  %v2119_v13 = vpop.eup %2118  ;;  %2134 = vpow2.f32 %v1204_v34  ;;  %v1171_v24 = vmul.f32 %v1139_v59, %v2735_v10  ;;  %v751_v39 = vmul.f32 %v2812_v57, %v2725_v58 }
 0x12a   : > { %v1004_v5 = vadd.f32 -0.28449672, %v972_v17  ;;  %3784 = vst [vmem:[#allocation17_spill] sm:$0xff] %v2815_v61  ;;  %v2824_v17 = vmul.f32 0.70710677, %v2805_v6  ;;  %v2121_v27 = vpop.eup %2120  ;;  %2136 = vrcp.f32 %v2810_v56  ;;  %v2834_v34 = vadd.f32 %v2668_v9, %v2634_v47 }
 0x12b   : > { %v1006_v8 = vadd.f32 -0.28449672, %v974_v18  ;;  %v1140_v18 = vsub.f32 0.0, %v2777_v37  ;;  %v2123_v43 = vpop.eup %2122  ;;  %v2836_v62 = vadd.f32 1.0, %v662_v30  ;;  %v2841_v10 = vadd.f32 %v2671_v11, %v2592_v23 }
 0x12c   : > { %v1036_v50 = vmul.f32 %v1004_v5, %v2744_v22  ;;  %3786 = vst [vmem:[#allocation19_spill] sm:$0xff] %v2824_v17  ;;  %v629_v63 = vand.u32 2147483647, %v2824_v17  ;;  %v781_v59 = vsub.f32 2.0, %v749_v49  ;;  %v752_v58 = vmul.f32 %v2121_v27, %v2751_v55 }
 0x12d   : > { %v1038_v20 = vmul.f32 %v1006_v8, %v2748_v36  ;;  %2138 = vpow2.f32 %v1208_v33  ;;  %v2125_v8 = vpop.eup %2124  ;;  %v2850_v30 = vmul.f32 0.70710677, %v2834_v34  ;;  %v783_v61 = vsub.f32 2.0, %v751_v39 }
 0x12e   : > { %v1068_v29 = vadd.f32 0.2548296, %v1036_v50  ;;  %2140 = vpow2.f32 %v1206_v1  ;;  %v1210_v11 = vmul.f32 1.442695, %v1171_v24  ;;  %v1172_v17 = vmul.f32 %v1140_v18, %v2777_v37 }
 0x12f   : > { %v1070_v5 = vadd.f32 0.2548296, %v1038_v20  ;;  %v2847_v20 = vmul.f32 0.5, %v2738_v0  ;;  %3788 = vst [vmem:[#allocation21_spill] sm:$0xff] %v2850_v30  ;;  %v2127_v2 = vpop.eup %2126  ;;  %2142 = vrcp.f32 %v2836_v62  ;;  %v631_v1 = vand.u32 2147483647, %v2850_v30 }
 0x130   : > { %v1100_v50 = vmul.f32 %v1068_v29, %v2744_v22  ;;  %v2854_v22 = vmul.f32 0.70710677, %v2841_v10  ;;  %v2129_v55 = vpop.eup %2128  ;;  %v2860_v29 = vmul.f32 %v2115_v40, %v781_v59  ;;  %v754_v24 = vmul.f32 %v2125_v8, %v2774_v44 }
 0x131   : > { %v1102_v9 = vmul.f32 %v1070_v5, %v2748_v36  ;;  %3787 = vst [vmem:[#allocation20_spill] sm:$0xff] %v2847_v20  ;;  %v661_v36 = vmul.f32 0.3275911, %v629_v63  ;;  %v2858_v0 = vpop.eup %2130  ;;  %v784_v5 = vsub.f32 2.0, %v752_v58  ;;  %v753_v37 = vmul.f32 %v2127_v2, %v2782_v4 }
 0x132   : > { %3789 = vst [vmem:[#allocation22_spill] sm:$0xff] %v2854_v22  ;;  %v1260_v33 = vmul.f32 %v2119_v13, %v1100_v50  ;;  %v2863_v39 = vpop.eup %2132  ;;  %v1142_v18 = vsub.f32 0.0, %v2799_v60  ;;  %v663_v13 = vmul.f32 0.3275911, %v631_v1  ;;  %v2868_v50 = vand.u32 2147483647, %v2854_v22 }
 0x133   : > { %v1262_v49 = vmul.f32 %v2123_v43, %v1102_v9  ;;  %3790 = vst [vmem:[#allocation23_spill] sm:$0xff] %v2863_v39  ;;  %v2870_v20 = vpop.eup %2134  ;;  %v755_v40 = vmul.f32 %v2129_v55, %v2788_v52  ;;  %2144 = vpow2.f32 %v1210_v11  ;;  %v1212_v43 = vmul.f32 1.442695, %v1172_v17 }
 0x134   : > { %3791 = vst [vmem:[#allocation24_spill] sm:$0xff] %v2870_v20  ;;  %v1141_v59 = vsub.f32 0.0, %v629_v63  ;;  %v2874_v44 = vpop.eup %2136  ;;  %v1292_v58 = vsub.f32 1.0, %v1260_v33  ;;  %v2878_v4 = vmul.f32 %v2812_v57, %v783_v61  ;;  %v2880_v9 = vadd.f32 1.0, %v661_v36 }
 0x135   : > { %v2884_v22 = vadd.f32 %v2673_v12, %v2604_v28  ;;  %v1294_v30 = vsub.f32 1.0, %v1262_v49  ;;  %v786_v20 = vsub.f32 2.0, %v754_v24  ;;  %v2887_v52 = vmul.f32 0.5, %v2767_v46 }
 0x136   : > { %v2889_v17 = vadd.f32 1.0, %v663_v13  ;;  %v2891_v11 = vmul.f32 %v2121_v27, %v784_v5  ;;  %v785_v33 = vsub.f32 2.0, %v753_v37  ;;  %v1174_v39 = vmul.f32 %v1142_v18, %v2799_v60 }
 0x137   : > { %3792 = vst [vmem:[#allocation25_spill] sm:$0xff] %v2887_v52  ;;  %v664_v57 = vmul.f32 0.3275911, %v2868_v50  ;;  %v2895_v61 = vpop.eup %2138  ;;  %v787_v36 = vsub.f32 2.0, %v755_v40  ;;  %v756_v12 = vmul.f32 %v2874_v44, %v2810_v56  ;;  %2146 = vpow2.f32 %v1212_v43 }
 0x138   : > { %v1173_v49 = vmul.f32 %v1141_v59, %v629_v63  ;;  %v2899_v24 = vpop.eup %2140  ;;  %v1356_v46 = vsub.f32 0.0, %v1292_v58  ;;  %2148 = vrcp.f32 %v2880_v9  ;;  %v1143_v27 = vsub.f32 0.0, %v631_v1 }
 0x139   : > { %v2903_v5 = vmul.f32 0.70710677, %v2884_v22  ;;  %v1358_v60 = vsub.f32 0.0, %v1294_v30  ;;  %v2905_v37 = vmul.f32 %v2125_v8, %v786_v20  ;;  %v2908_v18 = vmul.f32 0.5, %v2805_v6  ;;  %v2143_v56 = vpop.eup %2142 }
 0x13a   : > { %2150 = vrcp.f32 %v2889_v17  ;;  %v2911_v13 = vadd.f32 1.0, %v664_v57  ;;  %v2916_v40 = vadd.f32 %v2676_v15, %v2625_v42  ;;  %v2920_v43 = vadd.f32 %v2678_v16, %v2634_v47 }
 0x13b   : > { %3793 = vst [vmem:[#allocation26_spill] sm:$0xff] %v2903_v5  ;;  %3794 = vst [vmem:[#allocation27_spill] sm:$0xff] %v2908_v18  ;;  %v634_v63 = vand.u32 2147483647, %v2903_v5  ;;  %v2922_v8 = vmul.f32 %v2127_v2, %v785_v33  ;;  %v2924_v20 = vmul.f32 %v2129_v55, %v787_v36  ;;  %v1216_v6 = vmul.f32 1.442695, %v1174_v39 }
 0x13c   : > { %v2928_v59 = vadd.f32 %v2689_v21, %v2592_v23  ;;  %v1388_v57 = vsel %vm1324_vm0, %v1292_v58, %v1356_v46  ;;  %v788_v52 = vsub.f32 2.0, %v756_v12  ;;  %v1214_v5 = vmul.f32 1.442695, %v1173_v49 }
 0x13d   : > { %v1175_v15 = vmul.f32 %v1143_v27, %v631_v1  ;;  %v2932_v18 = vpop.eup %2144  ;;  %v1390_v16 = vsel %vm1326_vm1, %v1294_v30, %v1358_v60  ;;  %v758_v2 = vmul.f32 %v2143_v56, %v2836_v62  ;;  %v2938_v55 = vmul.f32 0.70710677, %v2916_v40 }
 0x13e   : > { %v2941_v39 = vmul.f32 0.70710677, %v2920_v43  ;;  %2152 = vrcp.f32 %v2911_v13  ;;  %v1144_v51 = vsub.f32 0.0, %v2868_v50  ;;  %v666_v21 = vmul.f32 0.3275911, %v634_v63 }
 0x13f   : > { %3795 = vst [vmem:[#allocation28_spill] sm:$0xff] %v2938_v55  ;;  %v2946_v1 = vmul.f32 0.70710677, %v2928_v59  ;;  %v1420_v58 = vadd.f32 1.0, %v1388_v57  ;;  %2154 = vpow2.f32 %v1216_v6  ;;  %v633_v53 = vand.u32 2147483647, %v2938_v55 }
 0x140   : > { %3796 = vst [vmem:[#allocation29_spill] sm:$0xff] %v2941_v39  ;;  %v635_v62 = vand.u32 2147483647, %v2941_v39  ;;  %v1422_v30 = vadd.f32 1.0, %v1390_v16  ;;  %v2951_v33 = vmul.f32 0.5, %v2834_v34  ;;  %v2954_v12 = vmul.f32 0.5, %v2841_v10 }
 0x141   : > { %3797 = vst [vmem:[#allocation30_spill] sm:$0xff] %v2946_v1  ;;  %v1218_v36 = vmul.f32 1.442695, %v1175_v15  ;;  %v2956_v49 = vpop.eup %2146  ;;  %2156 = vpow2.f32 %v1214_v5  ;;  %v665_v46 = vmul.f32 0.3275911, %v633_v53  ;;  %v2962_v57 = vmul.f32 %v2874_v44, %v788_v52 }
 0x142   : > { %3798 = vst [vmem:[#allocation31_spill] sm:$0xff] %v2951_v33  ;;  %3799 = vst [vmem:[#allocation32_spill] sm:$0xff] %v2954_v12  ;;  %v667_v27 = vmul.f32 0.3275911, %v635_v62  ;;  %v636_v60 = vand.u32 2147483647, %v2946_v1  ;;  %v2959_v6 = vpop.eup %2148  ;;  %v1176_v34 = vmul.f32 %v1144_v51, %v2868_v50  ;;  %v2968_v10 = vmul.f32 %v1420_v58, %v2705_v35 }
 0x143   : > { %3800 = vst [vmem:[#allocation33_spill] sm:$0xff] %v2956_v49  ;;  %v790_v16 = vsub.f32 2.0, %v758_v2  ;;  %v2965_v39 = vadd.f32 1.0, %v666_v21  ;;  %v1146_v12 = vsub.f32 0.0, %v634_v63  ;;  %v1145_v5 = vsub.f32 0.0, %v633_v53 }
 0x144   : > { %v2151_v15 = vpop.eup %2150  ;;  %v2972_v49 = vadd.f32 %v2694_v25, %v2604_v28  ;;  %2158 = vpow2.f32 %v1218_v36  ;;  %v2974_v1 = vadd.f32 1.0, %v665_v46  ;;  %v1147_v44 = vsub.f32 0.0, %v635_v62 }
 0x145   : > { %v423_v52 = vadd.f32 %v2696_v26, %v2625_v42  ;;  %v2979_v50 = vmul.f32 %v1422_v30, %v2712_v41  ;;  %v2982_v2 = vmul.f32 0.5, %v2884_v22  ;;  %v2984_v35 = vadd.f32 1.0, %v667_v27 }
 0x146   : > { %v668_v51 = vmul.f32 0.3275911, %v636_v60  ;;  %v2986_v21 = vmul.f32 %v2143_v56, %v790_v16  ;;  %v757_v25 = vmul.f32 %v2959_v6, %v2880_v9  ;;  %v1220_v58 = vmul.f32 1.442695, %v1176_v34 }
 0x147   : > { %3801 = vst [vmem:[#allocation34_spill] sm:$0xff] %v2982_v2  ;;  %2160 = vrcp.f32 %v2965_v39  ;;  %v759_v36 = vmul.f32 %v2151_v15, %v2889_v17  ;;  %v1178_v26 = vmul.f32 %v1146_v12, %v634_v63  ;;  %v1177_v46 = vmul.f32 %v1145_v5, %v633_v53 }
 0x148   : > { %v2993_v41 = vmul.f32 0.70710677, %v2972_v49  ;;  %v2153_v22 = vpop.eup %2152  ;;  %2162 = vrcp.f32 %v2974_v1  ;;  %v1179_v30 = vmul.f32 %v1147_v44, %v635_v62  ;;  %v2996_v27 = vmul.f32 0.70710677, %v423_v52 }
 0x149   : > { %v536_v56 = vadd.f32 %v2698_v31, %v2634_v47  ;;  %v3000_v9 = vpop.eup %2154  ;;  %2164 = vrcp.f32 %v2984_v35  ;;  %v3003_v16 = vadd.f32 1.0, %v668_v51  ;;  %v427_v63 = vadd.f32 %v2710_v38, %v2592_v23 }
 0x14a   : > { %3802 = vst [vmem:[#allocation35_spill] sm:$0xff] %v2993_v41  ;;  %3803 = vst [vmem:[#allocation36_spill] sm:$0xff] %v2996_v27  ;;  %v638_v17 = vand.u32 2147483647, %v2993_v41  ;;  %v789_v53 = vsub.f32 2.0, %v757_v25  ;;  %v3009_v12 = vmul.f32 0.5, %v2916_v40  ;;  %v760_v31 = vmul.f32 %v2153_v22, %v2911_v13 }
 0x14b   : > { %3804 = vst [vmem:[#allocation37_spill] sm:$0xff] %v3000_v9  ;;  %v1148_v62 = vsub.f32 0.0, %v636_v60  ;;  %v637_v34 = vand.u32 2147483647, %v2996_v27  ;;  %v3012_v5 = vpop.eup %2156  ;;  %v1224_v44 = vmul.f32 1.442695, %v1178_v26  ;;  %2166 = vpow2.f32 %v1220_v58 }
 0x14c   : > { %3805 = vst [vmem:[#allocation38_spill] sm:$0xff] %v3009_v12  ;;  %v670_v2 = vmul.f32 0.3275911, %v638_v17  ;;  %v3015_v51 = vmul.f32 0.70710677, %v536_v56  ;;  %v791_v38 = vsub.f32 2.0, %v759_v36  ;;  %2168 = vrcp.f32 %v3003_v16 }
 0x14d   : > { %v1222_v41 = vmul.f32 1.442695, %v1177_v46  ;;  %v669_v9 = vmul.f32 0.3275911, %v637_v34  ;;  %v3017_v55 = vmul.f32 0.70710677, %v427_v63  ;;  %v1180_v13 = vmul.f32 %v1148_v62, %v636_v60 }
 0x14e   : > { %3806 = vst [vmem:[#allocation39_spill] sm:$0xff] %v3015_v51  ;;  %v1226_v25 = vmul.f32 1.442695, %v1179_v30  ;;  %v639_v40 = vand.u32 2147483647, %v3015_v51  ;;  %v3021_v12 = vpop.eup %2158  ;;  %v3024_v27 = vmul.f32 0.5, %v2920_v43  ;;  %2170 = vpow2.f32 %v1224_v44 }
 0x14f   : > { %3807 = vst [vmem:[#allocation40_spill] sm:$0xff] %v3017_v55  ;;  %3808 = vst [vmem:[#allocation41_spill] sm:$0xff] %v3021_v12  ;;  %v3026_v26 = vadd.f32 1.0, %v670_v2  ;;  %v640_v58 = vand.u32 2147483647, %v3017_v55  ;;  %v792_v46 = vsub.f32 2.0, %v760_v31  ;;  %v3035_v51 = vmul.f32 %v2959_v6, %v789_v53 }
 0x150   : > { %3809 = vst [vmem:[#allocation42_spill] sm:$0xff] %v3024_v27  ;;  %v3030_v33 = vmul.f32 0.5, %v2928_v59  ;;  %v3032_v36 = vadd.f32 1.0, %v669_v9  ;;  %2172 = vpow2.f32 %v1222_v41  ;;  %v1150_v12 = vsub.f32 0.0, %v638_v17 }
 0x151   : > { %v2161_v30 = vpop.eup %2160  ;;  %v671_v43 = vmul.f32 0.3275911, %v639_v40  ;;  %v3037_v27 = vmul.f32 %v2151_v15, %v791_v38  ;;  %2174 = vpow2.f32 %v1226_v25  ;;  %v1149_v60 = vsub.f32 0.0, %v637_v34 }
 0x152   : > { %3810 = vst [vmem:[#allocation43_spill] sm:$0xff] %v3030_v33  ;;  %v672_v2 = vmul.f32 0.3275911, %v640_v58  ;;  %v2163_v62 = vpop.eup %2162  ;;  %v1228_v31 = vmul.f32 1.442695, %v1180_v13  ;;  %v3040_v44 = vmul.f32 0.5, %v2972_v49  ;;  %2176 = vrcp.f32 %v3026_v26 }
 0x153   : > { %v3043_v59 = vmul.f32 0.5, %v423_v52  ;;  %v2165_v9 = vpop.eup %2164  ;;  %v3045_v6 = vmul.f32 %v2153_v22, %v792_v46  ;;  %v762_v41 = vmul.f32 %v2161_v30, %v2965_v39  ;;  %2178 = vrcp.f32 %v3032_v36 }
 0x154   : > { %3811 = vst [vmem:[#allocation44_spill] sm:$0xff] %v3040_v44  ;;  %v1151_v15 = vsub.f32 0.0, %v639_v40  ;;  %v1182_v53 = vmul.f32 %v1150_v12, %v638_v17  ;;  %v3049_v38 = vmul.f32 0.5, %v536_v56  ;;  %v3051_v25 = vadd.f32 1.0, %v671_v43 }
 0x155   : > { %3812 = vst [vmem:[#allocation45_spill] sm:$0xff] %v3043_v59  ;;  %v1152_v13 = vsub.f32 0.0, %v640_v58  ;;  %v1181_v49 = vmul.f32 %v1149_v60, %v637_v34  ;;  %v3053_v44 = vadd.f32 1.0, %v672_v2  ;;  %v540_v52 = vadd.f32 %v2719_v45, %v2604_v28  ;;  %v3059_v46 = vpop.eup %2166 }
 0x156   : > { %3813 = vst [vmem:[#allocation46_spill] sm:$0xff] %v3049_v38  ;;  %v429_v22 = vadd.f32 %v2721_v48, %v2625_v42  ;;  %3814 = vst [vmem:[#allocation47_spill] sm:$0xff] %v3059_v46  ;;  %v761_v39 = vmul.f32 %v2163_v62, %v2974_v1  ;;  %v763_v17 = vmul.f32 %v2165_v9, %v2984_v35  ;;  %v3063_v56 = vmul.f32 0.5, %v427_v63  ;;  %v2169_v34 = vpop.eup %2168 }
 0x157   : > { %v542_v12 = vadd.f32 %v2723_v54, %v2634_v47  ;;  %v794_v43 = vsub.f32 2.0, %v762_v41  ;;  %v1183_v60 = vmul.f32 %v1151_v15, %v639_v40  ;;  %v3067_v2 = vmul.f32 0.70710677, %v540_v52 }
 0x158   : > { %3815 = vst [vmem:[#allocation48_spill] sm:$0xff] %v3063_v56  ;;  %v3069_v45 = vmul.f32 0.70710677, %v429_v22  ;;  %v1232_v33 = vmul.f32 1.442695, %v1182_v53  ;;  %2180 = vrcp.f32 %v3051_v25  ;;  %v1184_v48 = vmul.f32 %v1152_v13, %v640_v58  ;;  %v3074_v1 = vpop.eup %2170 }
 0x159   : > { %3816 = vst [vmem:[#allocation49_spill] sm:$0xff] %v3067_v2  ;;  %v3072_v55 = vmul.f32 0.70710677, %v542_v12  ;;  %3819 = vst [vmem:[#allocation52_spill] sm:$0xff] %v3074_v1  ;;  %v1230_v35 = vmul.f32 1.442695, %v1181_v49  ;;  %2182 = vrcp.f32 %v3053_v44  ;;  %v764_v53 = vmul.f32 %v2169_v34, %v3003_v16 }
 0x15a   : > { %3817 = vst [vmem:[#allocation50_spill] sm:$0xff] %v3069_v45  ;;  %v642_v54 = vand.u32 2147483647, %v3067_v2  ;;  %v641_v63 = vand.u32 2147483647, %v3069_v45  ;;  %v3079_v40 = vpop.eup %2172  ;;  %v793_v41 = vsub.f32 2.0, %v761_v39  ;;  %2184 = vpow2.f32 %v1228_v31 }
 0x15b   : > { %3818 = vst [vmem:[#allocation51_spill] sm:$0xff] %v3072_v55  ;;  %3820 = vst [vmem:[#allocation53_spill] sm:$0xff] %v3079_v40  ;;  %v795_v15 = vsub.f32 2.0, %v763_v17  ;;  %v643_v56 = vand.u32 2147483647, %v3072_v55  ;;  %v3083_v58 = vpop.eup %2174  ;;  %2186 = vpow2.f32 %v1232_v33  ;;  %v3087_v40 = vmul.f32 %v2161_v30, %v794_v43 }
 0x15c   : > { %v1234_v13 = vmul.f32 1.442695, %v1183_v60  ;;  %v674_v38 = vmul.f32 0.3275911, %v642_v54  ;;  %v673_v49 = vmul.f32 0.3275911, %v641_v63  ;;  %v2177_v59 = vpop.eup %2176  ;;  %2188 = vpow2.f32 %v1230_v35 }
 0x15d   : > { %v1236_v1 = vmul.f32 1.442695, %v1184_v48  ;;  %v1154_v2 = vsub.f32 0.0, %v642_v54  ;;  %v675_v46 = vmul.f32 0.3275911, %v643_v56  ;;  %v3085_v45 = vpop.eup %2178  ;;  %v3093_v16 = vadd.f32 %v2729_v3, %v2592_v23 }
 0x15e   : > { %v3089_v39 = vadd.f32 1.0, %v674_v38  ;;  %v3095_v31 = vmul.f32 %v2163_v62, %v793_v41  ;;  %v3097_v17 = vmul.f32 %v2165_v9, %v795_v15  ;;  %v796_v60 = vsub.f32 2.0, %v764_v53 }
 0x15f   : > { %v3099_v33 = vadd.f32 1.0, %v673_v49  ;;  %v766_v48 = vmul.f32 %v2177_v59, %v3026_v26  ;;  %2190 = vpow2.f32 %v1234_v13  ;;  %v3102_v55 = vmul.f32 0.5, %v540_v52 }
 0x160   : > { %v1153_v30 = vsub.f32 0.0, %v641_v63  ;;  %v765_v38 = vmul.f32 %v3085_v45, %v3032_v36  ;;  %2192 = vpow2.f32 %v1236_v1  ;;  %v1186_v43 = vmul.f32 %v1154_v2, %v642_v54 }
 0x161   : > { %3821 = vst [vmem:[#allocation54_spill] sm:$0xff] %v3102_v55  ;;  %v3106_v3 = vadd.f32 1.0, %v675_v46  ;;  %2194 = vrcp.f32 %v3089_v39  ;;  %v3109_v62 = vmul.f32 0.5, %v429_v22  ;;  %v1155_v9 = vsub.f32 0.0, %v643_v56 }
 0x162   : > { %v3112_v35 = vmul.f32 0.70710677, %v3093_v16  ;;  %v2181_v26 = vpop.eup %2180  ;;  %v3114_v41 = vmul.f32 %v2169_v34, %v796_v60  ;;  %2196 = vrcp.f32 %v3099_v33  ;;  %v3117_v52 = vmul.f32 0.5, %v542_v12 }
 0x163   : > { %3822 = vst [vmem:[#allocation55_spill] sm:$0xff] %v3109_v62  ;;  %v3121_v36 = vadd.f32 %v2740_v14, %v2604_v28  ;;  %v2183_v46 = vpop.eup %2182  ;;  %v798_v2 = vsub.f32 2.0, %v766_v48  ;;  %v1185_v1 = vmul.f32 %v1153_v30, %v641_v63  ;;  %v435_v54 = vadd.f32 %v2742_v19, %v2625_v42 }
 0x164   : > { %3823 = vst [vmem:[#allocation56_spill] sm:$0xff] %v3112_v35  ;;  %3824 = vst [vmem:[#allocation57_spill] sm:$0xff] %v3117_v52  ;;  %v644_v22 = vand.u32 2147483647, %v3112_v35  ;;  %v797_v15 = vsub.f32 2.0, %v765_v38  ;;  %2198 = vrcp.f32 %v3106_v3  ;;  %v3130_v12 = vpop.eup %2184  ;;  %v767_v14 = vmul.f32 %v2181_v26, %v3051_v25 }
 0x165   : > { %3825 = vst [vmem:[#allocation58_spill] sm:$0xff] %v3121_v36  ;;  %v1240_v53 = vmul.f32 1.442695, %v1186_v43  ;;  %v3128_v34 = vmul.f32 0.70710677, %v3121_v36  ;;  %3827 = vst [vmem:[#allocation60_spill] sm:$0xff] %v3130_v12  ;;  %v1187_v13 = vmul.f32 %v1155_v9, %v643_v56  ;;  %v3135_v63 = vpop.eup %2186  ;;  %v768_v48 = vmul.f32 %v2183_v46, %v3053_v44 }
 0x166   : > { %v676_v49 = vmul.f32 0.3275911, %v644_v22  ;;  %v3133_v60 = vmul.f32 0.70710677, %v435_v54  ;;  %3829 = vst [vmem:[#allocation62_spill] sm:$0xff] %v3135_v63  ;;  %v1156_v19 = vsub.f32 0.0, %v644_v22  ;;  %v548_v38 = vadd.f32 %v2746_v32, %v2634_v47  ;;  %v3141_v43 = vpop.eup %2188 }
 0x167   : > { %3826 = vst [vmem:[#allocation59_spill] sm:$0xff] %v3128_v34  ;;  %v646_v30 = vand.u32 2147483647, %v3128_v34  ;;  %3830 = vst [vmem:[#allocation63_spill] sm:$0xff] %v3141_v43  ;;  %v3143_v36 = vmul.f32 %v2177_v59, %v798_v2  ;;  %v1238_v35 = vmul.f32 1.442695, %v1185_v1  ;;  %2200 = vpow2.f32 %v1240_v53 }
 0x168   : > { %3828 = vst [vmem:[#allocation61_spill] sm:$0xff] %v3133_v60  ;;  %v708_v25 = vadd.f32 1.0, %v676_v49  ;;  %v645_v56 = vand.u32 2147483647, %v3133_v60  ;;  %v3146_v52 = vmul.f32 0.70710677, %v548_v38  ;;  %v1188_v59 = vmul.f32 %v1156_v19, %v644_v22 }
 0x169   : > { %v678_v9 = vmul.f32 0.3275911, %v646_v30  ;;  %v1158_v55 = vsub.f32 0.0, %v646_v30  ;;  %v3148_v44 = vpop.eup %2190  ;;  %v799_v62 = vsub.f32 2.0, %v767_v14  ;;  %v1242_v34 = vmul.f32 1.442695, %v1187_v13 }
 0x16a   : > { %3831 = vst [vmem:[#allocation64_spill] sm:$0xff] %v3146_v52  ;;  %3832 = vst [vmem:[#allocation65_spill] sm:$0xff] %v3148_v44  ;;  %2202 = vrcp.f32 %v708_v25  ;;  %v677_v63 = vmul.f32 0.3275911, %v645_v56  ;;  %v3150_v32 = vpop.eup %2192  ;;  %v800_v12 = vsub.f32 2.0, %v768_v48  ;;  %v3156_v53 = vmul.f32 %v3085_v45, %v797_v15 }
 0x16b   : > { %3833 = vst [vmem:[#allocation66_spill] sm:$0xff] %v3150_v32  ;;  %v710_v2 = vadd.f32 1.0, %v678_v9  ;;  %v647_v1 = vand.u32 2147483647, %v3146_v52  ;;  %v3153_v49 = vpop.eup %2194  ;;  %2204 = vpow2.f32 %v1238_v35  ;;  %v1157_v44 = vsub.f32 0.0, %v645_v56  ;;  %v1543_v52 = vld [vmem:[%s3702_s3 + $0x1d8] sm:$0xff] }
 0x16c   : > { %v3158_v60 = vadd.f32 1.0, %v677_v63  ;;  %v2197_v14 = vpop.eup %2196  ;;  %v1190_v13 = vmul.f32 %v1158_v55, %v646_v30  ;;  %v3162_v48 = vadd.f32 %v2758_v7, %v2592_v23  ;;  %v3164_v22 = vmul.f32 %v2181_v26, %v799_v62  ;;  %v1541_v26 = vld [vmem:[%s3702_s3 + $0x1c8] sm:$0xff] }
 0x16d   : > { %2206 = vrcp.f32 %v710_v2  ;;  %v679_v43 = vmul.f32 0.3275911, %v647_v1  ;;  %v3167_v19 = vmul.f32 0.5, %v3093_v16  ;;  %v1159_v45 = vsub.f32 0.0, %v647_v1  ;;  %v1540_v16 = vld [vmem:[%s3702_s3 + $0x1c0] sm:$0xff] }
 0x16e   : > { %3834 = vst [vmem:[#allocation67_spill] sm:$0xff] %v3162_v48  ;;  %2208 = vrcp.f32 %v3158_v60  ;;  %v2199_v35 = vpop.eup %2198  ;;  %v3170_v15 = vmul.f32 %v2183_v46, %v800_v12  ;;  %v1244_v63 = vmul.f32 1.442695, %v1188_v59  ;;  %v770_v55 = vmul.f32 %v3153_v49, %v3089_v39  ;;  %v3840_v12 = vld [vmem:[#allocation11_spill] sm:$0xff]  ;;  %v3845_v59 = vld [vmem:[#allocation13_spill] sm:$0xff] }
 0x16f   : > { %3835 = vst [vmem:[#allocation68_spill] sm:$0xff] %v3167_v19  ;;  %2210 = vpow2.f32 %v1242_v34  ;;  %v3172_v9 = vadd.f32 1.0, %v679_v43  ;;  %v769_v23 = vmul.f32 %v2197_v14, %v3099_v33  ;;  %v3177_v7 = vmul.f32 0.5, %v435_v54  ;;  %v3842_v43 = vld [vmem:[#allocation12_spill] sm:$0xff] }
 0x170   : > { %3836 = vst [vmem:[#allocation69_spill] sm:$0xff] %v3170_v15  ;;  %v1189_v62 = vmul.f32 %v1157_v44, %v645_v56  ;;  %v1248_v46 = vmul.f32 1.442695, %v1190_v13  ;;  %v3185_v34 = vmul.f32 0.5, %v548_v38  ;;  %v3189_v39 = vmul.f32 0.70710677, %v3162_v48 }
 0x171   : > { %3837 = vst [vmem:[#allocation70_spill] sm:$0xff] %v3177_v7  ;;  %2212 = vrcp.f32 %v3172_v9  ;;  %v771_v33 = vmul.f32 %v2199_v35, %v3106_v3  ;;  %v1191_v54 = vmul.f32 %v1159_v45, %v647_v1  ;;  %v3194_v30 = vadd.f32 %v3840_v12, %v2604_v28  ;;  %v3200_v44 = vpop.eup %2200  ;;  %v1526_v7 = vld [vmem:[%s3702_s3 + $0x150] sm:$0xff] }
 0x172   : > { %3838 = vst [vmem:[#allocation71_spill] sm:$0xff] %v3185_v34  ;;  %3839 = vst [vmem:[#allocation72_spill] sm:$0xff] %v3189_v39  ;;  %v3198_v56 = vadd.f32 %v3842_v43, %v2625_v42  ;;  %2214 = vpow2.f32 %v1244_v63  ;;  %v648_v38 = vand.u32 2147483647, %v3189_v39  ;;  %v3205_v13 = vadd.f32 %v3845_v59, %v2634_v47 }
 0x173   : > { %3841 = vst [vmem:[#allocation11_spill] sm:$0xff] %v3194_v30  ;;  %3844 = vst [vmem:[#allocation73_spill] sm:$0xff] %v3200_v44  ;;  %v2085_v48 = vpack.c.bf16 %v1541_v26, %v1540_v16  ;;  %v802_v1 = vsub.f32 2.0, %v770_v55  ;;  %v801_v45 = vsub.f32 2.0, %v769_v23  ;;  %v1246_v19 = vmul.f32 1.442695, %v1189_v62 }
 0x174   : > { %3843 = vst [vmem:[#allocation12_spill] sm:$0xff] %v3198_v56  ;;  %3846 = vst [vmem:[#allocation13_spill] sm:$0xff] %v3205_v13  ;;  %v2203_v3 = vpop.eup %2202  ;;  %v3208_v28 = vmul.f32 0.70710677, %v3194_v30  ;;  %v680_v42 = vmul.f32 0.3275911, %v648_v38  ;;  %2216 = vpow2.f32 %v1248_v46 }
 0x175   : > { %v772_v12 = vmul.f32 %v2203_v3, %v708_v25  ;;  %v1160_v43 = vsub.f32 0.0, %v648_v38  ;;  %v3211_v34 = vmul.f32 0.70710677, %v3198_v56  ;;  %2086 = vmatprep.subr.bf16.mxu1 %v2085_v48  ;;  %v3213_v63 = vpop.eup %2204  ;;  %v803_v39 = vsub.f32 2.0, %v771_v33 }
 0x176   : > { %3847 = vst [vmem:[#allocation74_spill] sm:$0xff] %v3208_v28  ;;  %3849 = vst [vmem:[#allocation76_spill] sm:$0xff] %v3213_v63  ;;  %v1250_v47 = vmul.f32 1.442695, %v1191_v54  ;;  %v650_v16 = vand.u32 2147483647, %v3208_v28  ;;  %2218 = vpow2.f32 %v1246_v19  ;;  %v3227_v46 = vmul.f32 %v3153_v49, %v802_v1 }
 0x177   : > { %3848 = vst [vmem:[#allocation75_spill] sm:$0xff] %v3211_v34  ;;  %v2207_v55 = vpop.eup %2206  ;;  %v3216_v23 = vadd.f32 1.0, %v680_v42  ;;  %v1192_v62 = vmul.f32 %v1160_v43, %v648_v38  ;;  %v649_v26 = vand.u32 2147483647, %v3211_v34  ;;  %v3220_v25 = vmul.f32 0.70710677, %v3205_v13 }
 0x178   : > { %v3222_v59 = vpop.eup %2208  ;;  %v804_v30 = vsub.f32 2.0, %v772_v12  ;;  %v774_v48 = vmul.f32 %v2207_v55, %v710_v2  ;;  %v682_v56 = vmul.f32 0.3275911, %v650_v16  ;;  %3852 = vst [vmem:[#allocation79_spill] sm:$0xff] %v3227_v46  ;;  %v3229_v54 = vmul.f32 %v2197_v14, %v801_v45  ;;  %v1524_v2 = vld [vmem:[%s3702_s3 + $0x140] sm:$0xff]  ;;  %v1525_v1 = vld [vmem:[%s3702_s3 + $0x148] sm:$0xff] }
 0x179   : > { %3850 = vst [vmem:[#allocation77_spill] sm:$0xff] %v3220_v25  ;;  %v3224_v33 = vpop.eup %2210  ;;  %2220 = vrcp.f32 %v3216_v23  ;;  %v1162_v38 = vsub.f32 0.0, %v650_v16  ;;  %v773_v42 = vmul.f32 %v3222_v59, %v3158_v60  ;;  %v1252_v43 = vmul.f32 1.442695, %v1192_v62  ;;  %v1510_v60 = vld [vmem:[%s3702_s3 + $0xd0] sm:$0xff]  ;;  %v1495_v62 = vld [vmem:[%s3702_s3 + $0x58] sm:$0xff] }
 0x17a   : > { %3851 = vst [vmem:[#allocation78_spill] sm:$0xff] %v3224_v33  ;;  %3853 = vst [vmem:[#allocation80_spill] sm:$0xff] %v3229_v54  ;;  %v3234_v28 = vadd.f32 1.0, %v682_v56  ;;  %v681_v12 = vmul.f32 0.3275911, %v649_v26  ;;  %v3239_v13 = vmul.f32 %v2199_v35, %v803_v39  ;;  %2222 = vpow2.f32 %v1250_v47  ;;  %v1511_v56 = vld [vmem:[%s3702_s3 + $0xd8] sm:$0xff] }
 0x17b   : > { %v2213_v19 = vpop.eup %2212  ;;  %v1161_v49 = vsub.f32 0.0, %v649_v26  ;;  %v651_v14 = vand.u32 2147483647, %v3220_v25  ;;  %v3251_v45 = vmul.f32 %v2203_v3, %v804_v30  ;;  %v806_v35 = vsub.f32 2.0, %v774_v48  ;;  %v1494_v47 = vld [vmem:[%s3702_s3 + $0x50] sm:$0xff]  ;;  %v1545_v33 = vld [vmem:[%s3702_s3 + $0x1e8] sm:$0xff] }
 0x17c   : > { %3854 = vst [vmem:[#allocation81_spill] sm:$0xff] %v3239_v13  ;;  %v775_v39 = vmul.f32 %v2213_v19, %v3172_v9  ;;  %2224 = vrcp.f32 %v3234_v28  ;;  %v1542_v25 = vld [vmem:[%s3702_s3 + $0x1d0] sm:$0xff]  ;;  %v3264_v34 = vpop.eup %2214  ;;  %v1194_v30 = vmul.f32 %v1162_v38, %v650_v16  ;;  %v3266_v3 = vadd.f32 1.0, %v681_v12  ;;  %v1513_v38 = vld [vmem:[%s3702_s3 + $0xe8] sm:$0xff]  ;;  %v1496_v12 = vld [vmem:[%s3702_s3 + $0x60] sm:$0xff] }
 0x17d   : > { %3855 = vst [vmem:[#allocation82_spill] sm:$0xff] %v3251_v45  ;;  %3856 = vst [vmem:[#allocation83_spill] sm:$0xff] %v3264_v34  ;;  %v1193_v9 = vmul.f32 %v1161_v49, %v649_v26  ;;  %v683_v48 = vmul.f32 0.3275911, %v651_v14  ;;  %v1527_v45 = vld [vmem:[%s3702_s3 + $0x158] sm:$0xff]  ;;  %v805_v44 = vsub.f32 2.0, %v773_v42  ;;  %2226 = vpow2.f32 %v1252_v43 }
 0x17e   : > { %v807_v32 = vsub.f32 2.0, %v775_v39  ;;  %v1163_v16 = vsub.f32 0.0, %v651_v14  ;;  %v1512_v26 = vld [vmem:[%s3702_s3 + $0xe0] sm:$0xff]  ;;  %2228 = vrcp.f32 %v3266_v3  ;;  %v2087_v42 = vpack.c.bf16 %v1525_v1, %v1524_v2  ;;  %v1497_v43 = vld [vmem:[%s3702_s3 + $0x68] sm:$0xff]  ;;  %v3298_v63 = vpop.eup %2216  ;;  %v1514_v13 = vld [vmem:[%s3702_s3 + $0xf0] sm:$0xff] }
 0x17f   : > { %v1254_v49 = vmul.f32 1.442695, %v1193_v9  ;;  %v3287_v34 = vadd.f32 1.0, %v683_v48  ;;  %v1544_v39 = vld [vmem:[%s3702_s3 + $0x1e0] sm:$0xff]  ;;  %v3300_v46 = vmul.f32 %v2207_v55, %v806_v35  ;;  %v2057_v48 = vpack.c.bf16 %v1511_v56, %v1510_v60  ;;  %v1529_v1 = vld [vmem:[%s3702_s3 + $0x168] sm:$0xff]  ;;  %v1515_v60 = vld [vmem:[%s3702_s3 + $0xf8] sm:$0xff] }
 0x180   : > { %v1195_v9 = vmul.f32 %v1163_v16, %v651_v14  ;;  %v2059_v15 = vpack.c.bf16 %v1495_v62, %v1494_v47  ;;  %v1528_v2 = vld [vmem:[%s3702_s3 + $0x160] sm:$0xff]  ;;  %v3311_v54 = vmul.f32 1.442695, %v1194_v30  ;;  %2088 = vmatpush3.bf16.msra.mxu1 %v2087_v42  ;;  %v2089_v55 = vpack.c.bf16 %v1543_v52, %v1542_v25  ;;  %v1498_v56 = vld [vmem:[%s3702_s3 + $0x70] sm:$0xff]  ;;  %v1499_v47 = vld [vmem:[%s3702_s3 + $0x78] sm:$0xff]  ;;  %v3322_v62 = vpop.eup %2218 }
 0x181   : > { %v2091_v35 = vpack.c.bf16 %v1527_v45, %v1526_v7  ;;  %v2061_v14 = vpack.c.bf16 %v1513_v38, %v1512_v26  ;;  %v3325_v30 = vmul.f32 %v3222_v59, %v805_v44  ;;  %2230 = vrcp.f32 %v3287_v34  ;;  %2058 = vmatprep.subr.bf16.mxu0 %v2057_v48  ;;  %v1546_v26 = vld [vmem:[%s3702_s3 + $0x1f0] sm:$0xff]  ;;  %v1547_v44 = vld [vmem:[%s3702_s3 + $0x1f8] sm:$0xff] }
 0x182   : > { %v1258_v52 = vmul.f32 1.442695, %v1195_v9  ;;  %v2093_v7 = vpack.c.bf16 %v1545_v33, %v1544_v39  ;;  %v3328_v45 = vmul.f32 %v2213_v19, %v807_v32  ;;  %2232 = vpow2.f32 %v1254_v49  ;;  %2060 = vmatpush3.bf16.msra.mxu0 %v2059_v15  ;;  %2090 = vmatprep.subr.bf16.mxu1 %v2089_v55  ;;  %v1530_v15 = vld [vmem:[%s3702_s3 + $0x170] sm:$0xff] }
 0x183   : > { %v2221_v25 = vpop.eup %2220  ;;  %v2063_v16 = vpack.c.bf16 %v1497_v43, %v1496_v12  ;;  %v845_v59 = vmul.f32 1.0614054, %v2860_v29  ;;  %2062 = vmatprep.subr.bf16.mxu0 %v2061_v14  ;;  %v2095_v33 = vpack.c.bf16 %v1529_v1, %v1528_v2  ;;  %v2065_v32 = vpack.c.bf16 %v1515_v60, %v1514_v13  ;;  %v1531_v12 = vld [vmem:[%s3702_s3 + $0x178] sm:$0xff] }
 0x184   : > { %v776_v38 = vmul.f32 %v2221_v25, %v3216_v23  ;;  %v2067_v19 = vpack.c.bf16 %v1499_v47, %v1498_v56  ;;  %v3344_v49 = vpop.eup %2222  ;;  %2234 = vpow2.f32 %v1258_v52  ;;  %2092 = vmatpush3.bf16.msra.mxu1 %v2091_v35  ;;  %v847_v43 = vmul.f32 1.0614054, %v2878_v4 }
 0x185   : > { %v877_v42 = vadd.f32 -1.4531521, %v845_v59  ;;  %v849_v23 = vmul.f32 1.0614054, %v2922_v8  ;;  %2094 = vmatprep.subr.bf16.mxu1 %v2093_v7  ;;  %v2097_v9 = vpack.c.bf16 %v1547_v44, %v1546_v26  ;;  %v851_v48 = vmul.f32 1.0614054, %v2924_v20 }
 0x186   : > { %v3348_v39 = vpop.eup %2224  ;;  %v808_v13 = vsub.f32 2.0, %v776_v38  ;;  %v848_v2 = vmul.f32 1.0614054, %v2891_v11  ;;  %2064 = vmatpush3.bf16.msra.mxu0 %v2063_v16  ;;  %v879_v35 = vadd.f32 -1.4531521, %v847_v43  ;;  %v2099_v56 = vpack.c.bf16 %v1531_v12, %v1530_v15  ;;  %v3863_v12 = vld [vmem:[#allocation23_spill] sm:$0xff] }
 0x187   : > { %v3354_v1 = vmul.f32 %v3348_v39, %v3234_v28  ;;  %v909_v55 = vmul.f32 %v877_v42, %v2860_v29  ;;  %v881_v14 = vadd.f32 -1.4531521, %v849_v23  ;;  %v3357_v60 = vpop.eup %2226  ;;  %2066 = vmatprep.subr.bf16.mxu0 %v2065_v32  ;;  %v883_v47 = vadd.f32 -1.4531521, %v851_v48 }
 0x188   : > { %3857 = vst [vmem:[#allocation84_spill] sm:$0xff] %v3357_v60  ;;  %v880_v52 = vadd.f32 -1.4531521, %v848_v2  ;;  %v850_v7 = vmul.f32 1.0614054, %v2905_v37  ;;  %v2229_v26 = vpop.eup %2228  ;;  %v3360_v44 = vmul.f32 %v2221_v25, %v808_v13  ;;  %2096 = vmatpush3.bf16.msra.mxu1 %v2095_v33  ;;  %v911_v28 = vmul.f32 %v879_v35, %v2878_v4 }
 0x189   : > { %v941_v59 = vadd.f32 1.4214138, %v909_v55  ;;  %v913_v16 = vmul.f32 %v881_v14, %v2922_v8  ;;  %v777_v38 = vmul.f32 %v2229_v26, %v3266_v3  ;;  %2098 = vmatprep.subr.bf16.mxu1 %v2097_v9  ;;  %v915_v42 = vmul.f32 %v883_v47, %v2924_v20 }
 0x18a   : > { %v912_v32 = vmul.f32 %v880_v52, %v2891_v11  ;;  %v882_v15 = vadd.f32 -1.4531521, %v850_v7  ;;  %2068 = vmatpush3.bf16.msra.mxu0 %v2067_v19  ;;  %v943_v43 = vadd.f32 1.4214138, %v911_v28  ;;  %2236 = vpow2.f32 %v3311_v54 }
 0x18b   : > { %v973_v25 = vmul.f32 %v941_v59, %v2860_v29  ;;  %v945_v33 = vadd.f32 1.4214138, %v913_v16  ;;  %v2231_v23 = vpop.eup %2230  ;;  %v809_v13 = vsub.f32 2.0, %v777_v38  ;;  %v947_v48 = vadd.f32 1.4214138, %v915_v42 }
 0x18c   : > { %v944_v2 = vadd.f32 1.4214138, %v912_v32  ;;  %v914_v55 = vmul.f32 %v882_v15, %v2905_v37  ;;  %v3370_v3 = vpop.eup %2232  ;;  %v779_v9 = vmul.f32 %v2231_v23, %v3287_v34  ;;  %2100 = vmatpush3.bf16.msra.mxu1 %v2099_v56  ;;  %v975_v14 = vmul.f32 %v943_v43, %v2878_v4 }
 0x18d   : > { %v1005_v35 = vadd.f32 -0.28449672, %v973_v25  ;;  %v977_v19 = vmul.f32 %v945_v33, %v2922_v8  ;;  %v3375_v47 = vmul.f32 %v2229_v26, %v809_v13  ;;  %v979_v52 = vmul.f32 %v947_v48, %v2924_v20  ;;  %v3858_v48 = vld [vmem:[#allocation2_spill] sm:$0xff] }
 0x18e   : > { %v976_v7 = vmul.f32 %v944_v2, %v2891_v11  ;;  %v946_v59 = vadd.f32 1.4214138, %v914_v55  ;;  %v3379_v28 = vpop.eup %2234  ;;  %v811_v16 = vsub.f32 2.0, %v779_v9  ;;  %v1007_v42 = vadd.f32 -0.28449672, %v975_v14 }
 0x18f   : > { %v1037_v38 = vmul.f32 %v1005_v35, %v2860_v29  ;;  %v1009_v34 = vadd.f32 -0.28449672, %v977_v19  ;;  %v1011_v56 = vadd.f32 -0.28449672, %v979_v52  ;;  %v853_v25 = vmul.f32 1.0614054, %v3035_v51 }
 0x190   : > { %v1008_v32 = vadd.f32 -0.28449672, %v976_v7  ;;  %v978_v15 = vmul.f32 %v946_v59, %v2905_v37  ;;  %v3384_v26 = vmul.f32 %v2231_v23, %v811_v16  ;;  %v1039_v33 = vmul.f32 %v1007_v42, %v2878_v4  ;;  %v3859_v7 = vld [vmem:[#allocation3_spill] sm:$0xff]  ;;  %v3860_v59 = vld [vmem:[#allocation6_spill] sm:$0xff] }
 0x191   : > { %v1069_v43 = vadd.f32 0.2548296, %v1037_v38  ;;  %v1041_v13 = vmul.f32 %v1009_v34, %v2922_v8  ;;  %vm1325_vm2 = vcmp.ge.f32.partialorder %v3858_v48, 0.0  ;;  %v1043_v2 = vmul.f32 %v1011_v56, %v2924_v20  ;;  %v3861_v56 = vld [vmem:[#allocation7_spill] sm:$0xff] }
 0x192   : > { %v1040_v55 = vmul.f32 %v1008_v32, %v2891_v11  ;;  %v1010_v9 = vadd.f32 -0.28449672, %v978_v15  ;;  %v885_v35 = vadd.f32 -1.4531521, %v853_v25  ;;  %v1071_v19 = vadd.f32 0.2548296, %v1039_v33 }
 0x193   : > { %v1101_v14 = vmul.f32 %v1069_v43, %v2860_v29  ;;  %v1073_v52 = vadd.f32 0.2548296, %v1041_v13  ;;  %v855_v23 = vmul.f32 1.0614054, %v3037_v27  ;;  %vm1327_vm3 = vcmp.ge.f32.partialorder %v3859_v7, 0.0  ;;  %v3862_v43 = vld [vmem:[#allocation4_spill] sm:$0xff] }
 0x194   : > { %vm1329_vm4 = vcmp.ge.f32.partialorder %v3860_v59, 0.0  ;;  %v1075_v16 = vadd.f32 0.2548296, %v1043_v2  ;;  %v1072_v38 = vadd.f32 0.2548296, %v1040_v55  ;;  %v1042_v42 = vmul.f32 %v1010_v9, %v2905_v37  ;;  %v3868_v59 = vld [vmem:[#allocation9_spill] sm:$0xff] }
 0x195   : > { %v917_v34 = vmul.f32 %v885_v35, %v3035_v51  ;;  %vm1331_vm5 = vcmp.ge.f32.partialorder %v3861_v56, 0.0  ;;  %v1261_v32 = vmul.f32 %v2858_v0, %v1101_v14  ;;  %v1103_v29 = vmul.f32 %v1071_v19, %v2878_v4  ;;  %v3864_v14 = vld [vmem:[#allocation5_spill] sm:$0xff]  ;;  %v3870_v56 = vld [vmem:[#allocation18_spill] sm:$0xff] }
 0x196   : > { %v1105_v15 = vmul.f32 %v1073_v52, %v2922_v8  ;;  %v887_v25 = vadd.f32 -1.4531521, %v855_v23  ;;  %vm1328_vm6 = vcmp.ge.f32.partialorder %v3862_v43, 0.0  ;;  %v1107_v33 = vmul.f32 %v1075_v16, %v2924_v20  ;;  %v3865_v8 = vld [vmem:[#allocation24_spill] sm:$0xff] }
 0x197   : > { %v1104_v13 = vmul.f32 %v1072_v38, %v2891_v11  ;;  %v1074_v2 = vadd.f32 0.2548296, %v1042_v42  ;;  %v949_v55 = vadd.f32 1.4214138, %v917_v34  ;;  %v1293_v9 = vsub.f32 1.0, %v1261_v32 }
 0x198   : > { %v1263_v35 = vmul.f32 %v3863_v12, %v1103_v29  ;;  %v1265_v60 = vmul.f32 %v2899_v24, %v1105_v15  ;;  %v919_v0 = vmul.f32 %v887_v25, %v3037_v27  ;;  %vm1330_vm7 = vcmp.ge.f32.partialorder %v3864_v14, 0.0 }
 0x199   : > { %v1267_v4 = vmul.f32 %v2932_v18, %v1107_v33  ;;  %v1264_v19 = vmul.f32 %v3865_v8, %v1104_v13  ;;  %v1106_v52 = vmul.f32 %v1074_v2, %v2905_v37  ;;  %v981_v20 = vmul.f32 %v949_v55, %v3035_v51 }
 0x19a   : > { %v1357_v11 = vsub.f32 0.0, %v1293_v9  ;;  %v1295_v23 = vsub.f32 1.0, %v1263_v35  ;;  %v1297_v16 = vsub.f32 1.0, %v1265_v60  ;;  %v951_v38 = vadd.f32 1.4214138, %v919_v0  ;;  %v3866_v35 = vld [vmem:[#allocation8_spill] sm:$0xff] }
 0x19b   : > { %v1299_v42 = vsub.f32 1.0, %v1267_v4  ;;  %v1296_v12 = vsub.f32 1.0, %v1264_v19  ;;  %v1266_v24 = vmul.f32 %v2895_v61, %v1106_v52  ;;  %v1013_v34 = vadd.f32 -0.28449672, %v981_v20  ;;  %v3867_v20 = vld [vmem:[#allocation19_spill] sm:$0xff] }
 0x19c   : > { %v1389_v32 = vsel %vm1325_vm2, %v1293_v9, %v1357_v11  ;;  %v1359_v29 = vsub.f32 0.0, %v1295_v23  ;;  %v1361_v18 = vsub.f32 0.0, %v1297_v16  ;;  %v983_v15 = vmul.f32 %v951_v38, %v3037_v27 }
 0x19d   : > { %v1421_v25 = vadd.f32 1.0, %v1389_v32  ;;  %v1363_v37 = vsub.f32 0.0, %v1299_v42  ;;  %v1360_v33 = vsub.f32 0.0, %v1296_v12  ;;  %v1298_v13 = vsub.f32 1.0, %v1266_v24  ;;  %v3871_v32 = vld [vmem:[#allocation15_spill] sm:$0xff] }
 0x19e   : > { %v1391_v60 = vsel %vm1327_vm3, %v1295_v23, %v1359_v29  ;;  %v1393_v2 = vsel %vm1329_vm4, %v1297_v16, %v1361_v18  ;;  %v1045_v61 = vmul.f32 %v1013_v34, %v3035_v51  ;;  %v1015_v55 = vadd.f32 -0.28449672, %v983_v15  ;;  %v3869_v23 = vld [vmem:[#allocation17_spill] sm:$0xff] }
 0x19f   : > { %v1453_v48 = vmul.f32 %v1421_v25, %v3866_v35  ;;  %v1423_v9 = vadd.f32 1.0, %v1391_v60  ;;  %v1425_v0 = vadd.f32 1.0, %v1393_v2  ;;  %v1395_v4 = vsel %vm1331_vm5, %v1299_v42, %v1363_v37  ;;  %v3872_v37 = vld [vmem:[#allocation21_spill] sm:$0xff] }
 0x1a0   : > { %v1427_v8 = vadd.f32 1.0, %v1395_v4  ;;  %v1392_v19 = vsel %vm1328_vm6, %v1296_v12, %v1360_v33  ;;  %v1362_v52 = vsub.f32 0.0, %v1298_v13  ;;  %v1077_v7 = vadd.f32 0.2548296, %v1045_v61 }
 0x1a1   : > { %vm1333_vm8 = vcmp.ge.f32.partialorder %v3867_v20, 0.0  ;;  %1619 = vmatprep.mubr.f32.mxu0 %v1453_v48  ;;  %v1455_v11 = vmul.f32 %v1423_v9, %v3868_v59  ;;  %v1457_v16 = vmul.f32 %v1425_v0, %v3869_v23  ;;  %v1424_v38 = vadd.f32 1.0, %v1392_v19 }
 0x1a2   : > { %v1047_v24 = vmul.f32 %v1015_v55, %v3037_v27  ;;  %1620 = vmatmul.mubr.f32.vlgmr.msra.gmra.mrb[16].mxu0 %v2968_v10  ;;  %v1459_v42 = vmul.f32 %v1427_v8, %v3870_v56  ;;  %v1394_v43 = vsel %vm1330_vm7, %v1298_v13, %v1362_v52  ;;  %v1109_v12 = vmul.f32 %v1077_v7, %v3035_v51  ;;  %v3873_v13 = vld [vmem:[#allocation16_spill] sm:$0xff] }
 0x1a3   : > { %v852_v34 = vmul.f32 1.0614054, %v2962_v57  ;;  %1724 = vmatprep.mubr.f32.mxu1 %v1455_v11  ;;  %1624 = vmatprep.mubr.f32.mxu0 %v1457_v16  ;;  %v1456_v29 = vmul.f32 %v1424_v38, %v3871_v32  ;;  %v1426_v18 = vadd.f32 1.0, %v1394_v43  ;;  %v854_v25 = vmul.f32 1.0614054, %v2986_v21 }
 0x1a4   : > { %v1079_v15 = vadd.f32 0.2548296, %v1047_v24  ;;  %vm1335_vm9 = vcmp.ge.f32.partialorder %v3872_v37, 0.0  ;;  %1725 = vmatmul.mubr.f32.vlgmr.msra.gmra.mrb[16].mxu1 %v2979_v50  ;;  %v1269_v10 = vmul.f32 %v3012_v5, %v1109_v12  ;;  %v857_v33 = vmul.f32 1.0614054, %v3095_v31  ;;  %v3874_v5 = vld [vmem:[#allocation41_spill] sm:$0xff] }
 0x1a5   : > { %v884_v14 = vadd.f32 -1.4531521, %v852_v34  ;;  %v859_v51 = vmul.f32 1.0614054, %v3097_v17  ;;  %1729 = vmatprep.mubr.f32.mxu1 %v1459_v42  ;;  %v1458_v60 = vmul.f32 %v1426_v18, %v3873_v13  ;;  %v886_v61 = vadd.f32 -1.4531521, %v854_v25 }
 0x1a6   : > { %v1111_v2 = vmul.f32 %v1079_v15, %v3037_v27  ;;  %v856_v55 = vmul.f32 1.0614054, %v3045_v6  ;;  %1625 = vmatmul.mubr.f32.gmra.mrb[18].mxu0 %v1456_v29  ;;  %v1301_v35 = vsub.f32 1.0, %v1269_v10  ;;  %v889_v50 = vadd.f32 -1.4531521, %v857_v33 }
 0x1a7   : > { %v916_v48 = vmul.f32 %v884_v14, %v2962_v57  ;;  %v891_v9 = vadd.f32 -1.4531521, %v859_v51  ;;  %v918_v4 = vmul.f32 %v886_v61, %v2986_v21  ;;  %v858_v19 = vmul.f32 1.0614054, %v3087_v40  ;;  %v3875_v14 = vld [vmem:[#allocation27_spill] sm:$0xff] }
 0x1a8   : > { %v1271_v0 = vmul.f32 %v3874_v5, %v1111_v2  ;;  %v888_v8 = vadd.f32 -1.4531521, %v856_v55  ;;  %1730 = vmatmul.mubr.f32.gmra.mrb[18].mxu1 %v1458_v60  ;;  %v1365_v52 = vsub.f32 0.0, %v1301_v35  ;;  %v921_v27 = vmul.f32 %v889_v50, %v3095_v31  ;;  %v3876_v5 = vld [vmem:[#allocation31_spill] sm:$0xff] }
 0x1a9   : > { %v948_v7 = vadd.f32 1.4214138, %v916_v48  ;;  %v923_v59 = vmul.f32 %v891_v9, %v3097_v17  ;;  %v950_v23 = vadd.f32 1.4214138, %v918_v4  ;;  %v890_v38 = vadd.f32 -1.4531521, %v858_v19 }
 0x1aa   : > { %v1303_v11 = vsub.f32 1.0, %v1271_v0  ;;  %v920_v16 = vmul.f32 %v888_v8, %v3045_v6  ;;  %v1397_v24 = vsel %vm1333_vm8, %v1301_v35, %v1365_v52  ;;  %v953_v42 = vadd.f32 1.4214138, %v921_v27  ;;  %v3877_v19 = vld [vmem:[#allocation10_spill] sm:$0xff] }
 0x1ab   : > { %v980_v56 = vmul.f32 %v948_v7, %v2962_v57  ;;  %v955_v43 = vadd.f32 1.4214138, %v923_v59  ;;  %v1429_v12 = vadd.f32 1.0, %v1397_v24  ;;  %v982_v32 = vmul.f32 %v950_v23, %v2986_v21 }
 0x1ac   : > { %v1367_v34 = vsub.f32 0.0, %v1303_v11  ;;  %v952_v29 = vadd.f32 1.4214138, %v920_v16  ;;  %v985_v15 = vmul.f32 %v953_v42, %v3095_v31  ;;  %v922_v10 = vmul.f32 %v890_v38, %v3087_v40  ;;  %v3880_v42 = vld [vmem:[#allocation29_spill] sm:$0xff] }
 0x1ad   : > { %v1012_v18 = vadd.f32 -0.28449672, %v980_v56  ;;  %v987_v25 = vmul.f32 %v955_v43, %v3097_v17  ;;  %v1461_v33 = vmul.f32 %v1429_v12, %v3875_v14  ;;  %v1014_v51 = vadd.f32 -0.28449672, %v982_v32  ;;  %v3879_v56 = vld [vmem:[#allocation28_spill] sm:$0xff]  ;;  %v3883_v14 = vld [vmem:[#allocation37_spill] sm:$0xff] }
 0x1ae   : > { %v1399_v20 = vsel %vm1335_vm9, %v1303_v11, %v1367_v34  ;;  %v984_v13 = vmul.f32 %v952_v29, %v3045_v6  ;;  %v1017_v61 = vadd.f32 -0.28449672, %v985_v15  ;;  %v954_v50 = vadd.f32 1.4214138, %v922_v10  ;;  %v3878_v11 = vld [vmem:[#allocation14_spill] sm:$0xff] }
 0x1af   : > { %v1431_v60 = vadd.f32 1.0, %v1399_v20  ;;  %v1044_v2 = vmul.f32 %v1012_v18, %v2962_v57  ;;  %v1019_v55 = vadd.f32 -0.28449672, %v987_v25  ;;  %1629 = vmatprep.mubr.f32.mxu0 %v1461_v33  ;;  %v1046_v35 = vmul.f32 %v1014_v51, %v2986_v21  ;;  %v3881_v29 = vld [vmem:[#allocation22_spill] sm:$0xff]  ;;  %v3882_v18 = vld [vmem:[#allocation33_spill] sm:$0xff] }
 0x1b0   : > { %v1016_v48 = vadd.f32 -0.28449672, %v984_v13  ;;  %v861_v9 = vmul.f32 1.0614054, %v3156_v53  ;;  %v1049_v37 = vmul.f32 %v1017_v61, %v3095_v31  ;;  %vm1332_vm10 = vcmp.ge.f32.partialorder %v3877_v19, 0.0 }
 0x1b1   : > { %v1463_v0 = vmul.f32 %v1431_v60, %v3876_v5  ;;  %v1076_v4 = vadd.f32 0.2548296, %v1044_v2  ;;  %v1051_v8 = vmul.f32 %v1019_v55, %v3097_v17  ;;  %v1078_v52 = vadd.f32 0.2548296, %v1046_v35  ;;  %v3884_v60 = vld [vmem:[#allocation53_spill] sm:$0xff] }
 0x1b2   : > { %v1048_v7 = vmul.f32 %v1016_v48, %v3045_v6  ;;  %v986_v27 = vmul.f32 %v954_v50, %v3087_v40  ;;  %v893_v59 = vadd.f32 -1.4531521, %v861_v9  ;;  %vm1334_vm11 = vcmp.ge.f32.partialorder %v3878_v11, 0.0  ;;  %v3885_v48 = vld [vmem:[#allocation47_spill] sm:$0xff] }
 0x1b3   : > { %1734 = vmatprep.mubr.f32.mxu1 %v1463_v0  ;;  %v1108_v23 = vmul.f32 %v1076_v4, %v2962_v57  ;;  %v1081_v16 = vadd.f32 0.2548296, %v1049_v37  ;;  %v1083_v38 = vadd.f32 0.2548296, %v1051_v8  ;;  %v863_v24 = vmul.f32 1.0614054, %v3164_v22 }
 0x1b4   : > { %vm1337_vm12 = vcmp.ge.f32.partialorder %v3879_v56, 0.0  ;;  %vm1339_vm13 = vcmp.ge.f32.partialorder %v3880_v42, 0.0  ;;  %v1110_v43 = vmul.f32 %v1078_v52, %v2986_v21  ;;  %v1080_v12 = vadd.f32 0.2548296, %v1048_v7  ;;  %v3886_v4 = vld [vmem:[#allocation26_spill] sm:$0xff] }
 0x1b5   : > { %v1018_v34 = vadd.f32 -0.28449672, %v986_v27  ;;  %v925_v32 = vmul.f32 %v893_v59, %v3156_v53  ;;  %vm1336_vm14 = vcmp.ge.f32.partialorder %v3881_v29, 0.0  ;;  %v1268_v15 = vmul.f32 %v3882_v18, %v1108_v23  ;;  %v3888_v18 = vld [vmem:[#allocation20_spill] sm:$0xff]  ;;  %v3891_v56 = vld [vmem:[#allocation38_spill] sm:$0xff] }
 0x1b6   : > { %v1113_v57 = vmul.f32 %v1081_v16, %v3095_v31  ;;  %v1115_v25 = vmul.f32 %v1083_v38, %v3097_v17  ;;  %v895_v10 = vadd.f32 -1.4531521, %v863_v24  ;;  %v1270_v33 = vmul.f32 %v3883_v14, %v1110_v43  ;;  %v3887_v43 = vld [vmem:[#allocation52_spill] sm:$0xff] }
 0x1b7   : > { %v1112_v20 = vmul.f32 %v1080_v12, %v3045_v6  ;;  %v1050_v51 = vmul.f32 %v1018_v34, %v3087_v40  ;;  %v957_v21 = vadd.f32 1.4214138, %v925_v32  ;;  %v1300_v13 = vsub.f32 1.0, %v1268_v15 }
 0x1b8   : > { %v1273_v2 = vmul.f32 %v3884_v60, %v1113_v57  ;;  %v1275_v61 = vmul.f32 %v3083_v58, %v1115_v25  ;;  %v927_v55 = vmul.f32 %v895_v10, %v3164_v22  ;;  %v1302_v35 = vsub.f32 1.0, %v1270_v33  ;;  %v3889_v10 = vld [vmem:[#allocation25_spill] sm:$0xff] }
 0x1b9   : > { %v1272_v31 = vmul.f32 %v3885_v48, %v1112_v20  ;;  %v1082_v50 = vadd.f32 0.2548296, %v1050_v51  ;;  %v989_v17 = vmul.f32 %v957_v21, %v3156_v53  ;;  %v1364_v9 = vsub.f32 0.0, %v1300_v13  ;;  %v3890_v21 = vld [vmem:[#allocation36_spill] sm:$0xff] }
 0x1ba   : > { %v1305_v5 = vsub.f32 1.0, %v1273_v2  ;;  %v1307_v0 = vsub.f32 1.0, %v1275_v61  ;;  %v959_v6 = vadd.f32 1.4214138, %v927_v55  ;;  %vm1338_vm15 = vcmp.ge.f32.partialorder %v3886_v4, 0.0  ;;  %v3893_v55 = vld [vmem:[#allocation32_spill] sm:$0xff] }
 0x1bb   : > { %v1366_v37 = vsub.f32 0.0, %v1302_v35  ;;  %v1304_v8 = vsub.f32 1.0, %v1272_v31  ;;  %v1114_v52 = vmul.f32 %v1082_v50, %v3087_v40  ;;  %v1021_v7 = vadd.f32 -0.28449672, %v989_v17  ;;  %v3899_v4 = vld [vmem:[#allocation34_spill] sm:$0xff] }
 0x1bc   : > { %v1396_v58 = vsel %vm1332_vm10, %v1300_v13, %v1364_v9  ;;  %v1369_v27 = vsub.f32 0.0, %v1305_v5  ;;  %v1371_v59 = vsub.f32 0.0, %v1307_v0  ;;  %v991_v23 = vmul.f32 %v959_v6, %v3164_v22  ;;  %v3892_v13 = vld [vmem:[#allocation42_spill] sm:$0xff]  ;;  %v3894_v9 = vld [vmem:[#allocation80_spill] sm:$0xff] }
 0x1bd   : > { %v1428_v16 = vadd.f32 1.0, %v1396_v58  ;;  %v1398_v38 = vsel %vm1334_vm11, %v1302_v35, %v1366_v37  ;;  %v1368_v24 = vsub.f32 0.0, %v1304_v8  ;;  %v1274_v12 = vmul.f32 %v3887_v43, %v1114_v52  ;;  %v3897_v58 = vld [vmem:[#allocation69_spill] sm:$0xff] }
 0x1be   : > { %v1430_v34 = vadd.f32 1.0, %v1398_v38  ;;  %v1401_v32 = vsel %vm1337_vm12, %v1305_v5, %v1369_v27  ;;  %v1403_v40 = vsel %vm1339_vm13, %v1307_v0, %v1371_v59  ;;  %v1053_v19 = vmul.f32 %v1021_v7, %v3156_v53  ;;  %v3895_v0 = vld [vmem:[#allocation81_spill] sm:$0xff]  ;;  %v3898_v38 = vld [vmem:[#allocation39_spill] sm:$0xff] }
 0x1bf   : > { %v1460_v15 = vmul.f32 %v1428_v16, %v3888_v18  ;;  %v1433_v57 = vadd.f32 1.0, %v1401_v32  ;;  %v1435_v25 = vadd.f32 1.0, %v1403_v40  ;;  %v1400_v11 = vsel %vm1336_vm14, %v1304_v8, %v1368_v24  ;;  %v3896_v8 = vld [vmem:[#allocation63_spill] sm:$0xff] }
 0x1c0   : > { %v1462_v14 = vmul.f32 %v1430_v34, %v3889_v10  ;;  %v1432_v33 = vadd.f32 1.0, %v1400_v11  ;;  %v1306_v20 = vsub.f32 1.0, %v1274_v12  ;;  %v1085_v51 = vadd.f32 0.2548296, %v1053_v19  ;;  %v3900_v10 = vld [vmem:[#allocation65_spill] sm:$0xff] }
 0x1c1   : > { %vm1341_vm0 = vcmp.ge.f32.partialorder %v3890_v21, 0.0  ;;  %1630 = vmatmul.mubr.f32.gmra.mrb[20].mxu0 %v1460_v15  ;;  %v1465_v42 = vmul.f32 %v1433_v57, %v3891_v56  ;;  %v1467_v60 = vmul.f32 %v1435_v25, %v3892_v13  ;;  %v1023_v2 = vadd.f32 -0.28449672, %v991_v23 }
 0x1c2   : > { %v860_v61 = vmul.f32 1.0614054, %v3114_v41  ;;  %1735 = vmatmul.mubr.f32.gmra.mrb[20].mxu1 %v1462_v14  ;;  %v1464_v35 = vmul.f32 %v1432_v33, %v3893_v55  ;;  %v1370_v29 = vsub.f32 0.0, %v1306_v20  ;;  %v1117_v48 = vmul.f32 %v1085_v51, %v3156_v53  ;;  %v3901_v51 = vld [vmem:[#allocation79_spill] sm:$0xff] }
 0x1c3   : > { %v862_v31 = vmul.f32 1.0614054, %v3143_v36  ;;  %1634 = vmatprep.mubr.f32.mxu0 %v1465_v42  ;;  %1739 = vmatprep.mubr.f32.mxu1 %v1467_v60  ;;  %v1055_v50 = vmul.f32 %v1023_v2, %v3164_v22  ;;  %v865_v5 = vmul.f32 1.0614054, %v3894_v9  ;;  %v867_v6 = vmul.f32 1.0614054, %v3895_v0 }
 0x1c4   : > { %v892_v17 = vadd.f32 -1.4531521, %v860_v61  ;;  %v1402_v37 = vsel %vm1338_vm15, %v1306_v20, %v1370_v29  ;;  %v1277_v52 = vmul.f32 %v3896_v8, %v1117_v48  ;;  %v864_v27 = vmul.f32 1.0614054, %v3897_v58 }
 0x1c5   : > { %v894_v7 = vadd.f32 -1.4531521, %v862_v31  ;;  %1635 = vmatmul.mubr.f32.gmra.mrb[22].mxu0 %v1464_v35  ;;  %v1434_v53 = vadd.f32 1.0, %v1402_v37  ;;  %v1087_v59 = vadd.f32 0.2548296, %v1055_v50  ;;  %vm1343_vm1 = vcmp.ge.f32.partialorder %v3898_v38, 0.0 }
 0x1c6   : > { %v924_v23 = vmul.f32 %v892_v17, %v3114_v41  ;;  %v897_v16 = vadd.f32 -1.4531521, %v865_v5  ;;  %v1309_v24 = vsub.f32 1.0, %v1277_v52  ;;  %v899_v12 = vadd.f32 -1.4531521, %v867_v6  ;;  %v3902_v17 = vld [vmem:[#allocation45_spill] sm:$0xff] }
 0x1c7   : > { %v926_v43 = vmul.f32 %v894_v7, %v3143_v36  ;;  %v896_v34 = vadd.f32 -1.4531521, %v864_v27  ;;  %v1466_v32 = vmul.f32 %v1434_v53, %v3899_v4  ;;  %v1119_v40 = vmul.f32 %v1087_v59, %v3164_v22 }
 0x1c8   : > { %v956_v19 = vadd.f32 1.4214138, %v924_v23  ;;  %v929_v18 = vmul.f32 %v897_v16, %v3894_v9  ;;  %v1373_v15 = vsub.f32 0.0, %v1309_v24  ;;  %v931_v25 = vmul.f32 %v899_v12, %v3895_v0 }
 0x1c9   : > { %v958_v57 = vadd.f32 1.4214138, %v926_v43  ;;  %v928_v11 = vmul.f32 %v896_v34, %v3897_v58  ;;  %1740 = vmatmul.mubr.f32.gmra.mrb[22].mxu1 %v1466_v32  ;;  %v1279_v14 = vmul.f32 %v3900_v10, %v1119_v40  ;;  %v866_v56 = vmul.f32 1.0614054, %v3901_v51  ;;  %v3904_v32 = vld [vmem:[#allocation35_spill] sm:$0xff] }
 0x1ca   : > { %v988_v33 = vmul.f32 %v956_v19, %v3114_v41  ;;  %v961_v20 = vadd.f32 1.4214138, %v929_v18  ;;  %v1405_v22 = vsel %vm1341_vm0, %v1309_v24, %v1373_v15  ;;  %v963_v13 = vadd.f32 1.4214138, %v931_v25  ;;  %v3903_v24 = vld [vmem:[#allocation30_spill] sm:$0xff] }
 0x1cb   : > { %v990_v42 = vmul.f32 %v958_v57, %v3143_v36  ;;  %v960_v60 = vadd.f32 1.4214138, %v928_v11  ;;  %v1437_v2 = vadd.f32 1.0, %v1405_v22  ;;  %v1311_v61 = vsub.f32 1.0, %v1279_v14  ;;  %v3905_v15 = vld [vmem:[#allocation50_spill] sm:$0xff] }
 0x1cc   : > { %v1020_v55 = vadd.f32 -0.28449672, %v988_v33  ;;  %v993_v35 = vmul.f32 %v961_v20, %v3894_v9  ;;  %v995_v48 = vmul.f32 %v963_v13, %v3895_v0  ;;  %v898_v50 = vadd.f32 -1.4531521, %v866_v56  ;;  %v3906_v57 = vld [vmem:[#allocation46_spill] sm:$0xff]  ;;  %v3907_v33 = vld [vmem:[#allocation40_spill] sm:$0xff] }
 0x1cd   : > { %v1022_v29 = vadd.f32 -0.28449672, %v990_v42  ;;  %v992_v31 = vmul.f32 %v960_v60, %v3897_v58  ;;  %v1469_v5 = vmul.f32 %v1437_v2, %v3902_v17  ;;  %v1375_v6 = vsub.f32 0.0, %v1311_v61  ;;  %v3908_v20 = vld [vmem:[#allocation51_spill] sm:$0xff]  ;;  %v3909_v56 = vld [vmem:[#allocation60_spill] sm:$0xff]  ;;  %v3910_v60 = vld [vmem:[#allocation62_spill] sm:$0xff] }
 0x1ce   : > { %v1052_v21 = vmul.f32 %v1020_v55, %v3114_v41  ;;  %v1025_v37 = vadd.f32 -0.28449672, %v993_v35  ;;  %v1027_v52 = vadd.f32 -0.28449672, %v995_v48  ;;  %v930_v27 = vmul.f32 %v898_v50, %v3901_v51 }
 0x1cf   : > { %v1054_v8 = vmul.f32 %v1022_v29, %v3143_v36  ;;  %v1024_v7 = vadd.f32 -0.28449672, %v992_v31  ;;  %1639 = vmatprep.mubr.f32.mxu0 %v1469_v5  ;;  %v1407_v53 = vsel %vm1343_vm1, %v1311_v61, %v1375_v6  ;;  %v869_v16 = vmul.f32 1.0614054, %v3325_v30  ;;  %v3911_v29 = vld [vmem:[#allocation76_spill] sm:$0xff]  ;;  %v3913_v6 = vld [vmem:[#allocation66_spill] sm:$0xff] }
 0x1d0   : > { %v1084_v59 = vadd.f32 0.2548296, %v1052_v21  ;;  %v1057_v23 = vmul.f32 %v1025_v37, %v3894_v9  ;;  %vm1340_vm2 = vcmp.ge.f32.partialorder %v3903_v24, 0.0  ;;  %v1439_v43 = vadd.f32 1.0, %v1407_v53 }
 0x1d1   : > { %v1086_v12 = vadd.f32 0.2548296, %v1054_v8  ;;  %v1059_v34 = vmul.f32 %v1027_v52, %v3895_v0  ;;  %v1056_v4 = vmul.f32 %v1024_v7, %v3897_v58  ;;  %vm1342_vm3 = vcmp.ge.f32.partialorder %v3904_v32, 0.0 }
 0x1d2   : > { %v1116_v40 = vmul.f32 %v1084_v59, %v3114_v41  ;;  %v1089_v19 = vadd.f32 0.2548296, %v1057_v23  ;;  %v962_v38 = vadd.f32 1.4214138, %v930_v27  ;;  %v901_v18 = vadd.f32 -1.4531521, %v869_v16 }
 0x1d3   : > { %vm1345_vm4 = vcmp.ge.f32.partialorder %v3905_v15, 0.0  ;;  %v1471_v25 = vmul.f32 %v1439_v43, %v3906_v57  ;;  %v1118_v11 = vmul.f32 %v1086_v12, %v3143_v36  ;;  %v1091_v10 = vadd.f32 0.2548296, %v1059_v34  ;;  %v3914_v34 = vld [vmem:[#allocation49_spill] sm:$0xff] }
 0x1d4   : > { %v1088_v14 = vadd.f32 0.2548296, %v1056_v4  ;;  %vm1344_vm5 = vcmp.ge.f32.partialorder %v3907_v33, 0.0  ;;  %vm1347_vm6 = vcmp.ge.f32.partialorder %v3908_v20, 0.0  ;;  %v1276_v22 = vmul.f32 %v3909_v56, %v1116_v40  ;;  %v3921_v20 = vld [vmem:[#allocation57_spill] sm:$0xff]  ;;  %v3922_v33 = vld [vmem:[#allocation48_spill] sm:$0xff] }
 0x1d5   : > { %v1121_v42 = vmul.f32 %v1089_v19, %v3894_v9  ;;  %v994_v41 = vmul.f32 %v962_v38, %v3901_v51  ;;  %v933_v13 = vmul.f32 %v901_v18, %v3325_v30  ;;  %1744 = vmatprep.mubr.f32.mxu1 %v1471_v25  ;;  %v1278_v2 = vmul.f32 %v3910_v60, %v1118_v11  ;;  %v3912_v9 = vld [vmem:[#allocation78_spill] sm:$0xff]  ;;  %v3915_v11 = vld [vmem:[#allocation43_spill] sm:$0xff]  ;;  %v3917_v60 = vld [vmem:[#allocation73_spill] sm:$0xff] }
 0x1d6   : > { %v1123_v61 = vmul.f32 %v1091_v10, %v3895_v0  ;;  %v1120_v36 = vmul.f32 %v1088_v14, %v3897_v58  ;;  %v871_v55 = vmul.f32 1.0614054, %v3328_v45  ;;  %v1308_v35 = vsub.f32 1.0, %v1276_v22  ;;  %v3916_v22 = vld [vmem:[#allocation44_spill] sm:$0xff] }
 0x1d7   : > { %v1281_v48 = vmul.f32 %v3911_v29, %v1121_v42  ;;  %v1026_v31 = vadd.f32 -0.28449672, %v994_v41  ;;  %v965_v50 = vadd.f32 1.4214138, %v933_v13  ;;  %v1310_v17 = vsub.f32 1.0, %v1278_v2  ;;  %v3918_v2 = vld [vmem:[#allocation55_spill] sm:$0xff] }
 0x1d8   : > { %v1283_v5 = vmul.f32 %v3912_v9, %v1123_v61  ;;  %v1280_v21 = vmul.f32 %v3913_v6, %v1120_v36  ;;  %v903_v37 = vadd.f32 -1.4531521, %v871_v55  ;;  %v1372_v8 = vsub.f32 0.0, %v1308_v35  ;;  %v3919_v55 = vld [vmem:[#allocation82_spill] sm:$0xff]  ;;  %v3920_v29 = vld [vmem:[#allocation61_spill] sm:$0xff] }
 0x1d9   : > { %v1313_v52 = vsub.f32 1.0, %v1281_v48  ;;  %v1058_v7 = vmul.f32 %v1026_v31, %v3901_v51  ;;  %v997_v0 = vmul.f32 %v965_v50, %v3325_v30  ;;  %v1374_v58 = vsub.f32 0.0, %v1310_v17 }
 0x1da   : > { %v1315_v27 = vsub.f32 1.0, %v1283_v5  ;;  %v1312_v53 = vsub.f32 1.0, %v1280_v21  ;;  %v935_v59 = vmul.f32 %v903_v37, %v3328_v45  ;;  %v1404_v23 = vsel %vm1340_vm2, %v1308_v35, %v1372_v8 }
 0x1db   : > { %v1377_v16 = vsub.f32 0.0, %v1313_v52  ;;  %v1090_v43 = vadd.f32 0.2548296, %v1058_v7  ;;  %v1029_v12 = vadd.f32 -0.28449672, %v997_v0  ;;  %vm1346_vm7 = vcmp.ge.f32.partialorder %v3914_v34, 0.0 }
 0x1dc   : > { %v1436_v4 = vadd.f32 1.0, %v1404_v23  ;;  %v1406_v40 = vsel %vm1342_vm3, %v1310_v17, %v1374_v58  ;;  %v1379_v19 = vsub.f32 0.0, %v1315_v27  ;;  %v1376_v38 = vsub.f32 0.0, %v1312_v53 }
 0x1dd   : > { %v1438_v18 = vadd.f32 1.0, %v1406_v40  ;;  %v1409_v57 = vsel %vm1345_vm4, %v1313_v52, %v1377_v16  ;;  %v1122_v25 = vmul.f32 %v1090_v43, %v3901_v51  ;;  %v1061_v24 = vmul.f32 %v1029_v12, %v3325_v30 }
 0x1de   : > { %v1468_v10 = vmul.f32 %v1436_v4, %v3915_v11  ;;  %v1441_v14 = vadd.f32 1.0, %v1409_v57  ;;  %v1411_v56 = vsel %vm1347_vm6, %v1315_v27, %v1379_v19  ;;  %v1408_v32 = vsel %vm1344_vm5, %v1312_v53, %v1376_v38 }
 0x1df   : > { %v1470_v42 = vmul.f32 %v1438_v18, %v3916_v22  ;;  %v1443_v41 = vadd.f32 1.0, %v1411_v56  ;;  %v1440_v13 = vadd.f32 1.0, %v1408_v32  ;;  %v1282_v15 = vmul.f32 %v3917_v60, %v1122_v25  ;;  %v3924_v18 = vld [vmem:[#allocation54_spill] sm:$0xff] }
 0x1e0   : > { %1640 = vmatmul.mubr.f32.gmra.mrb[24].mxu0 %v1468_v10  ;;  %v1473_v51 = vmul.f32 %v1441_v14, %v3918_v2  ;;  %v1093_v61 = vadd.f32 0.2548296, %v1061_v24  ;;  %v967_v36 = vadd.f32 1.4214138, %v935_v59  ;;  %v868_v35 = vmul.f32 1.0614054, %v3919_v55 }
 0x1e1   : > { %vm1349_vm8 = vcmp.ge.f32.partialorder %v3920_v29, 0.0  ;;  %1745 = vmatmul.mubr.f32.gmra.mrb[24].mxu1 %v1470_v42  ;;  %v1475_v48 = vmul.f32 %v1443_v41, %v3921_v20  ;;  %v1472_v31 = vmul.f32 %v1440_v13, %v3922_v33  ;;  %v1314_v50 = vsub.f32 1.0, %v1282_v15  ;;  %v3925_v20 = vld [vmem:[#allocation70_spill] sm:$0xff] }
 0x1e2   : > { %v870_v17 = vmul.f32 1.0614054, %v3300_v46  ;;  %1644 = vmatprep.mubr.f32.mxu0 %v1473_v51  ;;  %v1125_v9 = vmul.f32 %v1093_v61, %v3325_v30  ;;  %v999_v5 = vmul.f32 %v967_v36, %v3328_v45  ;;  %v900_v6 = vadd.f32 -1.4531521, %v868_v35 }
 0x1e3   : > { %v873_v21 = vmul.f32 1.0614054, %v3375_v47  ;;  %v3923_v37 = vsub.f32 2.0, %v3354_v1  ;;  %1749 = vmatprep.mubr.f32.mxu1 %v1475_v48  ;;  %v1378_v52 = vsub.f32 0.0, %v1314_v50  ;;  %v875_v0 = vmul.f32 1.0614054, %v3384_v26 }
 0x1e4   : > { %v902_v7 = vadd.f32 -1.4531521, %v870_v17  ;;  %1645 = vmatmul.mubr.f32.gmra.mrb[26].mxu0 %v1472_v31  ;;  %v1285_v58 = vmul.f32 %v3322_v62, %v1125_v9  ;;  %v1031_v27 = vadd.f32 -0.28449672, %v999_v5  ;;  %v932_v30 = vmul.f32 %v900_v6, %v3919_v55  ;;  %v3926_v5 = vld [vmem:[#allocation56_spill] sm:$0xff] }
 0x1e5   : > { %v3600_v8 = vmul.f32 %v3348_v39, %v3923_v37  ;;  %v905_v53 = vadd.f32 -1.4531521, %v873_v21  ;;  %v1410_v59 = vsel %vm1346_vm7, %v1314_v50, %v1378_v52  ;;  %v907_v23 = vadd.f32 -1.4531521, %v875_v0  ;;  %v3927_v6 = vld [vmem:[#allocation64_spill] sm:$0xff] }
 0x1e6   : > { %v934_v1 = vmul.f32 %v902_v7, %v3300_v46  ;;  %v872_v39 = vmul.f32 1.0614054, %v3360_v44  ;;  %v1442_v16 = vadd.f32 1.0, %v1410_v59  ;;  %v1317_v43 = vsub.f32 1.0, %v1285_v58 }
 0x1e7   : > { %v1063_v12 = vmul.f32 %v1031_v27, %v3328_v45  ;;  %v964_v4 = vadd.f32 1.4214138, %v932_v30  ;;  %v937_v62 = vmul.f32 %v905_v53, %v3375_v47  ;;  %v939_v19 = vmul.f32 %v907_v23, %v3384_v26 }
 0x1e8   : > { %v966_v40 = vadd.f32 1.4214138, %v934_v1  ;;  %v904_v38 = vadd.f32 -1.4531521, %v872_v39  ;;  %v1474_v57 = vmul.f32 %v1442_v16, %v3924_v18  ;;  %v1381_v34 = vsub.f32 0.0, %v1317_v43  ;;  %v3928_v1 = vld [vmem:[#allocation83_spill] sm:$0xff] }
 0x1e9   : > { %v1095_v25 = vadd.f32 0.2548296, %v1063_v12  ;;  %v996_v24 = vmul.f32 %v964_v4, %v3919_v55  ;;  %v969_v10 = vadd.f32 1.4214138, %v937_v62  ;;  %v971_v14 = vadd.f32 1.4214138, %v939_v19 }
 0x1ea   : > { %v998_v11 = vmul.f32 %v966_v40, %v3300_v46  ;;  %v936_v56 = vmul.f32 %v904_v38, %v3360_v44  ;;  %1750 = vmatmul.mubr.f32.gmra.mrb[26].mxu1 %v1474_v57  ;;  %v1413_v32 = vsel %vm1349_vm8, %v1317_v43, %v1381_v34  ;;  %v874_v41 = vmul.f32 1.0614054, %v3600_v8  ;;  %v3929_v40 = vld [vmem:[#allocation58_spill] sm:$0xff]  ;;  %v3930_v38 = vld [vmem:[#allocation71_spill] sm:$0xff] }
 0x1eb   : > { %v1127_v22 = vmul.f32 %v1095_v25, %v3328_v45  ;;  %v1028_v42 = vadd.f32 -0.28449672, %v996_v24  ;;  %v1445_v13 = vadd.f32 1.0, %v1413_v32  ;;  %v1001_v15 = vmul.f32 %v969_v10, %v3375_v47  ;;  %v3931_v24 = vld [vmem:[#allocation59_spill] sm:$0xff] }
 0x1ec   : > { %v1030_v60 = vadd.f32 -0.28449672, %v998_v11  ;;  %v1003_v2 = vmul.f32 %v971_v14, %v3384_v26  ;;  %v968_v36 = vadd.f32 1.4214138, %v936_v56  ;;  %v906_v35 = vadd.f32 -1.4531521, %v874_v41 }
 0x1ed   : > { %v1287_v51 = vmul.f32 %v3344_v49, %v1127_v22  ;;  %v1060_v61 = vmul.f32 %v1028_v42, %v3919_v55  ;;  %v1477_v29 = vmul.f32 %v1445_v13, %v3925_v20  ;;  %v1033_v45 = vadd.f32 -0.28449672, %v1001_v15  ;;  %v3933_v22 = vld [vmem:[#allocation75_spill] sm:$0xff]  ;;  %v3934_v42 = vld [vmem:[#allocation84_spill] sm:$0xff]  ;;  %v3936_v20 = vld [vmem:[#allocation13_spill] sm:$0xff] }
 0x1ee   : > { %v1062_v48 = vmul.f32 %v1030_v60, %v3300_v46  ;;  %v1035_v33 = vadd.f32 -0.28449672, %v1003_v2  ;;  %v1000_v17 = vmul.f32 %v968_v36, %v3360_v44  ;;  %v938_v9 = vmul.f32 %v906_v35, %v3600_v8  ;;  %v3935_v2 = vld [vmem:[#allocation77_spill] sm:$0xff]  ;;  %v2237_v35 = vpop.eup %2236 }
 0x1ef   : > { %v1319_v31 = vsub.f32 1.0, %v1287_v51  ;;  %v1092_v50 = vadd.f32 0.2548296, %v1060_v61  ;;  %vm1348_vm9 = vcmp.ge.f32.partialorder %v3926_v5, 0.0  ;;  %vm1351_vm10 = vcmp.ge.f32.partialorder %v3927_v6, 0.0  ;;  %1649 = vmatprep.mubr.f32.mxu0 %v1477_v29  ;;  %v3938_v6 = vld [vmem:[#allocation72_spill] sm:$0xff] }
 0x1f0   : > { %v1094_v49 = vadd.f32 0.2548296, %v1062_v48  ;;  %v1065_v21 = vmul.f32 %v1033_v45, %v3375_v47  ;;  %v1067_v37 = vmul.f32 %v1035_v33, %v3384_v26  ;;  %v1032_v0 = vadd.f32 -0.28449672, %v1000_v17  ;;  %v3937_v48 = vld [vmem:[#allocation68_spill] sm:$0xff] }
 0x1f1   : > { %v1383_v52 = vsub.f32 0.0, %v1319_v31  ;;  %v1124_v7 = vmul.f32 %v1092_v50, %v3919_v55  ;;  %v970_v58 = vadd.f32 1.4214138, %v938_v9  ;;  %v582_v54 = vmul.f32 0.5, %v3929_v40 }
 0x1f2   : > { %v1126_v27 = vmul.f32 %v1094_v49, %v3300_v46  ;;  %v1097_v30 = vadd.f32 0.2548296, %v1065_v21  ;;  %v1099_v53 = vadd.f32 0.2548296, %v1067_v37  ;;  %v1064_v39 = vmul.f32 %v1032_v0, %v3360_v44 }
 0x1f3   : > { %v1415_v59 = vsel %vm1351_vm10, %v1319_v31, %v1383_v52  ;;  %v1284_v23 = vmul.f32 %v3928_v1, %v1124_v7  ;;  %v1002_v16 = vmul.f32 %v970_v58, %v3600_v8  ;;  %vm1350_vm11 = vcmp.ge.f32.partialorder %v3931_v24, 0.0  ;;  %v3941_v1 = vld [vmem:[#allocation11_spill] sm:$0xff] }
 0x1f4   : > { %v1447_v43 = vadd.f32 1.0, %v1415_v59  ;;  %v1286_v12 = vmul.f32 %v3298_v63, %v1126_v27  ;;  %v1129_v55 = vmul.f32 %v1097_v30, %v3375_v47  ;;  %v1131_v4 = vmul.f32 %v1099_v53, %v3384_v26  ;;  %v3932_v26 = vld [vmem:[#allocation12_spill] sm:$0xff]  ;;  %v3940_v53 = vld [vmem:[#allocation74_spill] sm:$0xff] }
 0x1f5   : > { %v1316_v62 = vsub.f32 1.0, %v1284_v23  ;;  %v1096_v46 = vadd.f32 0.2548296, %v1064_v39  ;;  %v1034_v19 = vadd.f32 -0.28449672, %v1002_v16  ;;  %v585_v10 = vmul.f32 0.5, %v3932_v26 }
 0x1f6   : > { %v1479_v18 = vmul.f32 %v1447_v43, %v3930_v38  ;;  %v1318_v57 = vsub.f32 1.0, %v1286_v12  ;;  %v1289_v34 = vmul.f32 %v3370_v3, %v1129_v55  ;;  %v1291_v25 = vmul.f32 %v3379_v28, %v1131_v4  ;;  %v3664_v12 = vld [vmem:[%s3703_s4] ss:$0 sm:$0xff] }
 0x1f7   : > { %v1380_v11 = vsub.f32 0.0, %v1316_v62  ;;  %v1128_v63 = vmul.f32 %v1096_v46, %v3360_v44  ;;  %v1066_v47 = vmul.f32 %v1034_v19, %v3600_v8  ;;  %vm1353_vm12 = vcmp.ge.f32.partialorder %v3933_v22, 0.0 }
 0x1f8   : > { %1754 = vmatprep.mubr.f32.mxu1 %v1479_v18  ;;  %v1382_v14 = vsub.f32 0.0, %v1318_v57  ;;  %v1321_v56 = vsub.f32 1.0, %v1289_v34  ;;  %v1323_v32 = vsub.f32 1.0, %v1291_v25  ;;  %vm1355_vm13 = vcmp.ge.f32.partialorder %v3935_v2, 0.0 }
 0x1f9   : > { %v1412_v3 = vsel %vm1348_vm9, %v1316_v62, %v1380_v11  ;;  %v1288_v28 = vmul.f32 %v3934_v42, %v1128_v63  ;;  %v1098_v41 = vadd.f32 0.2548296, %v1066_v47  ;;  %v587_v29 = vmul.f32 0.5, %v3936_v20 }
 0x1fa   : > { %v1444_v13 = vadd.f32 1.0, %v1412_v3  ;;  %v1414_v60 = vsel %vm1350_vm11, %v1318_v57, %v1382_v14  ;;  %v1385_v15 = vsub.f32 0.0, %v1321_v56  ;;  %v1387_v44 = vsub.f32 0.0, %v1323_v32 }
 0x1fb   : > { %v1446_v51 = vadd.f32 1.0, %v1414_v60  ;;  %v1320_v61 = vsub.f32 1.0, %v1288_v28  ;;  %v1130_v36 = vmul.f32 %v1098_v41, %v3600_v8  ;;  %vm1352_vm14 = vcmp.ge.f32.partialorder %v3938_v6, 0.0  ;;  %v3939_v8 = vld [vmem:[#allocation67_spill] sm:$0xff] }
 0x1fc   : > { %v1476_v45 = vmul.f32 %v1444_v13, %v3937_v48  ;;  %v1417_v33 = vsel %vm1353_vm12, %v1321_v56, %v1385_v15  ;;  %v1419_v31 = vsel %vm1355_vm13, %v1323_v32, %v1387_v44  ;;  %v584_v7 = vmul.f32 0.5, %v3939_v8 }
 0x1fd   : > { %v1478_v50 = vmul.f32 %v1446_v51, %v582_v54  ;;  %v1449_v17 = vadd.f32 1.0, %v1417_v33  ;;  %v1451_v9 = vadd.f32 1.0, %v1419_v31  ;;  %v1384_v5 = vsub.f32 0.0, %v1320_v61 }
 0x1fe   : > { %1650 = vmatmul.mubr.f32.gmra.mrb[28].mxu0 %v1476_v45  ;;  %v1290_v49 = vmul.f32 %v2237_v35, %v1130_v36  ;;  %vm1354_vm15 = vcmp.ge.f32.partialorder %v3940_v53, 0.0  ;;  %v586_v23 = vmul.f32 0.5, %v3941_v1  ;;  %vm1765_vm0 = vcmask 31744  }
 0x1ff   : > { %1755 = vmatmul.mubr.f32.gmra.mrb[28].mxu1 %v1478_v50  ;;  %v1481_v21 = vmul.f32 %v1449_v17, %v585_v10  ;;  %v1483_v37 = vmul.f32 %v1451_v9, %v587_v29  ;;  %v1416_v52 = vsel %vm1352_vm14, %v1320_v61, %v1384_v5 }
 0x200   : > { %v1448_v0 = vadd.f32 1.0, %v1416_v52  ;;  %v1322_v58 = vsub.f32 1.0, %v1290_v49 }
 0x201   : > { %1654 = vmatprep.mubr.f32.mxu0 %v1481_v21  ;;  %1759 = vmatprep.mubr.f32.mxu1 %v1483_v37 }
 0x202   : > { %v1480_v27 = vmul.f32 %v1448_v0, %v584_v7  ;;  %v1386_v30 = vsub.f32 0.0, %v1322_v58 }
 0x204   : > { %1655 = vmatmul.mubr.f32.gmra.mrb[30].mxu0 %v1480_v27  ;;  %v1418_v59 = vsel %vm1354_vm15, %v1322_v58, %v1386_v30 }
 0x205   : > { %v1450_v39 = vadd.f32 1.0, %v1418_v59 }
 0x207   : > { %v1482_v16 = vmul.f32 %v1450_v39, %v586_v23 }
 0x209   : > { %1760 = vmatmul.mubr.f32.gmra.mrb[30].mxu1 %v1482_v16 }
 0x275   : > { %v1893_v43 = vpop.f32.mrb[16].mxu0 }
 0x276   : > { %v1894_v55 = vpop.f32.mrb[17].mxu0 }
 0x277   : > { %v1949_v4 = vpop.f32.mrb[16].mxu1  ;;  %v1895_v40 = vadd.f32 %v1894_v55, %v1893_v43 }
 0x278   : > { %v1950_v54 = vpop.f32.mrb[17].mxu1 }
 0x279   : > { %v1622_v62 = vadd.f32 %v1895_v40, %v3664_v12  ;;  %v1951_v46 = vadd.f32 %v1950_v54, %v1949_v4  ;;  %v1896_v19 = vpop.f32.mrb[18].mxu0 }
 0x27a   : > { %v1897_v38 = vpop.f32.mrb[19].mxu0 }
 0x27b   : > { %v1727_v18 = vadd.f32 %v1951_v46, %v1622_v62  ;;  %v1952_v57 = vpop.f32.mrb[18].mxu1  ;;  %v1898_v34 = vadd.f32 %v1897_v38, %v1896_v19 }
 0x27c   : > { %v1953_v25 = vpop.f32.mrb[19].mxu1 }
 0x27d   : > { %1766 = vst.msk [vmem:[%s3671_s9] sm:$0xff] %vm1765_vm0, %v1727_v18  ;;  %v1627_v24 = vadd.f32 %v1898_v34, %v3664_v12  ;;  %v1954_v11 = vadd.f32 %v1953_v25, %v1952_v57 }
 0x27f   : > { %v1732_v63 = vadd.f32 %v1954_v11, %v1627_v24 }
 0x281   : > { %1767 = vst.msk [vmem:[%s3671_s9 + $0x8] sm:$0xff] %vm1765_vm0, %v1732_v63 }
 0x294   : > { %v1899_v47 = vpop.f32.mrb[20].mxu0 }
 0x295   : > { %v1955_v26 = vpop.f32.mrb[20].mxu1  ;;  %v1900_v10 = vpop.f32.mrb[21].mxu0 }
 0x296   : > { %v1901_v14 = vadd.f32 %v1900_v10, %v1899_v47  ;;  %v1956_v56 = vpop.f32.mrb[21].mxu1 }
 0x297   : > { %v1957_v32 = vadd.f32 %v1956_v56, %v1955_v26 }
 0x298   : > { %v1632_v22 = vadd.f32 %v1901_v14, %v3664_v12  ;;  %v1902_v3 = vpop.f32.mrb[22].mxu0 }
 0x299   : > { %v1903_v42 = vpop.f32.mrb[23].mxu0 }
 0x29a   : > { %v1737_v28 = vadd.f32 %v1957_v32, %v1632_v22  ;;  %v1904_v41 = vadd.f32 %v1903_v42, %v1902_v3 }
 0x29c   : > { %1768 = vst.msk [vmem:[%s3671_s9 + $0x10] sm:$0xff] %vm1765_vm0, %v1737_v28  ;;  %v1958_v13 = vpop.f32.mrb[22].mxu1  ;;  %v1637_v60 = vadd.f32 %v1904_v41, %v3664_v12 }
 0x29d   : > { %v1959_v15 = vpop.f32.mrb[23].mxu1 }
 0x29e   : > { %v1960_v44 = vadd.f32 %v1959_v15, %v1958_v13 }
 0x2a0   : > { %v1742_v2 = vadd.f32 %v1960_v44, %v1637_v60 }
 0x2a2   : > { %1769 = vst.msk [vmem:[%s3671_s9 + $0x18] sm:$0xff] %vm1765_vm0, %v1742_v2 }
 0x2b3   : > { %v1905_v51 = vpop.f32.mrb[24].mxu0 }
 0x2b4   : > { %v1961_v61 = vpop.f32.mrb[24].mxu1  ;;  %v1906_v36 = vpop.f32.mrb[25].mxu0 }
 0x2b5   : > { %v1907_v35 = vadd.f32 %v1906_v36, %v1905_v51  ;;  %v1962_v20 = vpop.f32.mrb[25].mxu1 }
 0x2b6   : > { %v1963_v29 = vadd.f32 %v1962_v20, %v1961_v61 }
 0x2b7   : > { %v1642_v48 = vadd.f32 %v1907_v35, %v3664_v12  ;;  %v1908_v45 = vpop.f32.mrb[26].mxu0 }
 0x2b8   : > { %v1909_v33 = vpop.f32.mrb[27].mxu0 }
 0x2b9   : > { %v1747_v31 = vadd.f32 %v1963_v29, %v1642_v48  ;;  %v1910_v50 = vadd.f32 %v1909_v33, %v1908_v45 }
 0x2bb   : > { %1770 = vst.msk [vmem:[%s3671_s9 + $0x20] sm:$0xff] %vm1765_vm0, %v1747_v31  ;;  %v1647_v9 = vadd.f32 %v1910_v50, %v3664_v12 }
 0x2bd   : > { %v1964_v17 = vpop.f32.mrb[26].mxu1 }
 0x2be   : > { %v1965_v5 = vpop.f32.mrb[27].mxu1 }
 0x2bf   : > { %v1966_v6 = vadd.f32 %v1965_v5, %v1964_v17 }
 0x2c1   : > { %v1752_v49 = vadd.f32 %v1966_v6, %v1647_v9 }
 0x2c3   : > { %1771 = vst.msk [vmem:[%s3671_s9 + $0x28] sm:$0xff] %vm1765_vm0, %v1752_v49 }
 0x2d1   : > { %v1911_v21 = vpop.f32.mrb[28].mxu0 }
 0x2d2   : > { %v1967_v37 = vpop.f32.mrb[28].mxu1  ;;  %v1912_v52 = vpop.f32.mrb[29].mxu0 }
 0x2d3   : > { %v1913_v8 = vadd.f32 %v1912_v52, %v1911_v21  ;;  %v1968_v7 = vpop.f32.mrb[29].mxu1 }
 0x2d4   : > { %v1969_v0 = vadd.f32 %v1968_v7, %v1967_v37 }
 0x2d5   : > { %v1652_v58 = vadd.f32 %v1913_v8, %v3664_v12 }
 0x2d7   : > { %v1757_v27 = vadd.f32 %v1969_v0, %v1652_v58  ;;  %v1914_v30 = vpop.f32.mrb[30].mxu0 }
 0x2d8   : > { %v1915_v53 = vpop.f32.mrb[31].mxu0 }
 0x2d9   : > { %1772 = vst.msk [vmem:[%s3671_s9 + $0x30] sm:$0xff] %vm1765_vm0, %v1757_v27  ;;  %v1916_v59 = vadd.f32 %v1915_v53, %v1914_v30 }
 0x2db   : > { %v1657_v23 = vadd.f32 %v1916_v59, %v3664_v12 }
 0x2dc   : > { %v1970_v1 = vpop.f32.mrb[30].mxu1 }
 0x2dd   : > { %v1971_v39 = vpop.f32.mrb[31].mxu1 }
 0x2de   : > { %v1972_v16 = vadd.f32 %v1971_v39, %v1970_v1 }
 0x2e0   : > { %v1762_v43 = vadd.f32 %v1972_v16, %v1657_v23 }
 0x2e2   : > { %1773 = vst.msk [vmem:[%s3671_s9 + $0x38] sm:$0xff] %vm1765_vm0, %v1762_v43 }
 0x2e3 PF: > { %s15_s18 = sadd.s32 1, %s2244_s18  }
 0x2e4   : > { %p12_p4 = scmp.ge.s32.totalorder %s15_s18, 4  }
 0x2e6   :  { %14 = sbr.rel (!%p12_p4) target bundleno = 1 (0x1), region = 70 }

</bundles_post_ra>
